<compile_context>
chip_gen: v6e
topology: v6e:2x2x1
jax: 0.10.0
libtpu: 0.0.40
codegen_flags: <defaults>
</compile_context>

<pallas_src>
import functools

import jax
import jax.numpy as jnp
from jax.experimental import pallas as pl
from jax.experimental.pallas import tpu as pltpu


def fpn_kernel(x_ref, w_ref, b_ref, t_taus_ref, t_hats_ref,
               taus_ref, tau_hats_ref, ent_ref):
    x = x_ref[...]                       # (TB, E) f32, batch tile
    w = w_ref[...]                       # (E, N)  f32, VMEM resident
    b = b_ref[...]                       # (1, N)  f32, VMEM resident

    # Linear layer on the MXU: logits = x @ W + b
    logits = jnp.dot(x, w, preferred_element_type=jnp.float32) + b   # (TB, N)

    # Numerically stable log_softmax along the N axis (f32 on VPU/EUP).
    m = jnp.max(logits, axis=-1, keepdims=True)
    shifted = logits - m
    ex = jnp.exp(shifted)
    se = jnp.sum(ex, axis=-1, keepdims=True)
    log_probs = shifted - jnp.log(se)                                 # (TB, N)
    probs = ex / se                                                   # (TB, N)

    # taus[:, j] = sum_{k < j} probs[:, k]  -> one MXU matmul, no concat/slice.
    taus_ref[...] = jnp.dot(probs, t_taus_ref[...],
                            preferred_element_type=jnp.float32)       # (TB, N+1)

    # tau_hats[:, j] = sum_{k < j} probs[:, k] + 0.5 * probs[:, j]
    #               == (taus[:, :-1] + taus[:, 1:]) / 2
    tau_hats_ref[...] = jnp.dot(probs, t_hats_ref[...],
                                preferred_element_type=jnp.float32)   # (TB, N)

    # entropies = -(log_probs * probs).sum(-1, keepdim=True)
    ent_ref[...] = -jnp.sum(log_probs * probs, axis=-1, keepdims=True)


@functools.partial(jax.jit, static_argnames=("block_b",))
def fraction_proposal_forward(x, w, b, *, block_b=128):
    """x: (B, E), w: (E, N), b: (N,). Returns (taus, tau_hats, entropies)."""
    B, E = x.shape
    N = w.shape[1]
    dtype = x.dtype

    # Pad the batch up to a multiple of the block size (keeps the (8, 128)
    # block rule happy and the MXU M dimension dense); padded rows are cheap
    # and sliced away below.
    TB = block_b
    n_blocks = pl.cdiv(B, TB)
    Bp = n_blocks * TB
    if Bp != B:
        x = jnp.pad(x, ((0, Bp - B), (0, 0)))

    b2 = b.reshape(1, N).astype(dtype)

    # Triangular "cumsum" matrices, built once outside the kernel body so the
    # iota/compare/cast is not re-executed every grid step.
    k = jnp.arange(N, dtype=jnp.int32)[:, None]
    j1 = jnp.arange(N + 1, dtype=jnp.int32)[None, :]
    j2 = jnp.arange(N, dtype=jnp.int32)[None, :]
    t_taus = (k < j1).astype(dtype)                                   # (N, N+1)
    t_hats = (k < j2).astype(dtype) + 0.5 * (k == j2).astype(dtype)   # (N, N)

    out_shapes = (
        jax.ShapeDtypeStruct((Bp, N + 1), dtype),
        jax.ShapeDtypeStruct((Bp, N), dtype),
        jax.ShapeDtypeStruct((Bp, 1), dtype),
    )

    cost = pl.CostEstimate(
        flops=2 * Bp * E * N + 2 * Bp * N * (N + 1) + 2 * Bp * N * N,
        transcendentals=2 * Bp * N,
        bytes_accessed=(Bp * E + E * N + N * (2 * N + 1)
                        + Bp * (2 * N + 2)) * 4,
    )

    taus, tau_hats, ent = pl.pallas_call(
        fpn_kernel,
        out_shape=out_shapes,
        grid=(n_blocks,),
        in_specs=[
            pl.BlockSpec((TB, E), lambda i: (i, 0)),       # x: batch-tiled
            pl.BlockSpec((E, N), lambda i: (0, 0)),        # w: resident
            pl.BlockSpec((1, N), lambda i: (0, 0)),        # b: resident
            pl.BlockSpec((N, N + 1), lambda i: (0, 0)),    # T_taus: resident
            pl.BlockSpec((N, N), lambda i: (0, 0)),        # T_hats: resident
        ],
        out_specs=(
            pl.BlockSpec((TB, N + 1), lambda i: (i, 0)),
            pl.BlockSpec((TB, N), lambda i: (i, 0)),
            pl.BlockSpec((TB, 1), lambda i: (i, 0)),
        ),
        compiler_params=pltpu.CompilerParams(
            dimension_semantics=("parallel",),
        ),
        cost_estimate=cost,
    )(x, w, b2, t_taus, t_hats)

    if Bp != B:
        taus = taus[:B]
        tau_hats = tau_hats[:B]
        ent = ent[:B]
    return taus, tau_hats, ent


def _reference(x, w, b):
    logits = x @ w + b[None, :]
    log_probs = jax.nn.log_softmax(logits, axis=1)
    probs = jnp.exp(log_probs)
    tau_0 = jnp.zeros((x.shape[0], 1), x.dtype)
    taus = jnp.concatenate([tau_0, jnp.cumsum(probs, axis=1)], axis=1)
    tau_hats = (taus[:, :-1] + taus[:, 1:]) / 2.0
    entropies = -jnp.sum(log_probs * probs, axis=-1, keepdims=True)
    return taus, tau_hats, entropies


if __name__ == "__main__":
    # Module defaults: Linear(embedding_dim = 7*7*64 -> N = 32).  Batch of 256
    # gives two 128-row grid steps so the pipeline actually does something.
    B, E, N = 256, 7 * 7 * 64, 32

    key = jax.random.PRNGKey(0)
    kx, kw, kb = jax.random.split(key, 3)

    x = jax.random.normal(kx, (B, E), dtype=jnp.float32)

    # PyTorch-style uniform(-1/sqrt(E), 1/sqrt(E)) init for the Linear layer.
    bound = 1.0 / float(E) ** 0.5
    w = jax.random.uniform(kw, (E, N), minval=-bound, maxval=bound,
                           dtype=jnp.float32)
    b = jax.random.uniform(kb, (N,), minval=-bound, maxval=bound,
                           dtype=jnp.float32)

    taus, tau_hats, entropies = fraction_proposal_forward(x, w, b)
    jax.block_until_ready((taus, tau_hats, entropies))

    # Sanity-check against a pure-JAX reference.
    r_taus, r_tau_hats, r_ent = _reference(x, w, b)
    assert taus.shape == (B, N + 1)
    assert tau_hats.shape == (B, N)
    assert entropies.shape == (B, 1)
    assert jnp.allclose(taus, r_taus, atol=5e-5)
    assert jnp.allclose(tau_hats, r_tau_hats, atol=5e-5)
    assert jnp.allclose(entropies, r_ent, atol=5e-5)

    print("KERNEL_OK")
</pallas_src>

<mosaic_0001>
module attributes {stable_mosaic.version = 11 : i64} {
  func.func @fpn_kernel(%arg0: i32, %arg1: memref<128x3136xf32, #tpu.memory_space<vmem>>, %arg2: memref<3136x32xf32, #tpu.memory_space<vmem>>, %arg3: memref<1x32xf32, #tpu.memory_space<vmem>>, %arg4: memref<32x33xf32, #tpu.memory_space<vmem>>, %arg5: memref<32x32xf32, #tpu.memory_space<vmem>>, %arg6: memref<128x33xf32, #tpu.memory_space<vmem>>, %arg7: memref<128x32xf32, #tpu.memory_space<vmem>>, %arg8: memref<128x1xf32, #tpu.memory_space<vmem>>) attributes {dimension_semantics = [#tpu.dimension_semantics<parallel>], iteration_bounds = array<i64: 2>, scalar_prefetch = 0 : i64, scratch_operands = 0 : i64, tpu.core_type = #tpu.core_type<tc>, window_params = [{transform_indices = @transform_0, window_bounds = array<i64: 128, 3136>}, {pipeline_mode = #tpu.pipeline_mode<synchronous>, transform_indices = @transform_1, window_bounds = array<i64: 3136, 32>}, {pipeline_mode = #tpu.pipeline_mode<synchronous>, transform_indices = @transform_2, window_bounds = array<i64: 1, 32>}, {pipeline_mode = #tpu.pipeline_mode<synchronous>, transform_indices = @transform_3, window_bounds = array<i64: 32, 33>}, {pipeline_mode = #tpu.pipeline_mode<synchronous>, transform_indices = @transform_4, window_bounds = array<i64: 32, 32>}, {transform_indices = @transform_5, window_bounds = array<i64: 128, 33>}, {transform_indices = @transform_6, window_bounds = array<i64: 128, 32>}, {transform_indices = @transform_7, window_bounds = array<i64: 128, 1>}]} {
    %c0 = arith.constant 0 : index
    %c0_0 = arith.constant 0 : index
    %0 = vector.load %arg1[%c0, %c0_0] : memref<128x3136xf32, #tpu.memory_space<vmem>>, vector<128x3136xf32>
    %c0_1 = arith.constant 0 : index
    %c0_2 = arith.constant 0 : index
    %1 = vector.load %arg2[%c0_1, %c0_2] : memref<3136x32xf32, #tpu.memory_space<vmem>>, vector<3136x32xf32>
    %c0_3 = arith.constant 0 : index
    %c0_4 = arith.constant 0 : index
    %2 = vector.load %arg3[%c0_3, %c0_4] : memref<1x32xf32, #tpu.memory_space<vmem>>, vector<1x32xf32>
    %cst = arith.constant dense<0.000000e+00> : vector<128x32xf32>
    %3 = tpu.matmul %0, %1, %cst {dimension_numbers = #tpu.dot_dimension_numbers<[1], [0], [0], [1], [0, 0, 1, 1], [], []>} : vector<128x3136xf32>, vector<3136x32xf32>, vector<128x32xf32> -> vector<128x32xf32>
    %4 = vector.broadcast %2 : vector<1x32xf32> to vector<128x32xf32>
    %5 = arith.addf %3, %4 : vector<128x32xf32>
    %cst_5 = arith.constant dense<0xFF800000> : vector<128xf32>
    %6 = vector.multi_reduction <maximumf>, %5, %cst_5 [1] : vector<128x32xf32> to vector<128xf32>
    %7 = vector.shape_cast %6 : vector<128xf32> to vector<128x1xf32>
    %8 = vector.broadcast %7 : vector<128x1xf32> to vector<128x32xf32>
    %9 = arith.subf %5, %8 : vector<128x32xf32>
    %10 = math.exp %9 : vector<128x32xf32>
    %cst_6 = arith.constant dense<0.000000e+00> : vector<128xf32>
    %11 = vector.multi_reduction <add>, %10, %cst_6 [1] : vector<128x32xf32> to vector<128xf32>
    %12 = vector.shape_cast %11 : vector<128xf32> to vector<128x1xf32>
    %13 = math.log %12 : vector<128x1xf32>
    %14 = vector.broadcast %13 : vector<128x1xf32> to vector<128x32xf32>
    %15 = arith.subf %9, %14 : vector<128x32xf32>
    %16 = vector.broadcast %12 : vector<128x1xf32> to vector<128x32xf32>
    %17 = arith.divf %10, %16 : vector<128x32xf32>
    %c0_7 = arith.constant 0 : index
    %c0_8 = arith.constant 0 : index
    %18 = vector.load %arg4[%c0_7, %c0_8] : memref<32x33xf32, #tpu.memory_space<vmem>>, vector<32x33xf32>
    %cst_9 = arith.constant dense<0.000000e+00> : vector<128x33xf32>
    %19 = tpu.matmul %17, %18, %cst_9 {dimension_numbers = #tpu.dot_dimension_numbers<[1], [0], [0], [1], [0, 0, 1, 1], [], []>} : vector<128x32xf32>, vector<32x33xf32>, vector<128x33xf32> -> vector<128x33xf32>
    %c0_10 = arith.constant 0 : index
    %c0_11 = arith.constant 0 : index
    %20 = vector.load %arg6[%c0_10, %c0_11] : memref<128x33xf32, #tpu.memory_space<vmem>>, vector<128x33xf32>
    tpu.vector_store %arg6[%c0_10, %c0_11], %19 {strides = array<i32>} : memref<128x33xf32, #tpu.memory_space<vmem>>, vector<128x33xf32>,
    %c0_12 = arith.constant 0 : index
    %c0_13 = arith.constant 0 : index
    %21 = vector.load %arg5[%c0_12, %c0_13] : memref<32x32xf32, #tpu.memory_space<vmem>>, vector<32x32xf32>
    %cst_14 = arith.constant dense<0.000000e+00> : vector<128x32xf32>
    %22 = tpu.matmul %17, %21, %cst_14 {dimension_numbers = #tpu.dot_dimension_numbers<[1], [0], [0], [1], [0, 0, 1, 1], [], []>} : vector<128x32xf32>, vector<32x32xf32>, vector<128x32xf32> -> vector<128x32xf32>
    %c0_15 = arith.constant 0 : index
    %c0_16 = arith.constant 0 : index
    %23 = vector.load %arg7[%c0_15, %c0_16] : memref<128x32xf32, #tpu.memory_space<vmem>>, vector<128x32xf32>
    tpu.vector_store %arg7[%c0_15, %c0_16], %22 {strides = array<i32>} : memref<128x32xf32, #tpu.memory_space<vmem>>, vector<128x32xf32>,
    %24 = arith.mulf %15, %17 : vector<128x32xf32>
    %cst_17 = arith.constant dense<0.000000e+00> : vector<128xf32>
    %25 = vector.multi_reduction <add>, %24, %cst_17 [1] : vector<128x32xf32> to vector<128xf32>
    %26 = vector.shape_cast %25 : vector<128xf32> to vector<128x1xf32>
    %cst_18 = arith.constant 0.000000e+00 : f32
    %27 = vector.broadcast %cst_18 : f32 to vector<128x1xf32>
    %28 = arith.subf %27, %26 : vector<128x1xf32>
    %c0_19 = arith.constant 0 : index
    %c0_20 = arith.constant 0 : index
    %29 = vector.load %arg8[%c0_19, %c0_20] : memref<128x1xf32, #tpu.memory_space<vmem>>, vector<128x1xf32>
    tpu.vector_store %arg8[%c0_19, %c0_20], %28 {strides = array<i32>} : memref<128x1xf32, #tpu.memory_space<vmem>>, vector<128x1xf32>,
    return
  }
  func.func @transform_0(%arg0: i32) -> (i32, i32) {
    %c0_i32 = arith.constant 0 : i32
    %c0_i32_0 = arith.constant 0 : i32
    return %arg0, %c0_i32 : i32, i32
  }
  func.func @transform_1(%arg0: i32) -> (i32, i32) {
    %c0_i32 = arith.constant 0 : i32
    %c0_i32_0 = arith.constant 0 : i32
    %c0_i32_1 = arith.constant 0 : i32
    return %c0_i32, %c0_i32_0 : i32, i32
  }
  func.func @transform_2(%arg0: i32) -> (i32, i32) {
    %c0_i32 = arith.constant 0 : i32
    %c0_i32_0 = arith.constant 0 : i32
    %c0_i32_1 = arith.constant 0 : i32
    return %c0_i32, %c0_i32_0 : i32, i32
  }
  func.func @transform_3(%arg0: i32) -> (i32, i32) {
    %c0_i32 = arith.constant 0 : i32
    %c0_i32_0 = arith.constant 0 : i32
    %c0_i32_1 = arith.constant 0 : i32
    return %c0_i32, %c0_i32_0 : i32, i32
  }
  func.func @transform_4(%arg0: i32) -> (i32, i32) {
    %c0_i32 = arith.constant 0 : i32
    %c0_i32_0 = arith.constant 0 : i32
    %c0_i32_1 = arith.constant 0 : i32
    return %c0_i32, %c0_i32_0 : i32, i32
  }
  func.func @transform_5(%arg0: i32) -> (i32, i32) {
    %c0_i32 = arith.constant 0 : i32
    %c0_i32_0 = arith.constant 0 : i32
    return %arg0, %c0_i32 : i32, i32
  }
  func.func @transform_6(%arg0: i32) -> (i32, i32) {
    %c0_i32 = arith.constant 0 : i32
    %c0_i32_0 = arith.constant 0 : i32
    return %arg0, %c0_i32 : i32, i32
  }
  func.func @transform_7(%arg0: i32) -> (i32, i32) {
    %c0_i32 = arith.constant 0 : i32
    %c0_i32_0 = arith.constant 0 : i32
    return %arg0, %c0_i32 : i32, i32
  }
}

</mosaic_0001>

<bundles_post_ra>
// kernel: fraction_proposal_forward.1
= control target key start
LH: loop header
LB: loop body
LE: loop exit
PB: predicated region body
PF: predicated region fallthrough
CT: control target
= control target key end

     0   :  { %s5231_s24 = smov 0   ;;  %s7703_s0 = inlined_call_operand.vmem [shape: f32[256,3136], index: 0, kind: input, shape index: {}]   ;;  %s7704_s1 = inlined_call_operand.vmem [shape: f32[3136,32], index: 1, kind: input, shape index: {}]   ;;  %s7705_s2 = inlined_call_operand.vmem [shape: f32[1,32], index: 2, kind: input, shape index: {}]   ;;  %s7706_s3 = inlined_call_operand.vmem [shape: f32[32,33], index: 3, kind: input, shape index: {}]   ;;  %s7707_s4 = inlined_call_operand.vmem [shape: f32[32,32], index: 4, kind: input, shape index: {}]   ;;  %s7708_s5 = inlined_call_operand.vmem [shape: f32[256,33], index: 5, kind: output, shape index: {0}]   ;;  %s7709_s6 = inlined_call_operand.vmem [shape: f32[256,32], index: 6, kind: output, shape index: {1}]   ;;  %s7710_s7 = inlined_call_operand.vmem [shape: f32[256,1], index: 7, kind: output, shape index: {2}]  }
   0x1 LB: > { %s3870_s25 = sadd.s32 4294967295, %s5189_s24   ;;  %p3874_p0 = scmp.ge.s32.totalorder %s5189_s24, 1  ;;  %s5189_s24 = sphi %s5231_s24, %s18_s24  }
   0x2   : > { %p244_p1 = scmp.lt.s32.totalorder %s5189_s24, 3 }
   0x4   : > { %p245_p2 = pnand %p3874_p0, %p244_p1 }
   0x6   : > { %248 = sbr.rel (%p245_p2) target bundleno = 1171 (0x493), region = 40 }
   0xb   : > { %v743_v0 = vld [vmem:[%s7704_s1 + $0xf8] sm:$0xff]  ;;  %v742_v4 = vld [vmem:[%s7704_s1 + $0xf0] sm:$0xff]  ;;  %v741_v8 = vld [vmem:[%s7704_s1 + $0xe8] sm:$0xff]  ;;  %s5325_s17 = sshll.u32 %s3870_s25, 4  ;;  %vm1111_vm0 = vcmask 523264   ;;  %vm3045_vm1 = vcmask 261120  }
   0xc   : > { %v775_v1 = vld [vmem:[%s7704_s1 + $0x1f8] sm:$0xff]  ;;  %3934 = vmatprep.subr.mxu0 %v743_v0  ;;  %v774_v5 = vld [vmem:[%s7704_s1 + $0x1f0] sm:$0xff]  ;;  %v773_v9 = vld [vmem:[%s7704_s1 + $0x1e8] sm:$0xff]  ;;  %p288_p3 = scmp.lt.s32.totalorder %s5325_s17, 31  ;;  %vm3729_vm2 = vcmask 7168   ;;  %vm3467_vm3 = vcmask 269312  }
   0xd   : > { %v727_v2 = vld [vmem:[%s7704_s1 + $0x78] sm:$0xff]  ;;  %4014 = vmatprep.subr.mxu1 %v775_v1  ;;  %v726_v6 = vld [vmem:[%s7704_s1 + $0x70] sm:$0xff]  ;;  %v725_v10 = vld [vmem:[%s7704_s1 + $0x68] sm:$0xff] }
   0xe   : > { %v759_v3 = vld [vmem:[%s7704_s1 + $0x178] sm:$0xff]  ;;  %3935 = vmatpush3.msra.mxu0 %v727_v2  ;;  %v758_v7 = vld [vmem:[%s7704_s1 + $0x170] sm:$0xff]  ;;  %v757_v11 = vld [vmem:[%s7704_s1 + $0x168] sm:$0xff]  ;;  %s7758_s17 = smov (!%p288_p3, %s5325_s17), 31 }
   0xf   : > { %4015 = vmatpush3.msra.mxu1 %v759_v3  ;;  %3936 = vmatprep.subr.mxu0 %v742_v4  ;;  %v740_v12 = vld [vmem:[%s7704_s1 + $0xe0] sm:$0xff]  ;;  %v739_v16 = vld [vmem:[%s7704_s1 + $0xd8] sm:$0xff]  ;;  %v738_v20 = vld [vmem:[%s7704_s1 + $0xd0] sm:$0xff]  ;;  %s5078_s20 = smul.u32 200, %s7758_s17  ;;  %s7584_s25 = sshll.u32 %s7758_s17, 3 }
  0x10   : > { %4016 = vmatprep.subr.mxu1 %v774_v5  ;;  %3937 = vmatpush3.msra.mxu0 %v726_v6  ;;  %v772_v13 = vld [vmem:[%s7704_s1 + $0x1e0] sm:$0xff]  ;;  %v771_v17 = vld [vmem:[%s7704_s1 + $0x1d8] sm:$0xff]  ;;  %v770_v21 = vld [vmem:[%s7704_s1 + $0x1d0] sm:$0xff]  ;;  %s7590_s28 = scalar_lea.vmem %s7710_s7, %s7584_s25  ;;  %s7634_s9 = scalar_lea.vmem %s7709_s6, %s7584_s25 }
  0x11   : > { %4017 = vmatpush3.msra.mxu1 %v758_v7  ;;  %3938 = vmatprep.subr.mxu0 %v741_v8  ;;  %v724_v14 = vld [vmem:[%s7704_s1 + $0x60] sm:$0xff]  ;;  %v723_v18 = vld [vmem:[%s7704_s1 + $0x58] sm:$0xff]  ;;  %v722_v22 = vld [vmem:[%s7704_s1 + $0x50] sm:$0xff]  ;;  %s5427_s18 = scalar_lea.vmem %s7703_s0, %s5078_s20 }
  0x12   : > { %4018 = vmatprep.subr.mxu1 %v773_v9  ;;  %v756_v15 = vld [vmem:[%s7704_s1 + $0x160] sm:$0xff]  ;;  %3939 = vmatpush3.msra.mxu0 %v725_v10  ;;  %v755_v19 = vld [vmem:[%s7704_s1 + $0x158] sm:$0xff]  ;;  %v754_v23 = vld [vmem:[%s7704_s1 + $0x150] sm:$0xff] }
  0x13   : > { %4019 = vmatpush3.msra.mxu1 %v757_v11  ;;  %3940 = vmatprep.subr.mxu0 %v740_v12  ;;  %v737_v24 = vld [vmem:[%s7704_s1 + $0xc8] sm:$0xff]  ;;  %v736_v28 = vld [vmem:[%s7704_s1 + $0xc0] sm:$0xff]  ;;  %v735_v32 = vld [vmem:[%s7704_s1 + $0xb8] sm:$0xff] }
  0x14   : > { %4020 = vmatprep.subr.mxu1 %v772_v13  ;;  %3941 = vmatpush3.msra.mxu0 %v724_v14  ;;  %v769_v25 = vld [vmem:[%s7704_s1 + $0x1c8] sm:$0xff]  ;;  %v768_v29 = vld [vmem:[%s7704_s1 + $0x1c0] sm:$0xff]  ;;  %v767_v33 = vld [vmem:[%s7704_s1 + $0x1b8] sm:$0xff] }
  0x15   : > { %4021 = vmatpush3.msra.mxu1 %v756_v15  ;;  %3942 = vmatprep.subr.mxu0 %v739_v16  ;;  %v721_v26 = vld [vmem:[%s7704_s1 + $0x48] sm:$0xff]  ;;  %v720_v30 = vld [vmem:[%s7704_s1 + $0x40] sm:$0xff]  ;;  %v719_v34 = vld [vmem:[%s7704_s1 + $0x38] sm:$0xff] }
  0x16   : > { %4022 = vmatprep.subr.mxu1 %v771_v17  ;;  %3943 = vmatpush3.msra.mxu0 %v723_v18  ;;  %v753_v27 = vld [vmem:[%s7704_s1 + $0x148] sm:$0xff]  ;;  %v752_v31 = vld [vmem:[%s7704_s1 + $0x140] sm:$0xff]  ;;  %v751_v35 = vld [vmem:[%s7704_s1 + $0x138] sm:$0xff] }
  0x17   : > { %4023 = vmatpush3.msra.mxu1 %v755_v19  ;;  %3944 = vmatprep.subr.mxu0 %v738_v20  ;;  %v734_v36 = vld [vmem:[%s7704_s1 + $0xb0] sm:$0xff]  ;;  %v733_v40 = vld [vmem:[%s7704_s1 + $0xa8] sm:$0xff]  ;;  %v732_v44 = vld [vmem:[%s7704_s1 + $0xa0] sm:$0xff] }
  0x18   : > { %4024 = vmatprep.subr.mxu1 %v770_v21  ;;  %3945 = vmatpush3.msra.mxu0 %v722_v22  ;;  %v766_v37 = vld [vmem:[%s7704_s1 + $0x1b0] sm:$0xff]  ;;  %v765_v41 = vld [vmem:[%s7704_s1 + $0x1a8] sm:$0xff]  ;;  %v764_v45 = vld [vmem:[%s7704_s1 + $0x1a0] sm:$0xff] }
  0x19   : > { %4025 = vmatpush3.msra.mxu1 %v754_v23  ;;  %3946 = vmatprep.subr.mxu0 %v737_v24  ;;  %v718_v38 = vld [vmem:[%s7704_s1 + $0x30] sm:$0xff]  ;;  %v717_v42 = vld [vmem:[%s7704_s1 + $0x28] sm:$0xff]  ;;  %v716_v46 = vld [vmem:[%s7704_s1 + $0x20] sm:$0xff] }
  0x1a   : > { %4026 = vmatprep.subr.mxu1 %v769_v25  ;;  %3947 = vmatpush3.msra.mxu0 %v721_v26  ;;  %v750_v39 = vld [vmem:[%s7704_s1 + $0x130] sm:$0xff]  ;;  %v749_v43 = vld [vmem:[%s7704_s1 + $0x128] sm:$0xff]  ;;  %v748_v47 = vld [vmem:[%s7704_s1 + $0x120] sm:$0xff] }
  0x1b   : > { %4027 = vmatpush3.msra.mxu1 %v753_v27  ;;  %3948 = vmatprep.subr.mxu0 %v736_v28  ;;  %v731_v48 = vld [vmem:[%s7704_s1 + $0x98] sm:$0xff]  ;;  %v730_v52 = vld [vmem:[%s7704_s1 + $0x90] sm:$0xff]  ;;  %v729_v56 = vld [vmem:[%s7704_s1 + $0x88] sm:$0xff] }
  0x1c   : > { %4028 = vmatprep.subr.mxu1 %v768_v29  ;;  %3949 = vmatpush3.msra.mxu0 %v720_v30  ;;  %v763_v49 = vld [vmem:[%s7704_s1 + $0x198] sm:$0xff]  ;;  %v762_v53 = vld [vmem:[%s7704_s1 + $0x190] sm:$0xff]  ;;  %v761_v57 = vld [vmem:[%s7704_s1 + $0x188] sm:$0xff] }
  0x1d   : > { %4029 = vmatpush3.msra.mxu1 %v752_v31  ;;  %3950 = vmatprep.subr.mxu0 %v735_v32  ;;  %v715_v50 = vld [vmem:[%s7704_s1 + $0x18] sm:$0xff]  ;;  %v714_v54 = vld [vmem:[%s7704_s1 + $0x10] sm:$0xff]  ;;  %v713_v58 = vld [vmem:[%s7704_s1 + $0x8] sm:$0xff] }
  0x1e   : > { %4030 = vmatprep.subr.mxu1 %v767_v33  ;;  %3951 = vmatpush3.msra.mxu0 %v719_v34  ;;  %v747_v51 = vld [vmem:[%s7704_s1 + $0x118] sm:$0xff]  ;;  %v746_v55 = vld [vmem:[%s7704_s1 + $0x110] sm:$0xff]  ;;  %v745_v59 = vld [vmem:[%s7704_s1 + $0x108] sm:$0xff] }
  0x1f   : > { %4031 = vmatpush3.msra.mxu1 %v751_v35  ;;  %3952 = vmatprep.subr.mxu0 %v734_v36  ;;  %v728_v60 = vld [vmem:[%s7704_s1 + $0x80] sm:$0xff]  ;;  %v313_v63 = vld [vmem:[%s5427_s18 + $0x8] sm:$0xff]  ;;  %v315_v1 = vld [vmem:[%s5427_s18 + $0x18] sm:$0xff] }
  0x20   : > { %4032 = vmatprep.subr.mxu1 %v766_v37  ;;  %3953 = vmatpush3.msra.mxu0 %v718_v38  ;;  %v760_v61 = vld [vmem:[%s7704_s1 + $0x180] sm:$0xff]  ;;  %v314_v3 = vld [vmem:[%s5427_s18 + $0x10] sm:$0xff]  ;;  %v807_v4 = vld [vmem:[%s7704_s1 + $0x2f8] sm:$0xff] }
  0x21   : > { %4033 = vmatpush3.msra.mxu1 %v750_v39  ;;  %3954 = vmatprep.subr.mxu0 %v733_v40  ;;  %v712_v62 = vld [vmem:[%s7704_s1] sm:$0xff]  ;;  %v338_v5 = vld [vmem:[%s5427_s18 + $0xd0] sm:$0xff]  ;;  %v791_v6 = vld [vmem:[%s7704_s1 + $0x278] sm:$0xff] }
  0x22   : > { %4034 = vmatprep.subr.mxu1 %v765_v41  ;;  %3955 = vmatpush3.msra.mxu0 %v717_v42  ;;  %v744_v0 = vld [vmem:[%s7704_s1 + $0x100] sm:$0xff]  ;;  %v806_v8 = vld [vmem:[%s7704_s1 + $0x2f0] sm:$0xff]  ;;  %v839_v9 = vld [vmem:[%s7704_s1 + $0x3f8] sm:$0xff] }
  0x23   : > { %4035 = vmatpush3.msra.mxu1 %v749_v43  ;;  %3956 = vmatprep.subr.mxu0 %v732_v44  ;;  %v312_v2 = vld [vmem:[%s5427_s18] sm:$0xff]  ;;  %v337_v10 = vld [vmem:[%s5427_s18 + $0xc8] sm:$0xff]  ;;  %v339_v11 = vld [vmem:[%s5427_s18 + $0xd8] sm:$0xff] }
  0x24   : > { %4036 = vmatprep.subr.mxu1 %v764_v45  ;;  %3957 = vmatpush3.msra.mxu0 %v716_v46  ;;  %v340_v7 = vld [vmem:[%s5427_s18 + $0xe0] sm:$0xff]  ;;  %v790_v12 = vld [vmem:[%s7704_s1 + $0x270] sm:$0xff]  ;;  %v363_v13 = vld [vmem:[%s5427_s18 + $0x198] sm:$0xff] }
  0x25   : > { %4037 = vmatpush3.msra.mxu1 %v748_v47  ;;  %3958 = vmatprep.subr.mxu0 %v731_v48  ;;  %v365_v14 = vld [vmem:[%s5427_s18 + $0x1a8] sm:$0xff]  ;;  %v823_v17 = vld [vmem:[%s7704_s1 + $0x378] sm:$0xff]  ;;  %v362_v18 = vld [vmem:[%s5427_s18 + $0x190] sm:$0xff] }
  0x26   : > { %4038 = vmatprep.subr.mxu1 %v763_v49  ;;  %3959 = vmatpush3.msra.mxu0 %v715_v50  ;;  %v805_v15 = vld [vmem:[%s7704_s1 + $0x2e8] sm:$0xff]  ;;  %v364_v19 = vld [vmem:[%s5427_s18 + $0x1a0] sm:$0xff]  ;;  %v390_v21 = vld [vmem:[%s5427_s18 + $0x270] sm:$0xff] }
  0x27   : > { %4039 = vmatpush3.msra.mxu1 %v747_v51  ;;  %3960 = vmatprep.subr.mxu0 %v730_v52  ;;  %v789_v16 = vld [vmem:[%s7704_s1 + $0x268] sm:$0xff]  ;;  %v388_v20 = vld [vmem:[%s5427_s18 + $0x260] sm:$0xff]  ;;  %v838_v23 = vld [vmem:[%s7704_s1 + $0x3f0] sm:$0xff] }
  0x28   : > { %4040 = vmatprep.subr.mxu1 %v762_v53  ;;  %3961 = vmatpush3.msra.mxu0 %v714_v54  ;;  %v804_v22 = vld [vmem:[%s7704_s1 + $0x2e0] sm:$0xff]  ;;  %v822_v25 = vld [vmem:[%s7704_s1 + $0x370] sm:$0xff]  ;;  %v387_v26 = vld [vmem:[%s5427_s18 + $0x258] sm:$0xff] }
  0x29   : > { %4041 = vmatpush3.msra.mxu1 %v746_v55  ;;  %3962 = vmatprep.subr.mxu0 %v729_v56  ;;  %v788_v24 = vld [vmem:[%s7704_s1 + $0x260] sm:$0xff]  ;;  %v389_v27 = vld [vmem:[%s5427_s18 + $0x268] sm:$0xff]  ;;  %v415_v29 = vld [vmem:[%s5427_s18 + $0x338] sm:$0xff] }
  0x2a   : > { %4042 = vmatprep.subr.mxu1 %v761_v57  ;;  %3963 = vmatpush3.msra.mxu0 %v713_v58  ;;  %v413_v28 = vld [vmem:[%s5427_s18 + $0x328] sm:$0xff]  ;;  %v803_v30 = vld [vmem:[%s7704_s1 + $0x2d8] sm:$0xff]  ;;  %v412_v34 = vld [vmem:[%s5427_s18 + $0x320] sm:$0xff] }
  0x2b   : > { %4043 = vmatpush3.msra.mxu1 %v745_v59  ;;  %3964 = vmatprep.subr.mxu0 %v728_v60  ;;  %v837_v31 = vld [vmem:[%s7704_s1 + $0x3e8] sm:$0xff]  ;;  %v787_v32 = vld [vmem:[%s7704_s1 + $0x258] sm:$0xff]  ;;  %v414_v35 = vld [vmem:[%s5427_s18 + $0x330] sm:$0xff] }
  0x2c   : > { %4044 = vmatprep.subr.mxu1 %v760_v61  ;;  %3965 = vmatpush3.msra.mxu0 %v712_v62  ;;  %v821_v33 = vld [vmem:[%s7704_s1 + $0x368] sm:$0xff]  ;;  %v438_v36 = vld [vmem:[%s5427_s18 + $0x3f0] sm:$0xff]  ;;  %v440_v37 = vld [vmem:[%s5427_s18 + $0x400] sm:$0xff] }
  0x2d   : > { %1224 = vmatprep.mubr.f32.mxu0 %v313_v63  ;;  %4045 = vmatpush3.msra.mxu1 %v744_v0  ;;  %v802_v38 = vld [vmem:[%s7704_s1 + $0x2d0] sm:$0xff]  ;;  %v836_v39 = vld [vmem:[%s7704_s1 + $0x3e0] sm:$0xff]  ;;  %v437_v42 = vld [vmem:[%s5427_s18 + $0x3e8] sm:$0xff] }
  0x2e   : > { %1369 = vmatprep.mubr.f32.mxu1 %v315_v1  ;;  %1225 = vmatmul.mubr.f32.vlgmr.msra.gmra.mxu0 %v312_v2  ;;  %v786_v40 = vld [vmem:[%s7704_s1 + $0x250] sm:$0xff]  ;;  %v820_v41 = vld [vmem:[%s7704_s1 + $0x360] sm:$0xff]  ;;  %v439_v43 = vld [vmem:[%s5427_s18 + $0x3f8] sm:$0xff] }
  0x2f   : > { %1370 = vmatmul.mubr.f32.vlgmr.msra.gmra.mxu1 %v314_v3  ;;  %4094 = vmatprep.subr.mxu0 %v807_v4  ;;  %v463_v44 = vld [vmem:[%s5427_s18 + $0x4b8] sm:$0xff]  ;;  %v465_v45 = vld [vmem:[%s5427_s18 + $0x4c8] sm:$0xff]  ;;  %v462_v50 = vld [vmem:[%s5427_s18 + $0x4b0] sm:$0xff] }
  0x30   : > { %1229 = vmatprep.mubr.f32.mxu0 %v338_v5  ;;  %4095 = vmatpush3.msra.mxu0 %v791_v6  ;;  %v801_v46 = vld [vmem:[%s7704_s1 + $0x2c8] sm:$0xff]  ;;  %v835_v47 = vld [vmem:[%s7704_s1 + $0x3d8] sm:$0xff]  ;;  %v464_v51 = vld [vmem:[%s5427_s18 + $0x4c0] sm:$0xff] }
  0x31   : > { %1374 = vmatprep.mubr.f32.mxu1 %v340_v7  ;;  %4096 = vmatprep.subr.mxu0 %v806_v8  ;;  %v785_v48 = vld [vmem:[%s7704_s1 + $0x248] sm:$0xff]  ;;  %v819_v49 = vld [vmem:[%s7704_s1 + $0x358] sm:$0xff]  ;;  %v488_v52 = vld [vmem:[%s5427_s18 + $0x580] sm:$0xff] }
  0x32   : > { %4174 = vmatprep.subr.mxu1 %v839_v9  ;;  %1230 = vmatmul.mubr.f32.gmra.mxu0 %v337_v10  ;;  %v490_v53 = vld [vmem:[%s5427_s18 + $0x590] sm:$0xff]  ;;  %v800_v54 = vld [vmem:[%s7704_s1 + $0x2c0] sm:$0xff]  ;;  %v487_v58 = vld [vmem:[%s5427_s18 + $0x578] sm:$0xff] }
  0x33   : > { %1375 = vmatmul.mubr.f32.gmra.mxu1 %v339_v11  ;;  %4097 = vmatpush3.msra.mxu0 %v790_v12  ;;  %v834_v55 = vld [vmem:[%s7704_s1 + $0x3d0] sm:$0xff]  ;;  %v784_v56 = vld [vmem:[%s7704_s1 + $0x240] sm:$0xff]  ;;  %v489_v59 = vld [vmem:[%s5427_s18 + $0x588] sm:$0xff] }
  0x34   : > { %1234 = vmatprep.mubr.f32.mxu0 %v363_v13  ;;  %1379 = vmatprep.mubr.f32.mxu1 %v365_v14  ;;  %v818_v57 = vld [vmem:[%s7704_s1 + $0x350] sm:$0xff]  ;;  %v513_v60 = vld [vmem:[%s5427_s18 + $0x648] sm:$0xff]  ;;  %v515_v61 = vld [vmem:[%s5427_s18 + $0x658] sm:$0xff] }
  0x35   : > { %4098 = vmatprep.subr.mxu0 %v805_v15  ;;  %4175 = vmatpush3.msra.mxu1 %v823_v17  ;;  %v799_v62 = vld [vmem:[%s7704_s1 + $0x2b8] sm:$0xff]  ;;  %v833_v63 = vld [vmem:[%s7704_s1 + $0x3c8] sm:$0xff]  ;;  %v512_v2 = vld [vmem:[%s5427_s18 + $0x640] sm:$0xff] }
  0x36   : > { %4099 = vmatpush3.msra.mxu0 %v789_v16  ;;  %4176 = vmatprep.subr.mxu1 %v838_v23  ;;  %v783_v0 = vld [vmem:[%s7704_s1 + $0x238] sm:$0xff]  ;;  %v817_v1 = vld [vmem:[%s7704_s1 + $0x348] sm:$0xff]  ;;  %v514_v3 = vld [vmem:[%s5427_s18 + $0x650] sm:$0xff] }
  0x37   : > { %1235 = vmatmul.mubr.f32.gmra.mxu0 %v362_v18  ;;  %1380 = vmatmul.mubr.f32.gmra.mxu1 %v364_v19  ;;  %v538_v4 = vld [vmem:[%s5427_s18 + $0x710] sm:$0xff]  ;;  %v540_v5 = vld [vmem:[%s5427_s18 + $0x720] sm:$0xff]  ;;  %v537_v10 = vld [vmem:[%s5427_s18 + $0x708] sm:$0xff] }
  0x38   : > { %1239 = vmatprep.mubr.f32.mxu0 %v388_v20  ;;  %1384 = vmatprep.mubr.f32.mxu1 %v390_v21  ;;  %v798_v6 = vld [vmem:[%s7704_s1 + $0x2b0] sm:$0xff]  ;;  %v832_v7 = vld [vmem:[%s7704_s1 + $0x3c0] sm:$0xff]  ;;  %v539_v11 = vld [vmem:[%s5427_s18 + $0x718] sm:$0xff] }
  0x39   : > { %4100 = vmatprep.subr.mxu0 %v804_v22  ;;  %4177 = vmatpush3.msra.mxu1 %v822_v25  ;;  %v782_v8 = vld [vmem:[%s7704_s1 + $0x230] sm:$0xff]  ;;  %v816_v9 = vld [vmem:[%s7704_s1 + $0x340] sm:$0xff]  ;;  %v563_v12 = vld [vmem:[%s5427_s18 + $0x7d8] sm:$0xff] }
  0x3a   : > { %4101 = vmatpush3.msra.mxu0 %v788_v24  ;;  %4178 = vmatprep.subr.mxu1 %v837_v31  ;;  %v565_v13 = vld [vmem:[%s5427_s18 + $0x7e8] sm:$0xff]  ;;  %v831_v15 = vld [vmem:[%s7704_s1 + $0x3b8] sm:$0xff]  ;;  %v562_v18 = vld [vmem:[%s5427_s18 + $0x7d0] sm:$0xff] }
  0x3b   : > { %1240 = vmatmul.mubr.f32.gmra.mxu0 %v387_v26  ;;  %1385 = vmatmul.mubr.f32.gmra.mxu1 %v389_v27  ;;  %v797_v14 = vld [vmem:[%s7704_s1 + $0x2a8] sm:$0xff]  ;;  %v815_v17 = vld [vmem:[%s7704_s1 + $0x338] sm:$0xff]  ;;  %v564_v19 = vld [vmem:[%s5427_s18 + $0x7e0] sm:$0xff] }
  0x3c   : > { %1244 = vmatprep.mubr.f32.mxu0 %v413_v28  ;;  %1389 = vmatprep.mubr.f32.mxu1 %v415_v29  ;;  %v781_v16 = vld [vmem:[%s7704_s1 + $0x228] sm:$0xff]  ;;  %v588_v20 = vld [vmem:[%s5427_s18 + $0x8a0] sm:$0xff]  ;;  %v590_v21 = vld [vmem:[%s5427_s18 + $0x8b0] sm:$0xff] }
  0x3d   : > { %4102 = vmatprep.subr.mxu0 %v803_v30  ;;  %4179 = vmatpush3.msra.mxu1 %v821_v33  ;;  %v796_v22 = vld [vmem:[%s7704_s1 + $0x2a0] sm:$0xff]  ;;  %v830_v23 = vld [vmem:[%s7704_s1 + $0x3b0] sm:$0xff]  ;;  %v587_v26 = vld [vmem:[%s5427_s18 + $0x898] sm:$0xff] }
  0x3e   : > { %4103 = vmatpush3.msra.mxu0 %v787_v32  ;;  %4180 = vmatprep.subr.mxu1 %v836_v39  ;;  %v780_v24 = vld [vmem:[%s7704_s1 + $0x220] sm:$0xff]  ;;  %v814_v25 = vld [vmem:[%s7704_s1 + $0x330] sm:$0xff]  ;;  %v589_v27 = vld [vmem:[%s5427_s18 + $0x8a8] sm:$0xff] }
  0x3f   : > { %1245 = vmatmul.mubr.f32.gmra.mxu0 %v412_v34  ;;  %1390 = vmatmul.mubr.f32.gmra.mxu1 %v414_v35  ;;  %v613_v28 = vld [vmem:[%s5427_s18 + $0x968] sm:$0xff]  ;;  %v615_v29 = vld [vmem:[%s5427_s18 + $0x978] sm:$0xff]  ;;  %v612_v34 = vld [vmem:[%s5427_s18 + $0x960] sm:$0xff] }
  0x40   : > { %1249 = vmatprep.mubr.f32.mxu0 %v438_v36  ;;  %1394 = vmatprep.mubr.f32.mxu1 %v440_v37  ;;  %v795_v30 = vld [vmem:[%s7704_s1 + $0x298] sm:$0xff]  ;;  %v829_v31 = vld [vmem:[%s7704_s1 + $0x3a8] sm:$0xff]  ;;  %v614_v35 = vld [vmem:[%s5427_s18 + $0x970] sm:$0xff] }
  0x41   : > { %4104 = vmatprep.subr.mxu0 %v802_v38  ;;  %4181 = vmatpush3.msra.mxu1 %v820_v41  ;;  %v779_v32 = vld [vmem:[%s7704_s1 + $0x218] sm:$0xff]  ;;  %v813_v33 = vld [vmem:[%s7704_s1 + $0x328] sm:$0xff]  ;;  %v638_v36 = vld [vmem:[%s5427_s18 + $0xa30] sm:$0xff] }
  0x42   : > { %4105 = vmatpush3.msra.mxu0 %v786_v40  ;;  %4182 = vmatprep.subr.mxu1 %v835_v47  ;;  %v640_v37 = vld [vmem:[%s5427_s18 + $0xa40] sm:$0xff]  ;;  %v794_v38 = vld [vmem:[%s7704_s1 + $0x290] sm:$0xff]  ;;  %v827_v47 = vld [vmem:[%s7704_s1 + $0x398] sm:$0xff] }
  0x43   : > { %1250 = vmatmul.mubr.f32.gmra.mxu0 %v437_v42  ;;  %1395 = vmatmul.mubr.f32.gmra.mxu1 %v439_v43  ;;  %v828_v39 = vld [vmem:[%s7704_s1 + $0x3a0] sm:$0xff]  ;;  %v778_v40 = vld [vmem:[%s7704_s1 + $0x210] sm:$0xff]  ;;  %v637_v42 = vld [vmem:[%s5427_s18 + $0xa28] sm:$0xff] }
  0x44   : > { %1254 = vmatprep.mubr.f32.mxu0 %v463_v44  ;;  %1399 = vmatprep.mubr.f32.mxu1 %v465_v45  ;;  %v812_v41 = vld [vmem:[%s7704_s1 + $0x320] sm:$0xff]  ;;  %v639_v43 = vld [vmem:[%s5427_s18 + $0xa38] sm:$0xff]  ;;  %v665_v45 = vld [vmem:[%s5427_s18 + $0xb08] sm:$0xff] }
  0x45   : > { %4106 = vmatprep.subr.mxu0 %v801_v46  ;;  %4183 = vmatpush3.msra.mxu1 %v819_v49  ;;  %v663_v44 = vld [vmem:[%s5427_s18 + $0xaf8] sm:$0xff]  ;;  %v793_v46 = vld [vmem:[%s7704_s1 + $0x288] sm:$0xff] }
  0x46   : > { %4107 = vmatpush3.msra.mxu0 %v785_v48  ;;  %4184 = vmatprep.subr.mxu1 %v834_v55  ;;  %v777_v48 = vld [vmem:[%s7704_s1 + $0x208] sm:$0xff]  ;;  %v811_v49 = vld [vmem:[%s7704_s1 + $0x318] sm:$0xff]  ;;  %v810_v55 = vld [vmem:[%s7704_s1 + $0x310] sm:$0xff] }
  0x47   : > { %1255 = vmatmul.mubr.f32.gmra.mxu0 %v462_v50  ;;  %1400 = vmatmul.mubr.f32.gmra.mxu1 %v464_v51  ;;  %v662_v50 = vld [vmem:[%s5427_s18 + $0xaf0] sm:$0xff]  ;;  %v664_v51 = vld [vmem:[%s5427_s18 + $0xb00] sm:$0xff] }
  0x48   : > { %1259 = vmatprep.mubr.f32.mxu0 %v488_v52  ;;  %1404 = vmatprep.mubr.f32.mxu1 %v490_v53  ;;  %v826_v52 = vld [vmem:[%s7704_s1 + $0x390] sm:$0xff]  ;;  %v688_v53 = vld [vmem:[%s5427_s18 + $0xbc0] sm:$0xff] }
  0x49   : > { %4108 = vmatprep.subr.mxu0 %v800_v54  ;;  %4185 = vmatpush3.msra.mxu1 %v818_v57  ;;  %v690_v54 = vld [vmem:[%s5427_s18 + $0xbd0] sm:$0xff]  ;;  %v825_v57 = vld [vmem:[%s7704_s1 + $0x388] sm:$0xff] }
  0x4a   : > { %4109 = vmatpush3.msra.mxu0 %v784_v56  ;;  %4186 = vmatprep.subr.mxu1 %v833_v63  ;;  %v792_v56 = vld [vmem:[%s7704_s1 + $0x280] sm:$0xff]  ;;  %v317_v63 = vld [vmem:[%s5427_s18 + $0x28] sm:$0xff] }
  0x4b   : > { %1260 = vmatmul.mubr.f32.gmra.mxu0 %v487_v58  ;;  %1405 = vmatmul.mubr.f32.gmra.mxu1 %v489_v59  ;;  %v687_v58 = vld [vmem:[%s5427_s18 + $0xbb8] sm:$0xff]  ;;  %v689_v59 = vld [vmem:[%s5427_s18 + $0xbc8] sm:$0xff] }
  0x4c   : > { %1264 = vmatprep.mubr.f32.mxu0 %v513_v60  ;;  %1409 = vmatprep.mubr.f32.mxu1 %v515_v61  ;;  %v776_v60 = vld [vmem:[%s7704_s1 + $0x200] sm:$0xff]  ;;  %v809_v61 = vld [vmem:[%s7704_s1 + $0x308] sm:$0xff] }
  0x4d   : > { %4110 = vmatprep.subr.mxu0 %v799_v62  ;;  %4187 = vmatpush3.msra.mxu1 %v817_v1  ;;  %v824_v62 = vld [vmem:[%s7704_s1 + $0x380] sm:$0xff]  ;;  %v319_v1 = vld [vmem:[%s5427_s18 + $0x38] sm:$0xff] }
  0x4e   : > { %4111 = vmatpush3.msra.mxu0 %v783_v0  ;;  %4188 = vmatprep.subr.mxu1 %v832_v7  ;;  %v808_v0 = vld [vmem:[%s7704_s1 + $0x300] sm:$0xff] }
  0x4f   : > { %1265 = vmatmul.mubr.f32.gmra.mxu0 %v512_v2  ;;  %1410 = vmatmul.mubr.f32.gmra.mxu1 %v514_v3  ;;  %v316_v2 = vld [vmem:[%s5427_s18 + $0x20] sm:$0xff]  ;;  %v318_v3 = vld [vmem:[%s5427_s18 + $0x30] sm:$0xff] }
  0x50   : > { %1269 = vmatprep.mubr.f32.mxu0 %v538_v4  ;;  %1414 = vmatprep.mubr.f32.mxu1 %v540_v5  ;;  %v871_v4 = vld [vmem:[%s7704_s1 + $0x4f8] sm:$0xff]  ;;  %v342_v5 = vld [vmem:[%s5427_s18 + $0xf0] sm:$0xff]  ;;  %v344_v7 = vld [vmem:[%s5427_s18 + $0x100] sm:$0xff] }
  0x51   : > { %4112 = vmatprep.subr.mxu0 %v798_v6  ;;  %4189 = vmatpush3.msra.mxu1 %v816_v9  ;;  %v855_v6 = vld [vmem:[%s7704_s1 + $0x478] sm:$0xff] }
  0x52   : > { %4113 = vmatpush3.msra.mxu0 %v782_v8  ;;  %4190 = vmatprep.subr.mxu1 %v831_v15  ;;  %v870_v8 = vld [vmem:[%s7704_s1 + $0x4f0] sm:$0xff]  ;;  %v903_v9 = vld [vmem:[%s7704_s1 + $0x5f8] sm:$0xff]  ;;  %v869_v15 = vld [vmem:[%s7704_s1 + $0x4e8] sm:$0xff] }
  0x53   : > { %1270 = vmatmul.mubr.f32.gmra.mxu0 %v537_v10  ;;  %1415 = vmatmul.mubr.f32.gmra.mxu1 %v539_v11  ;;  %v341_v10 = vld [vmem:[%s5427_s18 + $0xe8] sm:$0xff]  ;;  %v343_v11 = vld [vmem:[%s5427_s18 + $0xf8] sm:$0xff] }
  0x54   : > { %1274 = vmatprep.mubr.f32.mxu0 %v563_v12  ;;  %1419 = vmatprep.mubr.f32.mxu1 %v565_v13  ;;  %v854_v12 = vld [vmem:[%s7704_s1 + $0x470] sm:$0xff]  ;;  %v367_v13 = vld [vmem:[%s5427_s18 + $0x1b8] sm:$0xff] }
  0x55   : > { %4114 = vmatprep.subr.mxu0 %v797_v14  ;;  %4191 = vmatpush3.msra.mxu1 %v815_v17  ;;  %v369_v14 = vld [vmem:[%s5427_s18 + $0x1c8] sm:$0xff]  ;;  %v887_v17 = vld [vmem:[%s7704_s1 + $0x578] sm:$0xff] }
  0x56   : > { %4115 = vmatpush3.msra.mxu0 %v781_v16  ;;  %4192 = vmatprep.subr.mxu1 %v830_v23  ;;  %v853_v16 = vld [vmem:[%s7704_s1 + $0x468] sm:$0xff]  ;;  %v902_v23 = vld [vmem:[%s7704_s1 + $0x5f0] sm:$0xff] }
  0x57   : > { %1275 = vmatmul.mubr.f32.gmra.mxu0 %v562_v18  ;;  %1420 = vmatmul.mubr.f32.gmra.mxu1 %v564_v19  ;;  %v366_v18 = vld [vmem:[%s5427_s18 + $0x1b0] sm:$0xff]  ;;  %v368_v19 = vld [vmem:[%s5427_s18 + $0x1c0] sm:$0xff] }
  0x58   : > { %1279 = vmatprep.mubr.f32.mxu0 %v588_v20  ;;  %1424 = vmatprep.mubr.f32.mxu1 %v590_v21  ;;  %v392_v20 = vld [vmem:[%s5427_s18 + $0x280] sm:$0xff]  ;;  %v394_v21 = vld [vmem:[%s5427_s18 + $0x290] sm:$0xff] }
  0x59   : > { %4116 = vmatprep.subr.mxu0 %v796_v22  ;;  %4193 = vmatpush3.msra.mxu1 %v814_v25  ;;  %v868_v22 = vld [vmem:[%s7704_s1 + $0x4e0] sm:$0xff]  ;;  %v886_v25 = vld [vmem:[%s7704_s1 + $0x570] sm:$0xff] }
  0x5a   : > { %4117 = vmatpush3.msra.mxu0 %v780_v24  ;;  %4194 = vmatprep.subr.mxu1 %v829_v31  ;;  %v852_v24 = vld [vmem:[%s7704_s1 + $0x460] sm:$0xff]  ;;  %v901_v31 = vld [vmem:[%s7704_s1 + $0x5e8] sm:$0xff] }
  0x5b   : > { %1280 = vmatmul.mubr.f32.gmra.mxu0 %v587_v26  ;;  %1425 = vmatmul.mubr.f32.gmra.mxu1 %v589_v27  ;;  %v391_v26 = vld [vmem:[%s5427_s18 + $0x278] sm:$0xff]  ;;  %v393_v27 = vld [vmem:[%s5427_s18 + $0x288] sm:$0xff] }
  0x5c   : > { %1284 = vmatprep.mubr.f32.mxu0 %v613_v28  ;;  %1429 = vmatprep.mubr.f32.mxu1 %v615_v29  ;;  %v417_v28 = vld [vmem:[%s5427_s18 + $0x348] sm:$0xff]  ;;  %v419_v29 = vld [vmem:[%s5427_s18 + $0x358] sm:$0xff] }
  0x5d   : > { %4118 = vmatprep.subr.mxu0 %v795_v30  ;;  %4195 = vmatpush3.msra.mxu1 %v813_v33  ;;  %v867_v30 = vld [vmem:[%s7704_s1 + $0x4d8] sm:$0xff]  ;;  %v885_v33 = vld [vmem:[%s7704_s1 + $0x568] sm:$0xff] }
  0x5e   : > { %4119 = vmatpush3.msra.mxu0 %v779_v32  ;;  %4196 = vmatprep.subr.mxu1 %v828_v39  ;;  %v851_v32 = vld [vmem:[%s7704_s1 + $0x458] sm:$0xff]  ;;  %v900_v39 = vld [vmem:[%s7704_s1 + $0x5e0] sm:$0xff] }
  0x5f   : > { %1285 = vmatmul.mubr.f32.gmra.mxu0 %v612_v34  ;;  %1430 = vmatmul.mubr.f32.gmra.mxu1 %v614_v35  ;;  %v416_v34 = vld [vmem:[%s5427_s18 + $0x340] sm:$0xff]  ;;  %v418_v35 = vld [vmem:[%s5427_s18 + $0x350] sm:$0xff] }
  0x60   : > { %1289 = vmatprep.mubr.f32.mxu0 %v638_v36  ;;  %1434 = vmatprep.mubr.f32.mxu1 %v640_v37  ;;  %v442_v36 = vld [vmem:[%s5427_s18 + $0x410] sm:$0xff]  ;;  %v444_v37 = vld [vmem:[%s5427_s18 + $0x420] sm:$0xff] }
  0x61   : > { %4120 = vmatprep.subr.mxu0 %v794_v38  ;;  %4197 = vmatpush3.msra.mxu1 %v812_v41  ;;  %v866_v38 = vld [vmem:[%s7704_s1 + $0x4d0] sm:$0xff]  ;;  %v884_v41 = vld [vmem:[%s7704_s1 + $0x560] sm:$0xff] }
  0x62   : > { %4121 = vmatpush3.msra.mxu0 %v778_v40  ;;  %4198 = vmatprep.subr.mxu1 %v827_v47  ;;  %v850_v40 = vld [vmem:[%s7704_s1 + $0x450] sm:$0xff]  ;;  %v899_v47 = vld [vmem:[%s7704_s1 + $0x5d8] sm:$0xff] }
  0x63   : > { %1290 = vmatmul.mubr.f32.gmra.mxu0 %v637_v42  ;;  %1435 = vmatmul.mubr.f32.gmra.mxu1 %v639_v43  ;;  %v441_v42 = vld [vmem:[%s5427_s18 + $0x408] sm:$0xff]  ;;  %v443_v43 = vld [vmem:[%s5427_s18 + $0x418] sm:$0xff] }
  0x64   : > { %1294 = vmatprep.mubr.f32.mxu0 %v663_v44  ;;  %1439 = vmatprep.mubr.f32.mxu1 %v665_v45  ;;  %v467_v44 = vld [vmem:[%s5427_s18 + $0x4d8] sm:$0xff]  ;;  %v469_v45 = vld [vmem:[%s5427_s18 + $0x4e8] sm:$0xff] }
  0x65   : > { %4122 = vmatprep.subr.mxu0 %v793_v46  ;;  %4199 = vmatpush3.msra.mxu1 %v811_v49  ;;  %v865_v46 = vld [vmem:[%s7704_s1 + $0x4c8] sm:$0xff]  ;;  %v883_v49 = vld [vmem:[%s7704_s1 + $0x558] sm:$0xff] }
  0x66   : > { %4123 = vmatpush3.msra.mxu0 %v777_v48  ;;  %4200 = vmatprep.subr.mxu1 %v826_v52  ;;  %v849_v48 = vld [vmem:[%s7704_s1 + $0x448] sm:$0xff]  ;;  %v492_v52 = vld [vmem:[%s5427_s18 + $0x5a0] sm:$0xff] }
  0x67   : > { %1295 = vmatmul.mubr.f32.gmra.mxu0 %v662_v50  ;;  %1440 = vmatmul.mubr.f32.gmra.mxu1 %v664_v51  ;;  %v466_v50 = vld [vmem:[%s5427_s18 + $0x4d0] sm:$0xff]  ;;  %v468_v51 = vld [vmem:[%s5427_s18 + $0x4e0] sm:$0xff] }
  0x68   : > { %1299 = vmatprep.mubr.f32.mxu0 %v688_v53  ;;  %1444 = vmatprep.mubr.f32.mxu1 %v690_v54  ;;  %v494_v53 = vld [vmem:[%s5427_s18 + $0x5b0] sm:$0xff]  ;;  %v864_v54 = vld [vmem:[%s7704_s1 + $0x4c0] sm:$0xff] }
  0x69   : > { %4201 = vmatpush3.msra.mxu1 %v810_v55  ;;  %4124 = vmatprep.subr.mxu0 %v792_v56  ;;  %v898_v55 = vld [vmem:[%s7704_s1 + $0x5d0] sm:$0xff]  ;;  %v848_v56 = vld [vmem:[%s7704_s1 + $0x440] sm:$0xff] }
  0x6a   : > { %4202 = vmatprep.subr.mxu1 %v825_v57  ;;  %4125 = vmatpush3.msra.mxu0 %v776_v60  ;;  %v882_v57 = vld [vmem:[%s7704_s1 + $0x550] sm:$0xff]  ;;  %v517_v60 = vld [vmem:[%s5427_s18 + $0x668] sm:$0xff] }
  0x6b   : > { %1300 = vmatmul.mubr.f32.gmra.mxu0 %v687_v58  ;;  %1445 = vmatmul.mubr.f32.gmra.mxu1 %v689_v59  ;;  %v491_v58 = vld [vmem:[%s5427_s18 + $0x598] sm:$0xff]  ;;  %v493_v59 = vld [vmem:[%s5427_s18 + $0x5a8] sm:$0xff] }
  0x6c   : > { %4203 = vmatpush3.msra.mxu1 %v809_v61  ;;  %1514 = vmatprep.mubr.f32.mxu0 %v317_v63  ;;  %v519_v61 = vld [vmem:[%s5427_s18 + $0x678] sm:$0xff]  ;;  %v897_v63 = vld [vmem:[%s7704_s1 + $0x5c8] sm:$0xff] }
  0x6d   : > { %4204 = vmatprep.subr.mxu1 %v824_v62  ;;  %1659 = vmatprep.mubr.f32.mxu1 %v319_v1  ;;  %v863_v62 = vld [vmem:[%s7704_s1 + $0x4b8] sm:$0xff]  ;;  %v881_v1 = vld [vmem:[%s7704_s1 + $0x548] sm:$0xff] }
  0x6e   : > { %4205 = vmatpush3.msra.mxu1 %v808_v0  ;;  %4254 = vmatprep.subr.mxu0 %v871_v4  ;;  %v847_v0 = vld [vmem:[%s7704_s1 + $0x438] sm:$0xff]  ;;  %v542_v4 = vld [vmem:[%s5427_s18 + $0x730] sm:$0xff] }
  0x6f   : > { %1515 = vmatmul.mubr.f32.vlgmr.msra.gmra.mxu0 %v316_v2  ;;  %1660 = vmatmul.mubr.f32.vlgmr.msra.gmra.mxu1 %v318_v3  ;;  %v516_v2 = vld [vmem:[%s5427_s18 + $0x660] sm:$0xff]  ;;  %v518_v3 = vld [vmem:[%s5427_s18 + $0x670] sm:$0xff] }
  0x70   : > { %1519 = vmatprep.mubr.f32.mxu0 %v342_v5  ;;  %4255 = vmatpush3.msra.mxu0 %v855_v6  ;;  %v544_v5 = vld [vmem:[%s5427_s18 + $0x740] sm:$0xff]  ;;  %v862_v6 = vld [vmem:[%s7704_s1 + $0x4b0] sm:$0xff] }
  0x71   : > { %1664 = vmatprep.mubr.f32.mxu1 %v344_v7  ;;  %4256 = vmatprep.subr.mxu0 %v870_v8  ;;  %v896_v7 = vld [vmem:[%s7704_s1 + $0x5c0] sm:$0xff]  ;;  %v846_v8 = vld [vmem:[%s7704_s1 + $0x430] sm:$0xff] }
  0x72   : > { %4334 = vmatprep.subr.mxu1 %v903_v9  ;;  %4257 = vmatpush3.msra.mxu0 %v854_v12  ;;  %v880_v9 = vld [vmem:[%s7704_s1 + $0x540] sm:$0xff]  ;;  %v567_v12 = vld [vmem:[%s5427_s18 + $0x7f8] sm:$0xff] }
  0x73   : > { %1520 = vmatmul.mubr.f32.gmra.mxu0 %v341_v10  ;;  %1665 = vmatmul.mubr.f32.gmra.mxu1 %v343_v11  ;;  %v541_v10 = vld [vmem:[%s5427_s18 + $0x728] sm:$0xff]  ;;  %v543_v11 = vld [vmem:[%s5427_s18 + $0x738] sm:$0xff] }
  0x74   : > { %1524 = vmatprep.mubr.f32.mxu0 %v367_v13  ;;  %1669 = vmatprep.mubr.f32.mxu1 %v369_v14  ;;  %v569_v13 = vld [vmem:[%s5427_s18 + $0x808] sm:$0xff] }
  0x75   : > { %4258 = vmatprep.subr.mxu0 %v869_v15  ;;  %4335 = vmatpush3.msra.mxu1 %v887_v17  ;;  %v861_v14 = vld [vmem:[%s7704_s1 + $0x4a8] sm:$0xff]  ;;  %v895_v15 = vld [vmem:[%s7704_s1 + $0x5b8] sm:$0xff] }
  0x76   : > { %4259 = vmatpush3.msra.mxu0 %v853_v16  ;;  %4336 = vmatprep.subr.mxu1 %v902_v23  ;;  %v845_v16 = vld [vmem:[%s7704_s1 + $0x428] sm:$0xff]  ;;  %v879_v17 = vld [vmem:[%s7704_s1 + $0x538] sm:$0xff]  ;;  %v894_v23 = vld [vmem:[%s7704_s1 + $0x5b0] sm:$0xff] }
  0x77   : > { %1525 = vmatmul.mubr.f32.gmra.mxu0 %v366_v18  ;;  %1670 = vmatmul.mubr.f32.gmra.mxu1 %v368_v19  ;;  %v566_v18 = vld [vmem:[%s5427_s18 + $0x7f0] sm:$0xff]  ;;  %v568_v19 = vld [vmem:[%s5427_s18 + $0x800] sm:$0xff] }
  0x78   : > { %1529 = vmatprep.mubr.f32.mxu0 %v392_v20  ;;  %1674 = vmatprep.mubr.f32.mxu1 %v394_v21  ;;  %v592_v20 = vld [vmem:[%s5427_s18 + $0x8c0] sm:$0xff]  ;;  %v594_v21 = vld [vmem:[%s5427_s18 + $0x8d0] sm:$0xff] }
  0x79   : > { %4260 = vmatprep.subr.mxu0 %v868_v22  ;;  %4337 = vmatpush3.msra.mxu1 %v886_v25  ;;  %v860_v22 = vld [vmem:[%s7704_s1 + $0x4a0] sm:$0xff]  ;;  %v878_v25 = vld [vmem:[%s7704_s1 + $0x530] sm:$0xff] }
  0x7a   : > { %4261 = vmatpush3.msra.mxu0 %v852_v24  ;;  %4338 = vmatprep.subr.mxu1 %v901_v31  ;;  %v844_v24 = vld [vmem:[%s7704_s1 + $0x420] sm:$0xff]  ;;  %v893_v31 = vld [vmem:[%s7704_s1 + $0x5a8] sm:$0xff] }
  0x7b   : > { %1530 = vmatmul.mubr.f32.gmra.mxu0 %v391_v26  ;;  %1675 = vmatmul.mubr.f32.gmra.mxu1 %v393_v27  ;;  %v591_v26 = vld [vmem:[%s5427_s18 + $0x8b8] sm:$0xff]  ;;  %v593_v27 = vld [vmem:[%s5427_s18 + $0x8c8] sm:$0xff] }
  0x7c   : > { %1534 = vmatprep.mubr.f32.mxu0 %v417_v28  ;;  %1679 = vmatprep.mubr.f32.mxu1 %v419_v29  ;;  %v617_v28 = vld [vmem:[%s5427_s18 + $0x988] sm:$0xff]  ;;  %v619_v29 = vld [vmem:[%s5427_s18 + $0x998] sm:$0xff] }
  0x7d   : > { %4262 = vmatprep.subr.mxu0 %v867_v30  ;;  %4339 = vmatpush3.msra.mxu1 %v885_v33  ;;  %v859_v30 = vld [vmem:[%s7704_s1 + $0x498] sm:$0xff]  ;;  %v877_v33 = vld [vmem:[%s7704_s1 + $0x528] sm:$0xff] }
  0x7e   : > { %4263 = vmatpush3.msra.mxu0 %v851_v32  ;;  %4340 = vmatprep.subr.mxu1 %v900_v39  ;;  %v843_v32 = vld [vmem:[%s7704_s1 + $0x418] sm:$0xff]  ;;  %v892_v39 = vld [vmem:[%s7704_s1 + $0x5a0] sm:$0xff] }
  0x7f   : > { %1535 = vmatmul.mubr.f32.gmra.mxu0 %v416_v34  ;;  %1680 = vmatmul.mubr.f32.gmra.mxu1 %v418_v35  ;;  %v616_v34 = vld [vmem:[%s5427_s18 + $0x980] sm:$0xff]  ;;  %v618_v35 = vld [vmem:[%s5427_s18 + $0x990] sm:$0xff] }
  0x80   : > { %1539 = vmatprep.mubr.f32.mxu0 %v442_v36  ;;  %1684 = vmatprep.mubr.f32.mxu1 %v444_v37  ;;  %v642_v36 = vld [vmem:[%s5427_s18 + $0xa50] sm:$0xff]  ;;  %v644_v37 = vld [vmem:[%s5427_s18 + $0xa60] sm:$0xff] }
  0x81   : > { %4264 = vmatprep.subr.mxu0 %v866_v38  ;;  %4341 = vmatpush3.msra.mxu1 %v884_v41  ;;  %v858_v38 = vld [vmem:[%s7704_s1 + $0x490] sm:$0xff]  ;;  %v876_v41 = vld [vmem:[%s7704_s1 + $0x520] sm:$0xff] }
  0x82   : > { %4265 = vmatpush3.msra.mxu0 %v850_v40  ;;  %4342 = vmatprep.subr.mxu1 %v899_v47  ;;  %v842_v40 = vld [vmem:[%s7704_s1 + $0x410] sm:$0xff]  ;;  %v891_v47 = vld [vmem:[%s7704_s1 + $0x598] sm:$0xff] }
  0x83   : > { %1540 = vmatmul.mubr.f32.gmra.mxu0 %v441_v42  ;;  %1685 = vmatmul.mubr.f32.gmra.mxu1 %v443_v43  ;;  %v641_v42 = vld [vmem:[%s5427_s18 + $0xa48] sm:$0xff]  ;;  %v643_v43 = vld [vmem:[%s5427_s18 + $0xa58] sm:$0xff] }
  0x84   : > { %1544 = vmatprep.mubr.f32.mxu0 %v467_v44  ;;  %1689 = vmatprep.mubr.f32.mxu1 %v469_v45  ;;  %v667_v44 = vld [vmem:[%s5427_s18 + $0xb18] sm:$0xff]  ;;  %v669_v45 = vld [vmem:[%s5427_s18 + $0xb28] sm:$0xff] }
  0x85   : > { %4266 = vmatprep.subr.mxu0 %v865_v46  ;;  %4343 = vmatpush3.msra.mxu1 %v883_v49  ;;  %v857_v46 = vld [vmem:[%s7704_s1 + $0x488] sm:$0xff]  ;;  %v875_v49 = vld [vmem:[%s7704_s1 + $0x518] sm:$0xff] }
  0x86   : > { %4267 = vmatpush3.msra.mxu0 %v849_v48  ;;  %4344 = vmatprep.subr.mxu1 %v898_v55  ;;  %v841_v48 = vld [vmem:[%s7704_s1 + $0x408] sm:$0xff]  ;;  %v874_v55 = vld [vmem:[%s7704_s1 + $0x510] sm:$0xff] }
  0x87   : > { %1545 = vmatmul.mubr.f32.gmra.mxu0 %v466_v50  ;;  %1690 = vmatmul.mubr.f32.gmra.mxu1 %v468_v51  ;;  %v666_v50 = vld [vmem:[%s5427_s18 + $0xb10] sm:$0xff]  ;;  %v668_v51 = vld [vmem:[%s5427_s18 + $0xb20] sm:$0xff] }
  0x88   : > { %1549 = vmatprep.mubr.f32.mxu0 %v492_v52  ;;  %1694 = vmatprep.mubr.f32.mxu1 %v494_v53  ;;  %v890_v52 = vld [vmem:[%s7704_s1 + $0x590] sm:$0xff]  ;;  %v692_v53 = vld [vmem:[%s5427_s18 + $0xbe0] sm:$0xff] }
  0x89   : > { %4268 = vmatprep.subr.mxu0 %v864_v54  ;;  %4345 = vmatpush3.msra.mxu1 %v882_v57  ;;  %v694_v54 = vld [vmem:[%s5427_s18 + $0xbf0] sm:$0xff]  ;;  %v889_v57 = vld [vmem:[%s7704_s1 + $0x588] sm:$0xff] }
  0x8a   : > { %4269 = vmatpush3.msra.mxu0 %v848_v56  ;;  %4346 = vmatprep.subr.mxu1 %v897_v63  ;;  %v856_v56 = vld [vmem:[%s7704_s1 + $0x480] sm:$0xff]  ;;  %v321_v63 = vld [vmem:[%s5427_s18 + $0x48] sm:$0xff] }
  0x8b   : > { %1550 = vmatmul.mubr.f32.gmra.mxu0 %v491_v58  ;;  %1695 = vmatmul.mubr.f32.gmra.mxu1 %v493_v59  ;;  %v691_v58 = vld [vmem:[%s5427_s18 + $0xbd8] sm:$0xff]  ;;  %v693_v59 = vld [vmem:[%s5427_s18 + $0xbe8] sm:$0xff] }
  0x8c   : > { %1554 = vmatprep.mubr.f32.mxu0 %v517_v60  ;;  %1699 = vmatprep.mubr.f32.mxu1 %v519_v61  ;;  %v840_v60 = vld [vmem:[%s7704_s1 + $0x400] sm:$0xff]  ;;  %v873_v61 = vld [vmem:[%s7704_s1 + $0x508] sm:$0xff] }
  0x8d   : > { %4270 = vmatprep.subr.mxu0 %v863_v62  ;;  %4347 = vmatpush3.msra.mxu1 %v881_v1  ;;  %v888_v62 = vld [vmem:[%s7704_s1 + $0x580] sm:$0xff]  ;;  %v323_v1 = vld [vmem:[%s5427_s18 + $0x58] sm:$0xff] }
  0x8e   : > { %4271 = vmatpush3.msra.mxu0 %v847_v0  ;;  %4348 = vmatprep.subr.mxu1 %v896_v7  ;;  %v872_v0 = vld [vmem:[%s7704_s1 + $0x500] sm:$0xff] }
  0x8f   : > { %1555 = vmatmul.mubr.f32.gmra.mxu0 %v516_v2  ;;  %1700 = vmatmul.mubr.f32.gmra.mxu1 %v518_v3  ;;  %v320_v2 = vld [vmem:[%s5427_s18 + $0x40] sm:$0xff]  ;;  %v322_v3 = vld [vmem:[%s5427_s18 + $0x50] sm:$0xff] }
  0x90   : > { %1559 = vmatprep.mubr.f32.mxu0 %v542_v4  ;;  %1704 = vmatprep.mubr.f32.mxu1 %v544_v5  ;;  %v935_v4 = vld [vmem:[%s7704_s1 + $0x6f8] sm:$0xff]  ;;  %v346_v5 = vld [vmem:[%s5427_s18 + $0x110] sm:$0xff]  ;;  %v348_v7 = vld [vmem:[%s5427_s18 + $0x120] sm:$0xff] }
  0x91   : > { %4272 = vmatprep.subr.mxu0 %v862_v6  ;;  %4349 = vmatpush3.msra.mxu1 %v880_v9  ;;  %v919_v6 = vld [vmem:[%s7704_s1 + $0x678] sm:$0xff] }
  0x92   : > { %4273 = vmatpush3.msra.mxu0 %v846_v8  ;;  %4350 = vmatprep.subr.mxu1 %v895_v15  ;;  %v934_v8 = vld [vmem:[%s7704_s1 + $0x6f0] sm:$0xff]  ;;  %v967_v9 = vld [vmem:[%s7704_s1 + $0x7f8] sm:$0xff]  ;;  %v933_v15 = vld [vmem:[%s7704_s1 + $0x6e8] sm:$0xff] }
  0x93   : > { %1560 = vmatmul.mubr.f32.gmra.mxu0 %v541_v10  ;;  %1705 = vmatmul.mubr.f32.gmra.mxu1 %v543_v11  ;;  %v345_v10 = vld [vmem:[%s5427_s18 + $0x108] sm:$0xff]  ;;  %v347_v11 = vld [vmem:[%s5427_s18 + $0x118] sm:$0xff] }
  0x94   : > { %1564 = vmatprep.mubr.f32.mxu0 %v567_v12  ;;  %1709 = vmatprep.mubr.f32.mxu1 %v569_v13  ;;  %v918_v12 = vld [vmem:[%s7704_s1 + $0x670] sm:$0xff]  ;;  %v371_v13 = vld [vmem:[%s5427_s18 + $0x1d8] sm:$0xff] }
  0x95   : > { %4274 = vmatprep.subr.mxu0 %v861_v14  ;;  %4351 = vmatpush3.msra.mxu1 %v879_v17  ;;  %v373_v14 = vld [vmem:[%s5427_s18 + $0x1e8] sm:$0xff]  ;;  %v951_v17 = vld [vmem:[%s7704_s1 + $0x778] sm:$0xff] }
  0x96   : > { %4275 = vmatpush3.msra.mxu0 %v845_v16  ;;  %4352 = vmatprep.subr.mxu1 %v894_v23  ;;  %v917_v16 = vld [vmem:[%s7704_s1 + $0x668] sm:$0xff]  ;;  %v966_v23 = vld [vmem:[%s7704_s1 + $0x7f0] sm:$0xff] }
  0x97   : > { %1565 = vmatmul.mubr.f32.gmra.mxu0 %v566_v18  ;;  %1710 = vmatmul.mubr.f32.gmra.mxu1 %v568_v19  ;;  %v370_v18 = vld [vmem:[%s5427_s18 + $0x1d0] sm:$0xff]  ;;  %v372_v19 = vld [vmem:[%s5427_s18 + $0x1e0] sm:$0xff] }
  0x98   : > { %1569 = vmatprep.mubr.f32.mxu0 %v592_v20  ;;  %1714 = vmatprep.mubr.f32.mxu1 %v594_v21  ;;  %v396_v20 = vld [vmem:[%s5427_s18 + $0x2a0] sm:$0xff]  ;;  %v398_v21 = vld [vmem:[%s5427_s18 + $0x2b0] sm:$0xff] }
  0x99   : > { %4276 = vmatprep.subr.mxu0 %v860_v22  ;;  %4353 = vmatpush3.msra.mxu1 %v878_v25  ;;  %v932_v22 = vld [vmem:[%s7704_s1 + $0x6e0] sm:$0xff]  ;;  %v950_v25 = vld [vmem:[%s7704_s1 + $0x770] sm:$0xff] }
  0x9a   : > { %4277 = vmatpush3.msra.mxu0 %v844_v24  ;;  %4354 = vmatprep.subr.mxu1 %v893_v31  ;;  %v916_v24 = vld [vmem:[%s7704_s1 + $0x660] sm:$0xff]  ;;  %v965_v31 = vld [vmem:[%s7704_s1 + $0x7e8] sm:$0xff] }
  0x9b   : > { %1570 = vmatmul.mubr.f32.gmra.mxu0 %v591_v26  ;;  %1715 = vmatmul.mubr.f32.gmra.mxu1 %v593_v27  ;;  %v395_v26 = vld [vmem:[%s5427_s18 + $0x298] sm:$0xff]  ;;  %v397_v27 = vld [vmem:[%s5427_s18 + $0x2a8] sm:$0xff] }
  0x9c   : > { %1574 = vmatprep.mubr.f32.mxu0 %v617_v28  ;;  %1719 = vmatprep.mubr.f32.mxu1 %v619_v29  ;;  %v421_v28 = vld [vmem:[%s5427_s18 + $0x368] sm:$0xff]  ;;  %v423_v29 = vld [vmem:[%s5427_s18 + $0x378] sm:$0xff] }
  0x9d   : > { %4278 = vmatprep.subr.mxu0 %v859_v30  ;;  %4355 = vmatpush3.msra.mxu1 %v877_v33  ;;  %v931_v30 = vld [vmem:[%s7704_s1 + $0x6d8] sm:$0xff]  ;;  %v949_v33 = vld [vmem:[%s7704_s1 + $0x768] sm:$0xff] }
  0x9e   : > { %4279 = vmatpush3.msra.mxu0 %v843_v32  ;;  %4356 = vmatprep.subr.mxu1 %v892_v39  ;;  %v915_v32 = vld [vmem:[%s7704_s1 + $0x658] sm:$0xff]  ;;  %v964_v39 = vld [vmem:[%s7704_s1 + $0x7e0] sm:$0xff] }
  0x9f   : > { %1575 = vmatmul.mubr.f32.gmra.mxu0 %v616_v34  ;;  %1720 = vmatmul.mubr.f32.gmra.mxu1 %v618_v35  ;;  %v420_v34 = vld [vmem:[%s5427_s18 + $0x360] sm:$0xff]  ;;  %v422_v35 = vld [vmem:[%s5427_s18 + $0x370] sm:$0xff] }
  0xa0   : > { %1579 = vmatprep.mubr.f32.mxu0 %v642_v36  ;;  %1724 = vmatprep.mubr.f32.mxu1 %v644_v37  ;;  %v446_v36 = vld [vmem:[%s5427_s18 + $0x430] sm:$0xff]  ;;  %v448_v37 = vld [vmem:[%s5427_s18 + $0x440] sm:$0xff] }
  0xa1   : > { %4280 = vmatprep.subr.mxu0 %v858_v38  ;;  %4357 = vmatpush3.msra.mxu1 %v876_v41  ;;  %v930_v38 = vld [vmem:[%s7704_s1 + $0x6d0] sm:$0xff]  ;;  %v948_v41 = vld [vmem:[%s7704_s1 + $0x760] sm:$0xff] }
  0xa2   : > { %4281 = vmatpush3.msra.mxu0 %v842_v40  ;;  %4358 = vmatprep.subr.mxu1 %v891_v47  ;;  %v914_v40 = vld [vmem:[%s7704_s1 + $0x650] sm:$0xff]  ;;  %v963_v47 = vld [vmem:[%s7704_s1 + $0x7d8] sm:$0xff] }
  0xa3   : > { %1580 = vmatmul.mubr.f32.gmra.mxu0 %v641_v42  ;;  %1725 = vmatmul.mubr.f32.gmra.mxu1 %v643_v43  ;;  %v445_v42 = vld [vmem:[%s5427_s18 + $0x428] sm:$0xff]  ;;  %v447_v43 = vld [vmem:[%s5427_s18 + $0x438] sm:$0xff] }
  0xa4   : > { %1584 = vmatprep.mubr.f32.mxu0 %v667_v44  ;;  %1729 = vmatprep.mubr.f32.mxu1 %v669_v45  ;;  %v471_v44 = vld [vmem:[%s5427_s18 + $0x4f8] sm:$0xff]  ;;  %v473_v45 = vld [vmem:[%s5427_s18 + $0x508] sm:$0xff] }
  0xa5   : > { %4282 = vmatprep.subr.mxu0 %v857_v46  ;;  %4359 = vmatpush3.msra.mxu1 %v875_v49  ;;  %v929_v46 = vld [vmem:[%s7704_s1 + $0x6c8] sm:$0xff]  ;;  %v947_v49 = vld [vmem:[%s7704_s1 + $0x758] sm:$0xff] }
  0xa6   : > { %4283 = vmatpush3.msra.mxu0 %v841_v48  ;;  %4360 = vmatprep.subr.mxu1 %v890_v52  ;;  %v913_v48 = vld [vmem:[%s7704_s1 + $0x648] sm:$0xff]  ;;  %v496_v52 = vld [vmem:[%s5427_s18 + $0x5c0] sm:$0xff] }
  0xa7   : > { %1585 = vmatmul.mubr.f32.gmra.mxu0 %v666_v50  ;;  %1730 = vmatmul.mubr.f32.gmra.mxu1 %v668_v51  ;;  %v470_v50 = vld [vmem:[%s5427_s18 + $0x4f0] sm:$0xff]  ;;  %v472_v51 = vld [vmem:[%s5427_s18 + $0x500] sm:$0xff] }
  0xa8   : > { %1589 = vmatprep.mubr.f32.mxu0 %v692_v53  ;;  %1734 = vmatprep.mubr.f32.mxu1 %v694_v54  ;;  %v498_v53 = vld [vmem:[%s5427_s18 + $0x5d0] sm:$0xff]  ;;  %v928_v54 = vld [vmem:[%s7704_s1 + $0x6c0] sm:$0xff] }
  0xa9   : > { %4361 = vmatpush3.msra.mxu1 %v874_v55  ;;  %4284 = vmatprep.subr.mxu0 %v856_v56  ;;  %v962_v55 = vld [vmem:[%s7704_s1 + $0x7d0] sm:$0xff]  ;;  %v912_v56 = vld [vmem:[%s7704_s1 + $0x640] sm:$0xff] }
  0xaa   : > { %4362 = vmatprep.subr.mxu1 %v889_v57  ;;  %4285 = vmatpush3.msra.mxu0 %v840_v60  ;;  %v946_v57 = vld [vmem:[%s7704_s1 + $0x750] sm:$0xff]  ;;  %v521_v60 = vld [vmem:[%s5427_s18 + $0x688] sm:$0xff] }
  0xab   : > { %1590 = vmatmul.mubr.f32.gmra.mxu0 %v691_v58  ;;  %1735 = vmatmul.mubr.f32.gmra.mxu1 %v693_v59  ;;  %v495_v58 = vld [vmem:[%s5427_s18 + $0x5b8] sm:$0xff]  ;;  %v497_v59 = vld [vmem:[%s5427_s18 + $0x5c8] sm:$0xff] }
  0xac   : > { %4363 = vmatpush3.msra.mxu1 %v873_v61  ;;  %1804 = vmatprep.mubr.f32.mxu0 %v321_v63  ;;  %v523_v61 = vld [vmem:[%s5427_s18 + $0x698] sm:$0xff]  ;;  %v961_v63 = vld [vmem:[%s7704_s1 + $0x7c8] sm:$0xff] }
  0xad   : > { %4364 = vmatprep.subr.mxu1 %v888_v62  ;;  %1949 = vmatprep.mubr.f32.mxu1 %v323_v1  ;;  %v927_v62 = vld [vmem:[%s7704_s1 + $0x6b8] sm:$0xff]  ;;  %v945_v1 = vld [vmem:[%s7704_s1 + $0x748] sm:$0xff] }
  0xae   : > { %4365 = vmatpush3.msra.mxu1 %v872_v0  ;;  %4414 = vmatprep.subr.mxu0 %v935_v4  ;;  %v911_v0 = vld [vmem:[%s7704_s1 + $0x638] sm:$0xff]  ;;  %v546_v4 = vld [vmem:[%s5427_s18 + $0x750] sm:$0xff] }
  0xaf   : > { %1805 = vmatmul.mubr.f32.vlgmr.msra.gmra.mxu0 %v320_v2  ;;  %1950 = vmatmul.mubr.f32.vlgmr.msra.gmra.mxu1 %v322_v3  ;;  %v520_v2 = vld [vmem:[%s5427_s18 + $0x680] sm:$0xff]  ;;  %v522_v3 = vld [vmem:[%s5427_s18 + $0x690] sm:$0xff] }
  0xb0   : > { %1809 = vmatprep.mubr.f32.mxu0 %v346_v5  ;;  %4415 = vmatpush3.msra.mxu0 %v919_v6  ;;  %v548_v5 = vld [vmem:[%s5427_s18 + $0x760] sm:$0xff]  ;;  %v926_v6 = vld [vmem:[%s7704_s1 + $0x6b0] sm:$0xff] }
  0xb1   : > { %1954 = vmatprep.mubr.f32.mxu1 %v348_v7  ;;  %4416 = vmatprep.subr.mxu0 %v934_v8  ;;  %v960_v7 = vld [vmem:[%s7704_s1 + $0x7c0] sm:$0xff]  ;;  %v910_v8 = vld [vmem:[%s7704_s1 + $0x630] sm:$0xff] }
  0xb2   : > { %4494 = vmatprep.subr.mxu1 %v967_v9  ;;  %4417 = vmatpush3.msra.mxu0 %v918_v12  ;;  %v944_v9 = vld [vmem:[%s7704_s1 + $0x740] sm:$0xff]  ;;  %v571_v12 = vld [vmem:[%s5427_s18 + $0x818] sm:$0xff] }
  0xb3   : > { %1810 = vmatmul.mubr.f32.gmra.mxu0 %v345_v10  ;;  %1955 = vmatmul.mubr.f32.gmra.mxu1 %v347_v11  ;;  %v545_v10 = vld [vmem:[%s5427_s18 + $0x748] sm:$0xff]  ;;  %v547_v11 = vld [vmem:[%s5427_s18 + $0x758] sm:$0xff] }
  0xb4   : > { %1814 = vmatprep.mubr.f32.mxu0 %v371_v13  ;;  %1959 = vmatprep.mubr.f32.mxu1 %v373_v14  ;;  %v573_v13 = vld [vmem:[%s5427_s18 + $0x828] sm:$0xff] }
  0xb5   : > { %4418 = vmatprep.subr.mxu0 %v933_v15  ;;  %4495 = vmatpush3.msra.mxu1 %v951_v17  ;;  %v925_v14 = vld [vmem:[%s7704_s1 + $0x6a8] sm:$0xff]  ;;  %v959_v15 = vld [vmem:[%s7704_s1 + $0x7b8] sm:$0xff] }
  0xb6   : > { %4419 = vmatpush3.msra.mxu0 %v917_v16  ;;  %4496 = vmatprep.subr.mxu1 %v966_v23  ;;  %v909_v16 = vld [vmem:[%s7704_s1 + $0x628] sm:$0xff]  ;;  %v943_v17 = vld [vmem:[%s7704_s1 + $0x738] sm:$0xff]  ;;  %v958_v23 = vld [vmem:[%s7704_s1 + $0x7b0] sm:$0xff] }
  0xb7   : > { %1815 = vmatmul.mubr.f32.gmra.mxu0 %v370_v18  ;;  %1960 = vmatmul.mubr.f32.gmra.mxu1 %v372_v19  ;;  %v570_v18 = vld [vmem:[%s5427_s18 + $0x810] sm:$0xff]  ;;  %v572_v19 = vld [vmem:[%s5427_s18 + $0x820] sm:$0xff] }
  0xb8   : > { %1819 = vmatprep.mubr.f32.mxu0 %v396_v20  ;;  %1964 = vmatprep.mubr.f32.mxu1 %v398_v21  ;;  %v596_v20 = vld [vmem:[%s5427_s18 + $0x8e0] sm:$0xff]  ;;  %v598_v21 = vld [vmem:[%s5427_s18 + $0x8f0] sm:$0xff] }
  0xb9   : > { %4420 = vmatprep.subr.mxu0 %v932_v22  ;;  %4497 = vmatpush3.msra.mxu1 %v950_v25  ;;  %v924_v22 = vld [vmem:[%s7704_s1 + $0x6a0] sm:$0xff]  ;;  %v942_v25 = vld [vmem:[%s7704_s1 + $0x730] sm:$0xff] }
  0xba   : > { %4421 = vmatpush3.msra.mxu0 %v916_v24  ;;  %4498 = vmatprep.subr.mxu1 %v965_v31  ;;  %v908_v24 = vld [vmem:[%s7704_s1 + $0x620] sm:$0xff]  ;;  %v957_v31 = vld [vmem:[%s7704_s1 + $0x7a8] sm:$0xff] }
  0xbb   : > { %1820 = vmatmul.mubr.f32.gmra.mxu0 %v395_v26  ;;  %1965 = vmatmul.mubr.f32.gmra.mxu1 %v397_v27  ;;  %v595_v26 = vld [vmem:[%s5427_s18 + $0x8d8] sm:$0xff]  ;;  %v597_v27 = vld [vmem:[%s5427_s18 + $0x8e8] sm:$0xff] }
  0xbc   : > { %1824 = vmatprep.mubr.f32.mxu0 %v421_v28  ;;  %1969 = vmatprep.mubr.f32.mxu1 %v423_v29  ;;  %v621_v28 = vld [vmem:[%s5427_s18 + $0x9a8] sm:$0xff]  ;;  %v623_v29 = vld [vmem:[%s5427_s18 + $0x9b8] sm:$0xff] }
  0xbd   : > { %4422 = vmatprep.subr.mxu0 %v931_v30  ;;  %4499 = vmatpush3.msra.mxu1 %v949_v33  ;;  %v923_v30 = vld [vmem:[%s7704_s1 + $0x698] sm:$0xff]  ;;  %v941_v33 = vld [vmem:[%s7704_s1 + $0x728] sm:$0xff] }
  0xbe   : > { %4423 = vmatpush3.msra.mxu0 %v915_v32  ;;  %4500 = vmatprep.subr.mxu1 %v964_v39  ;;  %v907_v32 = vld [vmem:[%s7704_s1 + $0x618] sm:$0xff]  ;;  %v956_v39 = vld [vmem:[%s7704_s1 + $0x7a0] sm:$0xff] }
  0xbf   : > { %1825 = vmatmul.mubr.f32.gmra.mxu0 %v420_v34  ;;  %1970 = vmatmul.mubr.f32.gmra.mxu1 %v422_v35  ;;  %v620_v34 = vld [vmem:[%s5427_s18 + $0x9a0] sm:$0xff]  ;;  %v622_v35 = vld [vmem:[%s5427_s18 + $0x9b0] sm:$0xff] }
  0xc0   : > { %1829 = vmatprep.mubr.f32.mxu0 %v446_v36  ;;  %1974 = vmatprep.mubr.f32.mxu1 %v448_v37  ;;  %v646_v36 = vld [vmem:[%s5427_s18 + $0xa70] sm:$0xff]  ;;  %v648_v37 = vld [vmem:[%s5427_s18 + $0xa80] sm:$0xff] }
  0xc1   : > { %4424 = vmatprep.subr.mxu0 %v930_v38  ;;  %4501 = vmatpush3.msra.mxu1 %v948_v41  ;;  %v922_v38 = vld [vmem:[%s7704_s1 + $0x690] sm:$0xff]  ;;  %v940_v41 = vld [vmem:[%s7704_s1 + $0x720] sm:$0xff] }
  0xc2   : > { %4425 = vmatpush3.msra.mxu0 %v914_v40  ;;  %4502 = vmatprep.subr.mxu1 %v963_v47  ;;  %v906_v40 = vld [vmem:[%s7704_s1 + $0x610] sm:$0xff]  ;;  %v955_v47 = vld [vmem:[%s7704_s1 + $0x798] sm:$0xff] }
  0xc3   : > { %1830 = vmatmul.mubr.f32.gmra.mxu0 %v445_v42  ;;  %1975 = vmatmul.mubr.f32.gmra.mxu1 %v447_v43  ;;  %v645_v42 = vld [vmem:[%s5427_s18 + $0xa68] sm:$0xff]  ;;  %v647_v43 = vld [vmem:[%s5427_s18 + $0xa78] sm:$0xff] }
  0xc4   : > { %1834 = vmatprep.mubr.f32.mxu0 %v471_v44  ;;  %1979 = vmatprep.mubr.f32.mxu1 %v473_v45  ;;  %v671_v44 = vld [vmem:[%s5427_s18 + $0xb38] sm:$0xff]  ;;  %v673_v45 = vld [vmem:[%s5427_s18 + $0xb48] sm:$0xff] }
  0xc5   : > { %4426 = vmatprep.subr.mxu0 %v929_v46  ;;  %4503 = vmatpush3.msra.mxu1 %v947_v49  ;;  %v921_v46 = vld [vmem:[%s7704_s1 + $0x688] sm:$0xff]  ;;  %v939_v49 = vld [vmem:[%s7704_s1 + $0x718] sm:$0xff] }
  0xc6   : > { %4427 = vmatpush3.msra.mxu0 %v913_v48  ;;  %4504 = vmatprep.subr.mxu1 %v962_v55  ;;  %v905_v48 = vld [vmem:[%s7704_s1 + $0x608] sm:$0xff]  ;;  %v938_v55 = vld [vmem:[%s7704_s1 + $0x710] sm:$0xff] }
  0xc7   : > { %1835 = vmatmul.mubr.f32.gmra.mxu0 %v470_v50  ;;  %1980 = vmatmul.mubr.f32.gmra.mxu1 %v472_v51  ;;  %v670_v50 = vld [vmem:[%s5427_s18 + $0xb30] sm:$0xff]  ;;  %v672_v51 = vld [vmem:[%s5427_s18 + $0xb40] sm:$0xff] }
  0xc8   : > { %1839 = vmatprep.mubr.f32.mxu0 %v496_v52  ;;  %1984 = vmatprep.mubr.f32.mxu1 %v498_v53  ;;  %v954_v52 = vld [vmem:[%s7704_s1 + $0x790] sm:$0xff]  ;;  %v696_v53 = vld [vmem:[%s5427_s18 + $0xc00] sm:$0xff] }
  0xc9   : > { %4428 = vmatprep.subr.mxu0 %v928_v54  ;;  %4505 = vmatpush3.msra.mxu1 %v946_v57  ;;  %v698_v54 = vld [vmem:[%s5427_s18 + $0xc10] sm:$0xff]  ;;  %v953_v57 = vld [vmem:[%s7704_s1 + $0x788] sm:$0xff] }
  0xca   : > { %4429 = vmatpush3.msra.mxu0 %v912_v56  ;;  %4506 = vmatprep.subr.mxu1 %v961_v63  ;;  %v920_v56 = vld [vmem:[%s7704_s1 + $0x680] sm:$0xff]  ;;  %v325_v63 = vld [vmem:[%s5427_s18 + $0x68] sm:$0xff] }
  0xcb   : > { %1840 = vmatmul.mubr.f32.gmra.mxu0 %v495_v58  ;;  %1985 = vmatmul.mubr.f32.gmra.mxu1 %v497_v59  ;;  %v695_v58 = vld [vmem:[%s5427_s18 + $0xbf8] sm:$0xff]  ;;  %v697_v59 = vld [vmem:[%s5427_s18 + $0xc08] sm:$0xff] }
  0xcc   : > { %1844 = vmatprep.mubr.f32.mxu0 %v521_v60  ;;  %1989 = vmatprep.mubr.f32.mxu1 %v523_v61  ;;  %v904_v60 = vld [vmem:[%s7704_s1 + $0x600] sm:$0xff]  ;;  %v937_v61 = vld [vmem:[%s7704_s1 + $0x708] sm:$0xff] }
  0xcd   : > { %4430 = vmatprep.subr.mxu0 %v927_v62  ;;  %4507 = vmatpush3.msra.mxu1 %v945_v1  ;;  %v952_v62 = vld [vmem:[%s7704_s1 + $0x780] sm:$0xff]  ;;  %v327_v1 = vld [vmem:[%s5427_s18 + $0x78] sm:$0xff] }
  0xce   : > { %4431 = vmatpush3.msra.mxu0 %v911_v0  ;;  %4508 = vmatprep.subr.mxu1 %v960_v7  ;;  %v936_v0 = vld [vmem:[%s7704_s1 + $0x700] sm:$0xff] }
  0xcf   : > { %1845 = vmatmul.mubr.f32.gmra.mxu0 %v520_v2  ;;  %1990 = vmatmul.mubr.f32.gmra.mxu1 %v522_v3  ;;  %v324_v2 = vld [vmem:[%s5427_s18 + $0x60] sm:$0xff]  ;;  %v326_v3 = vld [vmem:[%s5427_s18 + $0x70] sm:$0xff] }
  0xd0   : > { %1849 = vmatprep.mubr.f32.mxu0 %v546_v4  ;;  %1994 = vmatprep.mubr.f32.mxu1 %v548_v5  ;;  %v999_v4 = vld [vmem:[%s7704_s1 + $0x8f8] sm:$0xff]  ;;  %v350_v5 = vld [vmem:[%s5427_s18 + $0x130] sm:$0xff]  ;;  %v352_v7 = vld [vmem:[%s5427_s18 + $0x140] sm:$0xff] }
  0xd1   : > { %4432 = vmatprep.subr.mxu0 %v926_v6  ;;  %4509 = vmatpush3.msra.mxu1 %v944_v9  ;;  %v983_v6 = vld [vmem:[%s7704_s1 + $0x878] sm:$0xff] }
  0xd2   : > { %4433 = vmatpush3.msra.mxu0 %v910_v8  ;;  %4510 = vmatprep.subr.mxu1 %v959_v15 }
  0xd3   : > { %1850 = vmatmul.mubr.f32.gmra.mxu0 %v545_v10  ;;  %1995 = vmatmul.mubr.f32.gmra.mxu1 %v547_v11  ;;  %v998_v10 = vld [vmem:[%s7704_s1 + $0x8f0] sm:$0xff]  ;;  %v1031_v11 = vld [vmem:[%s7704_s1 + $0x9f8] sm:$0xff] }
  0xd4   : > { %1854 = vmatprep.mubr.f32.mxu0 %v571_v12  ;;  %1999 = vmatprep.mubr.f32.mxu1 %v573_v13  ;;  %v349_v12 = vld [vmem:[%s5427_s18 + $0x128] sm:$0xff]  ;;  %v351_v13 = vld [vmem:[%s5427_s18 + $0x138] sm:$0xff] }
  0xd5   : > { %4434 = vmatprep.subr.mxu0 %v925_v14  ;;  %4511 = vmatpush3.msra.mxu1 %v943_v17  ;;  %v6238_v14 = vld [vmem:[%s7705_s2] ss:$0 sm:$0xff]  ;;  %v982_v17 = vld [vmem:[%s7704_s1 + $0x870] sm:$0xff] }
  0xd6   : > { %4435 = vmatpush3.msra.mxu0 %v909_v16  ;;  %4512 = vmatprep.subr.mxu1 %v958_v23 }
  0xd7   : > { %1855 = vmatmul.mubr.f32.gmra.mxu0 %v570_v18  ;;  %2000 = vmatmul.mubr.f32.gmra.mxu1 %v572_v19  ;;  %v375_v18 = vld [vmem:[%s5427_s18 + $0x1f8] sm:$0xff] }
  0xd8   : > { %1859 = vmatprep.mubr.f32.mxu0 %v596_v20  ;;  %2004 = vmatprep.mubr.f32.mxu1 %v598_v21  ;;  %v377_v21 = vld [vmem:[%s5427_s18 + $0x208] sm:$0xff] }
  0xd9   : > { %4436 = vmatprep.subr.mxu0 %v924_v22  ;;  %4513 = vmatpush3.msra.mxu1 %v942_v25  ;;  %v997_v22 = vld [vmem:[%s7704_s1 + $0x8e8] sm:$0xff] }
  0xda   : > { %4437 = vmatpush3.msra.mxu0 %v908_v24  ;;  %4514 = vmatprep.subr.mxu1 %v957_v31  ;;  %v981_v25 = vld [vmem:[%s7704_s1 + $0x868] sm:$0xff] }
  0xdb   : > { %1860 = vmatmul.mubr.f32.gmra.mxu0 %v595_v26  ;;  %2005 = vmatmul.mubr.f32.gmra.mxu1 %v597_v27  ;;  %v1015_v26 = vld [vmem:[%s7704_s1 + $0x978] sm:$0xff] }
  0xdc   : > { %1864 = vmatprep.mubr.f32.mxu0 %v621_v28  ;;  %2009 = vmatprep.mubr.f32.mxu1 %v623_v29  ;;  %v374_v28 = vld [vmem:[%s5427_s18 + $0x1f0] sm:$0xff]  ;;  %v376_v29 = vld [vmem:[%s5427_s18 + $0x200] sm:$0xff] }
  0xdd   : > { %4438 = vmatprep.subr.mxu0 %v923_v30  ;;  %4515 = vmatpush3.msra.mxu1 %v941_v33  ;;  %v402_v33 = vld [vmem:[%s5427_s18 + $0x2d0] sm:$0xff] }
  0xde   : > { %4439 = vmatpush3.msra.mxu0 %v907_v32  ;;  %4516 = vmatprep.subr.mxu1 %v956_v39  ;;  %v400_v32 = vld [vmem:[%s5427_s18 + $0x2c0] sm:$0xff] }
  0xdf   : > { %1865 = vmatmul.mubr.f32.gmra.mxu0 %v620_v34  ;;  %2010 = vmatmul.mubr.f32.gmra.mxu1 %v622_v35 }
  0xe0   : > { %1869 = vmatprep.mubr.f32.mxu0 %v646_v36  ;;  %2014 = vmatprep.mubr.f32.mxu1 %v648_v37  ;;  %v996_v37 = vld [vmem:[%s7704_s1 + $0x8e0] sm:$0xff] }
  0xe1   : > { %4440 = vmatprep.subr.mxu0 %v922_v38  ;;  %4517 = vmatpush3.msra.mxu1 %v940_v41  ;;  %v1030_v38 = vld [vmem:[%s7704_s1 + $0x9f0] sm:$0xff]  ;;  %v980_v41 = vld [vmem:[%s7704_s1 + $0x860] sm:$0xff] }
  0xe2   : > { %4441 = vmatpush3.msra.mxu0 %v906_v40  ;;  %4518 = vmatprep.subr.mxu1 %v955_v47 }
  0xe3   : > { %1870 = vmatmul.mubr.f32.gmra.mxu0 %v645_v42  ;;  %2015 = vmatmul.mubr.f32.gmra.mxu1 %v647_v43  ;;  %v1014_v42 = vld [vmem:[%s7704_s1 + $0x970] sm:$0xff] }
  0xe4   : > { %1874 = vmatprep.mubr.f32.mxu0 %v671_v44  ;;  %2019 = vmatprep.mubr.f32.mxu1 %v673_v45  ;;  %v399_v44 = vld [vmem:[%s5427_s18 + $0x2b8] sm:$0xff]  ;;  %v401_v45 = vld [vmem:[%s5427_s18 + $0x2c8] sm:$0xff] }
  0xe5   : > { %4442 = vmatprep.subr.mxu0 %v921_v46  ;;  %4519 = vmatpush3.msra.mxu1 %v939_v49  ;;  %v427_v49 = vld [vmem:[%s5427_s18 + $0x398] sm:$0xff] }
  0xe6   : > { %4443 = vmatpush3.msra.mxu0 %v905_v48  ;;  %4520 = vmatprep.subr.mxu1 %v954_v52  ;;  %v425_v48 = vld [vmem:[%s5427_s18 + $0x388] sm:$0xff] }
  0xe7   : > { %1875 = vmatmul.mubr.f32.gmra.mxu0 %v670_v50  ;;  %2020 = vmatmul.mubr.f32.gmra.mxu1 %v672_v51 }
  0xe8   : > { %1879 = vmatprep.mubr.f32.mxu0 %v696_v53  ;;  %2024 = vmatprep.mubr.f32.mxu1 %v698_v54  ;;  %v995_v53 = vld [vmem:[%s7704_s1 + $0x8d8] sm:$0xff]  ;;  %v1029_v54 = vld [vmem:[%s7704_s1 + $0x9e8] sm:$0xff] }
  0xe9   : > { %4521 = vmatpush3.msra.mxu1 %v938_v55  ;;  %4444 = vmatprep.subr.mxu0 %v920_v56 }
  0xea   : > { %4522 = vmatprep.subr.mxu1 %v953_v57  ;;  %4445 = vmatpush3.msra.mxu0 %v904_v60  ;;  %v979_v57 = vld [vmem:[%s7704_s1 + $0x858] sm:$0xff]  ;;  %v424_v60 = vld [vmem:[%s5427_s18 + $0x380] sm:$0xff] }
  0xeb   : > { %1880 = vmatmul.mubr.f32.gmra.mxu0 %v695_v58  ;;  %2025 = vmatmul.mubr.f32.gmra.mxu1 %v697_v59  ;;  %v1013_v58 = vld [vmem:[%s7704_s1 + $0x968] sm:$0xff] }
  0xec   : > { %4523 = vmatpush3.msra.mxu1 %v937_v61  ;;  %2094 = vmatprep.mubr.f32.mxu0 %v325_v63  ;;  %v426_v61 = vld [vmem:[%s5427_s18 + $0x390] sm:$0xff] }
  0xed   : > { %4524 = vmatprep.subr.mxu1 %v952_v62  ;;  %2239 = vmatprep.mubr.f32.mxu1 %v327_v1  ;;  %v452_v1 = vld [vmem:[%s5427_s18 + $0x460] sm:$0xff] }
  0xee   : > { %4525 = vmatpush3.msra.mxu1 %v936_v0  ;;  %v3966_v8 = vpop.f32.mrf.mxu0  ;;  %4574 = vmatprep.subr.mxu0 %v999_v4  ;;  %v450_v0 = vld [vmem:[%s5427_s18 + $0x450] sm:$0xff] }
  0xef   : > { %v4046_v9 = vpop.f32.mrf.mxu1  ;;  %2095 = vmatmul.mubr.f32.vlgmr.msra.gmra.mxu0 %v324_v2  ;;  %2240 = vmatmul.mubr.f32.vlgmr.msra.gmra.mxu1 %v326_v3 }
  0xf0   : > { %2099 = vmatprep.mubr.f32.mxu0 %v350_v5  ;;  %4575 = vmatpush3.msra.mxu0 %v983_v6  ;;  %v3967_v15 = vpop.f32.mrf.mxu0  ;;  %v994_v5 = vld [vmem:[%s7704_s1 + $0x8d0] sm:$0xff]  ;;  %v1028_v6 = vld [vmem:[%s7704_s1 + $0x9e0] sm:$0xff] }
  0xf1   : > { %v4047_v16 = vpop.f32.mrf.mxu1  ;;  %2244 = vmatprep.mubr.f32.mxu1 %v352_v7  ;;  %v3968_v19 = vadd.f32 %v3967_v15, %v3966_v8  ;;  %4576 = vmatprep.subr.mxu0 %v998_v10  ;;  %v1012_v10 = vld [vmem:[%s7704_s1 + $0x960] sm:$0xff] }
  0xf2   : > { %v4048_v20 = vadd.f32 %v4047_v16, %v4046_v9  ;;  %4654 = vmatprep.subr.mxu1 %v1031_v11  ;;  %v3969_v23 = vpop.f32.mrf.mxu0  ;;  %4577 = vmatpush3.msra.mxu0 %v982_v17  ;;  %v978_v9 = vld [vmem:[%s7704_s1 + $0x850] sm:$0xff]  ;;  %v475_v17 = vld [vmem:[%s5427_s18 + $0x518] sm:$0xff] }
  0xf3   : > { %v4049_v24 = vpop.f32.mrf.mxu1  ;;  %2100 = vmatmul.mubr.f32.gmra.mxu0 %v349_v12  ;;  %2245 = vmatmul.mubr.f32.gmra.mxu1 %v351_v13  ;;  %v1227_v27 = vadd.f32 %v3968_v19, %v6238_v14  ;;  %v449_v12 = vld [vmem:[%s5427_s18 + $0x448] sm:$0xff]  ;;  %v451_v13 = vld [vmem:[%s5427_s18 + $0x458] sm:$0xff] }
  0xf4   : > { %2104 = vmatprep.mubr.f32.mxu0 %v375_v18  ;;  %v3970_v30 = vpop.f32.mrf.mxu0  ;;  %2249 = vmatprep.mubr.f32.mxu1 %v377_v21  ;;  %v477_v18 = vld [vmem:[%s5427_s18 + $0x528] sm:$0xff] }
  0xf5   : > { %v4050_v31 = vpop.f32.mrf.mxu1  ;;  %4578 = vmatprep.subr.mxu0 %v997_v22  ;;  %v6259_v34 = vadd.f32 %v4048_v20, %v1227_v27  ;;  %v3971_v35 = vadd.f32 %v3970_v30, %v3969_v23  ;;  %4655 = vmatpush3.msra.mxu1 %v1015_v26  ;;  %v993_v22 = vld [vmem:[%s7704_s1 + $0x8c8] sm:$0xff]  ;;  %v1027_v23 = vld [vmem:[%s7704_s1 + $0x9d8] sm:$0xff]  ;;  %v476_v30 = vld [vmem:[%s5427_s18 + $0x520] sm:$0xff] }
  0xf6   : > { %v4051_v36 = vadd.f32 %v4050_v31, %v4049_v24  ;;  %4579 = vmatpush3.msra.mxu0 %v981_v25  ;;  %4656 = vmatprep.subr.mxu1 %v1030_v38  ;;  %v977_v26 = vld [vmem:[%s7704_s1 + $0x848] sm:$0xff]  ;;  %v1011_v27 = vld [vmem:[%s7704_s1 + $0x958] sm:$0xff] }
  0xf7   : > { %v3972_v39 = vpop.f32.mrf.mxu0  ;;  %v4052_v40 = vpop.f32.mrf.mxu1  ;;  %2105 = vmatmul.mubr.f32.gmra.mxu0 %v374_v28  ;;  %2250 = vmatmul.mubr.f32.gmra.mxu1 %v376_v29  ;;  %v1232_v43 = vadd.f32 %v3971_v35, %v6238_v14  ;;  %v474_v29 = vld [vmem:[%s5427_s18 + $0x510] sm:$0xff] }
  0xf8   : > { %2109 = vmatprep.mubr.f32.mxu0 %v400_v32  ;;  %2254 = vmatprep.mubr.f32.mxu1 %v402_v33  ;;  %v500_v33 = vld [vmem:[%s5427_s18 + $0x5e0] sm:$0xff]  ;;  %v502_v35 = vld [vmem:[%s5427_s18 + $0x5f0] sm:$0xff] }
  0xf9   : > { %v3973_v46 = vpop.f32.mrf.mxu0  ;;  %v4053_v47 = vpop.f32.mrf.mxu1  ;;  %4580 = vmatprep.subr.mxu0 %v996_v37  ;;  %v6278_v50 = vadd.f32 %v4051_v36, %v1232_v43  ;;  %4657 = vmatpush3.msra.mxu1 %v1014_v42  ;;  %v976_v43 = vld [vmem:[%s7704_s1 + $0x840] sm:$0xff] }
  0xfa   : > { %v3974_v51 = vadd.f32 %v3973_v46, %v3972_v39  ;;  %v4054_v52 = vadd.f32 %v4053_v47, %v4052_v40  ;;  %4581 = vmatpush3.msra.mxu0 %v980_v41  ;;  %4658 = vmatprep.subr.mxu1 %v1029_v54  ;;  %v992_v39 = vld [vmem:[%s7704_s1 + $0x8c0] sm:$0xff]  ;;  %v1026_v40 = vld [vmem:[%s7704_s1 + $0x9d0] sm:$0xff]  ;;  %v499_v46 = vld [vmem:[%s5427_s18 + $0x5d8] sm:$0xff] }
  0xfb   : > { %v3975_v55 = vpop.f32.mrf.mxu0  ;;  %v4055_v56 = vpop.f32.mrf.mxu1  ;;  %2110 = vmatmul.mubr.f32.gmra.mxu0 %v399_v44  ;;  %2255 = vmatmul.mubr.f32.gmra.mxu1 %v401_v45  ;;  %v1010_v44 = vld [vmem:[%s7704_s1 + $0x950] sm:$0xff]  ;;  %v501_v47 = vld [vmem:[%s5427_s18 + $0x5e8] sm:$0xff] }
  0xfc   : > { %v1237_v59 = vadd.f32 %v3974_v51, %v6238_v14  ;;  %2114 = vmatprep.mubr.f32.mxu0 %v425_v48  ;;  %2259 = vmatprep.mubr.f32.mxu1 %v427_v49  ;;  %v525_v51 = vld [vmem:[%s5427_s18 + $0x6a8] sm:$0xff] }
  0xfd   : > { %v3976_v62 = vpop.f32.mrf.mxu0  ;;  %v4056_v63 = vpop.f32.mrf.mxu1  ;;  %4582 = vmatprep.subr.mxu0 %v995_v53  ;;  %4659 = vmatpush3.msra.mxu1 %v1013_v58 }
  0xfe   : > { %v6297_v2 = vadd.f32 %v4054_v52, %v1237_v59  ;;  %v3977_v3 = vadd.f32 %v3976_v62, %v3975_v55  ;;  %v4057_v4 = vadd.f32 %v4056_v63, %v4055_v56  ;;  %4583 = vmatpush3.msra.mxu0 %v979_v57  ;;  %4660 = vmatprep.subr.mxu1 %v1028_v6  ;;  %v527_v52 = vld [vmem:[%s5427_s18 + $0x6b8] sm:$0xff]  ;;  %v1025_v57 = vld [vmem:[%s7704_s1 + $0x9c8] sm:$0xff]  ;;  %v524_v63 = vld [vmem:[%s5427_s18 + $0x6a0] sm:$0xff] }
  0xff   : > { %v3978_v7 = vpop.f32.mrf.mxu0  ;;  %v4058_v8 = vpop.f32.mrf.mxu1  ;;  %2115 = vmatmul.mubr.f32.gmra.mxu0 %v424_v60  ;;  %2260 = vmatmul.mubr.f32.gmra.mxu1 %v426_v61  ;;  %v991_v56 = vld [vmem:[%s7704_s1 + $0x8b8] sm:$0xff]  ;;  %v1009_v61 = vld [vmem:[%s7704_s1 + $0x948] sm:$0xff] }
 0x100   : > { %v1242_v11 = vadd.f32 %v3977_v3, %v6238_v14  ;;  %2119 = vmatprep.mubr.f32.mxu0 %v450_v0  ;;  %2264 = vmatprep.mubr.f32.mxu1 %v452_v1  ;;  %v975_v60 = vld [vmem:[%s7704_s1 + $0x838] sm:$0xff]  ;;  %v526_v0 = vld [vmem:[%s5427_s18 + $0x6b0] sm:$0xff] }
 0x101   : > { %v3979_v15 = vpop.f32.mrf.mxu0  ;;  %v4059_v16 = vpop.f32.mrf.mxu1  ;;  %4584 = vmatprep.subr.mxu0 %v994_v5  ;;  %4661 = vmatpush3.msra.mxu1 %v1012_v10  ;;  %v552_v5 = vld [vmem:[%s5427_s18 + $0x780] sm:$0xff] }
 0x102   : > { %v6316_v19 = vadd.f32 %v4057_v4, %v1242_v11  ;;  %v3980_v20 = vadd.f32 %v3979_v15, %v3978_v7  ;;  %v4060_v21 = vadd.f32 %v4059_v16, %v4058_v8  ;;  %4585 = vmatpush3.msra.mxu0 %v978_v9  ;;  %4662 = vmatprep.subr.mxu1 %v1027_v23  ;;  %v550_v4 = vld [vmem:[%s5427_s18 + $0x770] sm:$0xff]  ;;  %v1024_v10 = vld [vmem:[%s7704_s1 + $0x9c0] sm:$0xff]  ;;  %v577_v23 = vld [vmem:[%s5427_s18 + $0x848] sm:$0xff] }
 0x103   : > { %v3981_v24 = vpop.f32.mrf.mxu0  ;;  %v4061_v25 = vpop.f32.mrf.mxu1  ;;  %2120 = vmatmul.mubr.f32.gmra.mxu0 %v449_v12  ;;  %2265 = vmatmul.mubr.f32.gmra.mxu1 %v451_v13  ;;  %v990_v9 = vld [vmem:[%s7704_s1 + $0x8b0] sm:$0xff]  ;;  %v1008_v15 = vld [vmem:[%s7704_s1 + $0x940] sm:$0xff] }
 0x104   : > { %v1247_v28 = vadd.f32 %v3980_v20, %v6238_v14  ;;  %2124 = vmatprep.mubr.f32.mxu0 %v475_v17  ;;  %2269 = vmatprep.mubr.f32.mxu1 %v477_v18  ;;  %v974_v13 = vld [vmem:[%s7704_s1 + $0x830] sm:$0xff]  ;;  %v549_v17 = vld [vmem:[%s5427_s18 + $0x768] sm:$0xff]  ;;  %v551_v18 = vld [vmem:[%s5427_s18 + $0x778] sm:$0xff] }
 0x105   : > { %v3982_v31 = vpop.f32.mrf.mxu0  ;;  %v4062_v32 = vpop.f32.mrf.mxu1  ;;  %4586 = vmatprep.subr.mxu0 %v993_v22  ;;  %4663 = vmatpush3.msra.mxu1 %v1011_v27  ;;  %v575_v22 = vld [vmem:[%s5427_s18 + $0x838] sm:$0xff]  ;;  %v989_v27 = vld [vmem:[%s7704_s1 + $0x8a8] sm:$0xff] }
 0x106   : > { %v6335_v36 = vadd.f32 %v4060_v21, %v1247_v28  ;;  %v3983_v37 = vadd.f32 %v3982_v31, %v3981_v24  ;;  %v4063_v38 = vadd.f32 %v4062_v32, %v4061_v25  ;;  %4587 = vmatpush3.msra.mxu0 %v977_v26  ;;  %4664 = vmatprep.subr.mxu1 %v1026_v40  ;;  %v1023_v28 = vld [vmem:[%s7704_s1 + $0x9b8] sm:$0xff]  ;;  %v973_v31 = vld [vmem:[%s7704_s1 + $0x828] sm:$0xff]  ;;  %v600_v40 = vld [vmem:[%s5427_s18 + $0x900] sm:$0xff] }
 0x107   : > { %v3984_v41 = vpop.f32.mrf.mxu0  ;;  %v4064_v42 = vpop.f32.mrf.mxu1  ;;  %2125 = vmatmul.mubr.f32.gmra.mxu0 %v474_v29  ;;  %2270 = vmatmul.mubr.f32.gmra.mxu1 %v476_v30  ;;  %v1007_v32 = vld [vmem:[%s7704_s1 + $0x938] sm:$0xff] }
 0x108   : > { %v1252_v45 = vadd.f32 %v3983_v37, %v6238_v14  ;;  %2129 = vmatprep.mubr.f32.mxu0 %v500_v33  ;;  %2274 = vmatprep.mubr.f32.mxu1 %v502_v35  ;;  %v574_v35 = vld [vmem:[%s5427_s18 + $0x830] sm:$0xff]  ;;  %v576_v37 = vld [vmem:[%s5427_s18 + $0x840] sm:$0xff] }
 0x109   : > { %v3985_v48 = vpop.f32.mrf.mxu0  ;;  %v4065_v49 = vpop.f32.mrf.mxu1  ;;  %4588 = vmatprep.subr.mxu0 %v992_v39  ;;  %4665 = vmatpush3.msra.mxu1 %v1010_v44 }
 0x10a   : > { %v6354_v53 = vadd.f32 %v4063_v38, %v1252_v45  ;;  %v3986_v54 = vadd.f32 %v3985_v48, %v3984_v41  ;;  %v4066_v55 = vadd.f32 %v4065_v49, %v4064_v42  ;;  %4589 = vmatpush3.msra.mxu0 %v976_v43  ;;  %4666 = vmatprep.subr.mxu1 %v1025_v57  ;;  %v602_v41 = vld [vmem:[%s5427_s18 + $0x910] sm:$0xff]  ;;  %v988_v45 = vld [vmem:[%s7704_s1 + $0x8a0] sm:$0xff] }
 0x10b   : > { %v3987_v58 = vpop.f32.mrf.mxu0  ;;  %v4067_v59 = vpop.f32.mrf.mxu1  ;;  %2130 = vmatmul.mubr.f32.gmra.mxu0 %v499_v46  ;;  %2275 = vmatmul.mubr.f32.gmra.mxu1 %v501_v47  ;;  %v1022_v46 = vld [vmem:[%s7704_s1 + $0x9b0] sm:$0xff]  ;;  %v972_v49 = vld [vmem:[%s7704_s1 + $0x820] sm:$0xff] }
 0x10c   : > { %v1257_v62 = vadd.f32 %v3986_v54, %v6238_v14  ;;  %2134 = vmatprep.mubr.f32.mxu0 %v525_v51  ;;  %2279 = vmatprep.mubr.f32.mxu1 %v527_v52  ;;  %v1006_v51 = vld [vmem:[%s7704_s1 + $0x930] sm:$0xff]  ;;  %v599_v54 = vld [vmem:[%s5427_s18 + $0x8f8] sm:$0xff] }
 0x10d   : > { %v3988_v1 = vpop.f32.mrf.mxu0  ;;  %v4068_v3 = vpop.f32.mrf.mxu1  ;;  %4590 = vmatprep.subr.mxu0 %v991_v56  ;;  %4667 = vmatpush3.msra.mxu1 %v1009_v61 }
 0x10e   : > { %v6373_v6 = vadd.f32 %v4066_v55, %v1257_v62  ;;  %v3989_v7 = vadd.f32 %v3988_v1, %v3987_v58  ;;  %v4069_v8 = vadd.f32 %v4068_v3, %v4067_v59  ;;  %4591 = vmatpush3.msra.mxu0 %v975_v60  ;;  %4668 = vmatprep.subr.mxu1 %v1024_v10  ;;  %v601_v55 = vld [vmem:[%s5427_s18 + $0x908] sm:$0xff]  ;;  %v627_v59 = vld [vmem:[%s5427_s18 + $0x9d8] sm:$0xff] }
 0x10f   : > { %v3990_v11 = vpop.f32.mrf.mxu0  ;;  %v4070_v12 = vpop.f32.mrf.mxu1  ;;  %2135 = vmatmul.mubr.f32.gmra.mxu0 %v524_v63  ;;  %2280 = vmatmul.mubr.f32.gmra.mxu1 %v526_v0  ;;  %v625_v58 = vld [vmem:[%s5427_s18 + $0x9c8] sm:$0xff]  ;;  %v987_v63 = vld [vmem:[%s7704_s1 + $0x898] sm:$0xff] }
 0x110   : > { %v1262_v16 = vadd.f32 %v3989_v7, %v6238_v14  ;;  %2139 = vmatprep.mubr.f32.mxu0 %v550_v4  ;;  %2284 = vmatprep.mubr.f32.mxu1 %v552_v5  ;;  %v1021_v0 = vld [vmem:[%s7704_s1 + $0x9a8] sm:$0xff]  ;;  %v971_v4 = vld [vmem:[%s7704_s1 + $0x818] sm:$0xff] }
 0x111   : > { %v3991_v20 = vpop.f32.mrf.mxu0  ;;  %v4071_v21 = vpop.f32.mrf.mxu1  ;;  %4592 = vmatprep.subr.mxu0 %v990_v9  ;;  %4669 = vmatpush3.msra.mxu1 %v1008_v15  ;;  %v1005_v5 = vld [vmem:[%s7704_s1 + $0x928] sm:$0xff]  ;;  %v626_v9 = vld [vmem:[%s5427_s18 + $0x9d0] sm:$0xff] }
 0x112   : > { %v6392_v24 = vadd.f32 %v4069_v8, %v1262_v16  ;;  %v3992_v25 = vadd.f32 %v3991_v20, %v3990_v11  ;;  %v4072_v26 = vadd.f32 %v4071_v21, %v4070_v12  ;;  %4593 = vmatpush3.msra.mxu0 %v974_v13  ;;  %4670 = vmatprep.subr.mxu1 %v1023_v28  ;;  %v624_v8 = vld [vmem:[%s5427_s18 + $0x9c0] sm:$0xff]  ;;  %v650_v12 = vld [vmem:[%s5427_s18 + $0xa90] sm:$0xff]  ;;  %v651_v28 = vld [vmem:[%s5427_s18 + $0xa98] sm:$0xff] }
 0x113   : > { %v3993_v29 = vpop.f32.mrf.mxu0  ;;  %v4073_v30 = vpop.f32.mrf.mxu1  ;;  %2140 = vmatmul.mubr.f32.gmra.mxu0 %v549_v17  ;;  %2285 = vmatmul.mubr.f32.gmra.mxu1 %v551_v18  ;;  %v652_v13 = vld [vmem:[%s5427_s18 + $0xaa0] sm:$0xff]  ;;  %v986_v18 = vld [vmem:[%s7704_s1 + $0x890] sm:$0xff] }
 0x114   : > { %v1267_v33 = vadd.f32 %v3992_v25, %v6238_v14  ;;  %2144 = vmatprep.mubr.f32.mxu0 %v575_v22  ;;  %2289 = vmatprep.mubr.f32.mxu1 %v577_v23  ;;  %v1020_v20 = vld [vmem:[%s7704_s1 + $0x9a0] sm:$0xff]  ;;  %v970_v23 = vld [vmem:[%s7704_s1 + $0x810] sm:$0xff] }
 0x115   : > { %v3994_v38 = vpop.f32.mrf.mxu0  ;;  %v4074_v39 = vpop.f32.mrf.mxu1  ;;  %4594 = vmatprep.subr.mxu0 %v989_v27  ;;  %4671 = vmatpush3.msra.mxu1 %v1007_v32  ;;  %v1004_v25 = vld [vmem:[%s7704_s1 + $0x920] sm:$0xff]  ;;  %v649_v27 = vld [vmem:[%s5427_s18 + $0xa88] sm:$0xff] }
 0x116   : > { %v6411_v42 = vadd.f32 %v4072_v26, %v1267_v33  ;;  %v3995_v43 = vadd.f32 %v3994_v38, %v3993_v29  ;;  %v4075_v44 = vadd.f32 %v4074_v39, %v4073_v30  ;;  %4595 = vmatpush3.msra.mxu0 %v973_v31  ;;  %4672 = vmatprep.subr.mxu1 %v1022_v46  ;;  %v675_v31 = vld [vmem:[%s5427_s18 + $0xb58] sm:$0xff]  ;;  %v677_v32 = vld [vmem:[%s5427_s18 + $0xb68] sm:$0xff]  ;;  %v674_v46 = vld [vmem:[%s5427_s18 + $0xb50] sm:$0xff] }
 0x117   : > { %v3996_v47 = vpop.f32.mrf.mxu0  ;;  %v4076_v48 = vpop.f32.mrf.mxu1  ;;  %2145 = vmatmul.mubr.f32.gmra.mxu0 %v574_v35  ;;  %2290 = vmatmul.mubr.f32.gmra.mxu1 %v576_v37  ;;  %v985_v38 = vld [vmem:[%s7704_s1 + $0x888] sm:$0xff]  ;;  %v1019_v39 = vld [vmem:[%s7704_s1 + $0x998] sm:$0xff] }
 0x118   : > { %v1272_v52 = vadd.f32 %v3995_v43, %v6238_v14  ;;  %2149 = vmatprep.mubr.f32.mxu0 %v600_v40  ;;  %2294 = vmatprep.mubr.f32.mxu1 %v602_v41  ;;  %v969_v43 = vld [vmem:[%s7704_s1 + $0x808] sm:$0xff] }
 0x119   : > { %v3997_v56 = vpop.f32.mrf.mxu0  ;;  %v4077_v57 = vpop.f32.mrf.mxu1  ;;  %4596 = vmatprep.subr.mxu0 %v988_v45  ;;  %4673 = vmatpush3.msra.mxu1 %v1006_v51  ;;  %v1018_v51 = vld [vmem:[%s7704_s1 + $0x990] sm:$0xff] }
 0x11a   : > { %v6430_v60 = vadd.f32 %v4075_v44, %v1272_v52  ;;  %v3998_v61 = vadd.f32 %v3997_v56, %v3996_v47  ;;  %v4078_v62 = vadd.f32 %v4077_v57, %v4076_v48  ;;  %4597 = vmatpush3.msra.mxu0 %v972_v49  ;;  %4674 = vmatprep.subr.mxu1 %v1021_v0  ;;  %v1003_v44 = vld [vmem:[%s7704_s1 + $0x918] sm:$0xff]  ;;  %v676_v47 = vld [vmem:[%s5427_s18 + $0xb60] sm:$0xff]  ;;  %v702_v57 = vld [vmem:[%s5427_s18 + $0xc30] sm:$0xff] }
 0x11b   : > { %v3999_v1 = vpop.f32.mrf.mxu0  ;;  %v4079_v3 = vpop.f32.mrf.mxu1  ;;  %2150 = vmatmul.mubr.f32.gmra.mxu0 %v599_v54  ;;  %2295 = vmatmul.mubr.f32.gmra.mxu1 %v601_v55  ;;  %v700_v52 = vld [vmem:[%s5427_s18 + $0xc20] sm:$0xff] }
 0x11c   : > { %v1277_v7 = vadd.f32 %v3998_v61, %v6238_v14  ;;  %2154 = vmatprep.mubr.f32.mxu0 %v625_v58  ;;  %2299 = vmatprep.mubr.f32.mxu1 %v627_v59  ;;  %v1002_v58 = vld [vmem:[%s7704_s1 + $0x910] sm:$0xff] }
 0x11d   : > { %v4000_v10 = vpop.f32.mrf.mxu0  ;;  %v4080_v11 = vpop.f32.mrf.mxu1  ;;  %4598 = vmatprep.subr.mxu0 %v987_v63  ;;  %4675 = vmatpush3.msra.mxu1 %v1005_v5  ;;  %v1017_v63 = vld [vmem:[%s7704_s1 + $0x988] sm:$0xff] }
 0x11e   : > { %v6449_v15 = vadd.f32 %v4078_v62, %v1277_v7  ;;  %v4001_v16 = vadd.f32 %v4000_v10, %v3999_v1  ;;  %v4081_v17 = vadd.f32 %v4080_v11, %v4079_v3  ;;  %4599 = vmatpush3.msra.mxu0 %v971_v4  ;;  %4676 = vmatprep.subr.mxu1 %v1020_v20  ;;  %v984_v62 = vld [vmem:[%s7704_s1 + $0x880] sm:$0xff]  ;;  %v699_v1 = vld [vmem:[%s5427_s18 + $0xc18] sm:$0xff]  ;;  %v701_v3 = vld [vmem:[%s5427_s18 + $0xc28] sm:$0xff] }
 0x11f   : > { %v4002_v21 = vpop.f32.mrf.mxu0  ;;  %v4082_v22 = vpop.f32.mrf.mxu1  ;;  %2155 = vmatmul.mubr.f32.gmra.mxu0 %v624_v8  ;;  %2300 = vmatmul.mubr.f32.gmra.mxu1 %v626_v9  ;;  %v968_v7 = vld [vmem:[%s7704_s1 + $0x800] sm:$0xff]  ;;  %v1001_v8 = vld [vmem:[%s7704_s1 + $0x908] sm:$0xff]  ;;  %v331_v20 = vld [vmem:[%s5427_s18 + $0x98] sm:$0xff] }
 0x120   : > { %v1282_v26 = vadd.f32 %v4001_v16, %v6238_v14  ;;  %2159 = vmatprep.mubr.f32.mxu0 %v650_v12  ;;  %2304 = vmatprep.mubr.f32.mxu1 %v652_v13  ;;  %v1016_v12 = vld [vmem:[%s7704_s1 + $0x980] sm:$0xff]  ;;  %v329_v13 = vld [vmem:[%s5427_s18 + $0x88] sm:$0xff] }
 0x121   : > { %v4003_v29 = vpop.f32.mrf.mxu0  ;;  %v4083_v30 = vpop.f32.mrf.mxu1  ;;  %4600 = vmatprep.subr.mxu0 %v986_v18  ;;  %4677 = vmatpush3.msra.mxu1 %v1004_v25  ;;  %v1000_v18 = vld [vmem:[%s7704_s1 + $0x900] sm:$0xff] }
 0x122   : > { %v6468_v33 = vadd.f32 %v4081_v17, %v1282_v26  ;;  %v4004_v35 = vadd.f32 %v4003_v29, %v4002_v21  ;;  %v4084_v37 = vadd.f32 %v4083_v30, %v4082_v22  ;;  %4601 = vmatpush3.msra.mxu0 %v970_v23  ;;  %4678 = vmatprep.subr.mxu1 %v1019_v39  ;;  %v328_v22 = vld [vmem:[%s5427_s18 + $0x80] sm:$0xff]  ;;  %v330_v23 = vld [vmem:[%s5427_s18 + $0x90] sm:$0xff] }
 0x123   : > { %v4005_v40 = vpop.f32.mrf.mxu0  ;;  %v4085_v41 = vpop.f32.mrf.mxu1  ;;  %2160 = vmatmul.mubr.f32.gmra.mxu0 %v649_v27  ;;  %2305 = vmatmul.mubr.f32.gmra.mxu1 %v651_v28  ;;  %v1063_v27 = vld [vmem:[%s7704_s1 + $0xaf8] sm:$0xff]  ;;  %v354_v28 = vld [vmem:[%s5427_s18 + $0x150] sm:$0xff] }
 0x124   : > { %v1287_v45 = vadd.f32 %v4004_v35, %v6238_v14  ;;  %2164 = vmatprep.mubr.f32.mxu0 %v675_v31  ;;  %2309 = vmatprep.mubr.f32.mxu1 %v677_v32  ;;  %v1047_v32 = vld [vmem:[%s7704_s1 + $0xa78] sm:$0xff]  ;;  %v356_v35 = vld [vmem:[%s5427_s18 + $0x160] sm:$0xff]  ;;  %v1062_v39 = vld [vmem:[%s7704_s1 + $0xaf0] sm:$0xff] }
 0x125   : > { %v4006_v48 = vpop.f32.mrf.mxu0  ;;  %v4086_v49 = vpop.f32.mrf.mxu1  ;;  %4602 = vmatprep.subr.mxu0 %v985_v38  ;;  %4679 = vmatpush3.msra.mxu1 %v1003_v44  ;;  %v355_v44 = vld [vmem:[%s5427_s18 + $0x158] sm:$0xff] }
 0x126   : > { %v6489_v54 = vadd.f32 %v4084_v37, %v1287_v45  ;;  %v4007_v55 = vadd.f32 %v4006_v48, %v4005_v40  ;;  %v4087_v56 = vadd.f32 %v4086_v49, %v4085_v41  ;;  %4603 = vmatpush3.msra.mxu0 %v969_v43  ;;  %4680 = vmatprep.subr.mxu1 %v1018_v51  ;;  %v1095_v40 = vld [vmem:[%s7704_s1 + $0xbf8] sm:$0xff]  ;;  %v353_v43 = vld [vmem:[%s5427_s18 + $0x148] sm:$0xff] }
 0x127   : > { %v4008_v59 = vpop.f32.mrf.mxu0  ;;  %v4088_v61 = vpop.f32.mrf.mxu1  ;;  %2165 = vmatmul.mubr.f32.gmra.mxu0 %v674_v46  ;;  %2310 = vmatmul.mubr.f32.gmra.mxu1 %v676_v47  ;;  %v1046_v47 = vld [vmem:[%s7704_s1 + $0xa70] sm:$0xff]  ;;  %v379_v48 = vld [vmem:[%s5427_s18 + $0x218] sm:$0xff] }
 0x128   : > { %v1292_v0 = vadd.f32 %v4007_v55, %v6238_v14  ;;  %2169 = vmatprep.mubr.f32.mxu0 %v700_v52  ;;  %2314 = vmatprep.mubr.f32.mxu1 %v702_v57  ;;  %v1061_v55 = vld [vmem:[%s7704_s1 + $0xae8] sm:$0xff] }
 0x129   : > { %v4009_v4 = vpop.f32.mrf.mxu0  ;;  %v4089_v5 = vpop.f32.mrf.mxu1  ;;  %4681 = vmatpush3.msra.mxu1 %v1002_v58  ;;  %4604 = vmatprep.subr.mxu0 %v984_v62  ;;  %v1045_v58 = vld [vmem:[%s7704_s1 + $0xa68] sm:$0xff]  ;;  %v378_v62 = vld [vmem:[%s5427_s18 + $0x210] sm:$0xff] }
 0x12a   : > { %v6510_v9 = vadd.f32 %v4087_v56, %v1292_v0  ;;  %v4010_v10 = vadd.f32 %v4009_v4, %v4008_v59  ;;  %v4090_v11 = vadd.f32 %v4089_v5, %v4088_v61  ;;  %4682 = vmatprep.subr.mxu1 %v1017_v63  ;;  %4605 = vmatpush3.msra.mxu0 %v968_v7  ;;  %v1079_v59 = vld [vmem:[%s7704_s1 + $0xb78] sm:$0xff]  ;;  %v380_v63 = vld [vmem:[%s5427_s18 + $0x220] sm:$0xff]  ;;  %v406_v4 = vld [vmem:[%s5427_s18 + $0x2f0] sm:$0xff] }
 0x12b   : > { %v4011_v16 = vpop.f32.mrf.mxu0  ;;  %v4091_v17 = vpop.f32.mrf.mxu1  ;;  %2170 = vmatmul.mubr.f32.gmra.mxu0 %v699_v1  ;;  %2315 = vmatmul.mubr.f32.gmra.mxu1 %v701_v3  ;;  %v404_v3 = vld [vmem:[%s5427_s18 + $0x2e0] sm:$0xff] }
 0x12c   : > { %v1297_v21 = vadd.f32 %v4010_v10, %v6238_v14  ;;  %4683 = vmatpush3.msra.mxu1 %v1001_v8  ;;  %2384 = vmatprep.mubr.f32.mxu0 %v329_v13  ;;  %v1094_v10 = vld [vmem:[%s7704_s1 + $0xbf0] sm:$0xff]  ;;  %v1044_v13 = vld [vmem:[%s7704_s1 + $0xa60] sm:$0xff] }
 0x12d   : > { %v4012_v25 = vpop.f32.mrf.mxu0  ;;  %v4092_v26 = vpop.f32.mrf.mxu1  ;;  %4684 = vmatprep.subr.mxu1 %v1016_v12  ;;  %2529 = vmatprep.mubr.f32.mxu1 %v331_v20  ;;  %v405_v20 = vld [vmem:[%s5427_s18 + $0x2e8] sm:$0xff] }
 0x12e   : > { %v6527_v29 = vadd.f32 %v4090_v11, %v1297_v21  ;;  %v4013_v30 = vadd.f32 %v4012_v25, %v4011_v16  ;;  %v4093_v31 = vadd.f32 %v4092_v26, %v4091_v17  ;;  %4685 = vmatpush3.msra.mxu1 %v1000_v18  ;;  %4734 = vmatprep.subr.mxu0 %v1063_v27  ;;  %v1078_v16 = vld [vmem:[%s7704_s1 + $0xb70] sm:$0xff]  ;;  %v403_v18 = vld [vmem:[%s5427_s18 + $0x2d8] sm:$0xff] }
 0x12f   : > { %v4126_v37 = vpop.f32.mrf.mxu0  ;;  %v4206_v38 = vpop.f32.mrf.mxu1  ;;  %2385 = vmatmul.mubr.f32.vlgmr.msra.gmra.mxu0 %v328_v22  ;;  %2530 = vmatmul.mubr.f32.vlgmr.msra.gmra.mxu1 %v330_v23  ;;  %v429_v23 = vld [vmem:[%s5427_s18 + $0x3a8] sm:$0xff]  ;;  %v431_v25 = vld [vmem:[%s5427_s18 + $0x3b8] sm:$0xff] }
 0x130   : > { %v1302_v41 = vadd.f32 %v4013_v30, %v6238_v14  ;;  %2389 = vmatprep.mubr.f32.mxu0 %v354_v28  ;;  %4735 = vmatpush3.msra.mxu0 %v1047_v32  ;;  %v381_v14 = vld [vmem:[%s5427_s18 + $0x228] sm:$0xff] }
 0x131   : > { %v4127_v45 = vpop.f32.mrf.mxu0  ;;  %v4207_v46 = vpop.f32.mrf.mxu1  ;;  %2534 = vmatprep.mubr.f32.mxu1 %v356_v35  ;;  %4736 = vmatprep.subr.mxu0 %v1062_v39  ;;  %v1093_v30 = vld [vmem:[%s7704_s1 + $0xbe8] sm:$0xff]  ;;  %v1043_v35 = vld [vmem:[%s7704_s1 + $0xa58] sm:$0xff]  ;;  %v428_v39 = vld [vmem:[%s5427_s18 + $0x3a0] sm:$0xff] }
 0x132   : > { %v6546_v49 = vadd.f32 %v4093_v31, %v1302_v41  ;;  %v4128_v51 = vadd.f32 %v4127_v45, %v4126_v37  ;;  %v4208_v52 = vadd.f32 %v4207_v46, %v4206_v38  ;;  %4814 = vmatprep.subr.mxu1 %v1095_v40  ;;  %4737 = vmatpush3.msra.mxu0 %v1046_v47  ;;  %v1077_v37 = vld [vmem:[%s7704_s1 + $0xb68] sm:$0xff]  ;;  %v430_v40 = vld [vmem:[%s5427_s18 + $0x3b0] sm:$0xff]  ;;  %v456_v45 = vld [vmem:[%s5427_s18 + $0x480] sm:$0xff] }
 0x133   : > { %v4129_v56 = vpop.f32.mrf.mxu0  ;;  %v4209_v57 = vpop.f32.mrf.mxu1  ;;  %2390 = vmatmul.mubr.f32.gmra.mxu0 %v353_v43  ;;  %2535 = vmatmul.mubr.f32.gmra.mxu1 %v355_v44  ;;  %v454_v44 = vld [vmem:[%s5427_s18 + $0x470] sm:$0xff] }
 0x134   : > { %v1517_v61 = vadd.f32 %v4128_v51, %v6259_v34  ;;  %2394 = vmatprep.mubr.f32.mxu0 %v379_v48  ;;  %2539 = vmatprep.mubr.f32.mxu1 %v381_v14  ;;  %v1060_v34 = vld [vmem:[%s7704_s1 + $0xae0] sm:$0xff] }
 0x135   : > { %v4130_v0 = vpop.f32.mrf.mxu0  ;;  %v4210_v1 = vpop.f32.mrf.mxu1  ;;  %4738 = vmatprep.subr.mxu0 %v1061_v55  ;;  %4815 = vmatpush3.msra.mxu1 %v1079_v59  ;;  %v1092_v51 = vld [vmem:[%s7704_s1 + $0xbe0] sm:$0xff]  ;;  %v1042_v55 = vld [vmem:[%s7704_s1 + $0xa50] sm:$0xff]  ;;  %v455_v59 = vld [vmem:[%s5427_s18 + $0x478] sm:$0xff] }
 0x136   : > { %v6563_v5 = vadd.f32 %v4208_v52, %v1517_v61  ;;  %v4131_v7 = vadd.f32 %v4130_v0, %v4129_v56  ;;  %v4211_v8 = vadd.f32 %v4210_v1, %v4209_v57  ;;  %4739 = vmatpush3.msra.mxu0 %v1045_v58  ;;  %4816 = vmatprep.subr.mxu1 %v1094_v10  ;;  %v1076_v56 = vld [vmem:[%s7704_s1 + $0xb60] sm:$0xff]  ;;  %v453_v58 = vld [vmem:[%s5427_s18 + $0x468] sm:$0xff] }
 0x137   : > { %v4132_v11 = vpop.f32.mrf.mxu0  ;;  %v4212_v12 = vpop.f32.mrf.mxu1  ;;  %2395 = vmatmul.mubr.f32.gmra.mxu0 %v378_v62  ;;  %2540 = vmatmul.mubr.f32.gmra.mxu1 %v380_v63  ;;  %v479_v63 = vld [vmem:[%s5427_s18 + $0x538] sm:$0xff]  ;;  %v481_v0 = vld [vmem:[%s5427_s18 + $0x548] sm:$0xff] }
 0x138   : > { %v1522_v17 = vadd.f32 %v4131_v7, %v6278_v50  ;;  %2399 = vmatprep.mubr.f32.mxu0 %v404_v3  ;;  %2544 = vmatprep.mubr.f32.mxu1 %v406_v4  ;;  %v1059_v50 = vld [vmem:[%s7704_s1 + $0xad8] sm:$0xff]  ;;  %v1041_v10 = vld [vmem:[%s7704_s1 + $0xa48] sm:$0xff] }
 0x139   : > { %v4133_v21 = vpop.f32.mrf.mxu0  ;;  %v4213_v22 = vpop.f32.mrf.mxu1  ;;  %4740 = vmatprep.subr.mxu0 %v1060_v34  ;;  %4817 = vmatpush3.msra.mxu1 %v1078_v16  ;;  %v1091_v7 = vld [vmem:[%s7704_s1 + $0xbd8] sm:$0xff]  ;;  %v480_v16 = vld [vmem:[%s5427_s18 + $0x540] sm:$0xff] }
 0x13a   : > { %v6582_v26 = vadd.f32 %v4211_v8, %v1522_v17  ;;  %v4134_v27 = vadd.f32 %v4133_v21, %v4132_v11  ;;  %v4214_v28 = vadd.f32 %v4213_v22, %v4212_v12  ;;  %4741 = vmatpush3.msra.mxu0 %v1044_v13  ;;  %4818 = vmatprep.subr.mxu1 %v1093_v30  ;;  %v1075_v11 = vld [vmem:[%s7704_s1 + $0xb58] sm:$0xff]  ;;  %v478_v13 = vld [vmem:[%s5427_s18 + $0x530] sm:$0xff]  ;;  %v1040_v30 = vld [vmem:[%s7704_s1 + $0xa40] sm:$0xff] }
 0x13b   : > { %v4135_v31 = vpop.f32.mrf.mxu0  ;;  %v4215_v32 = vpop.f32.mrf.mxu1  ;;  %2400 = vmatmul.mubr.f32.gmra.mxu0 %v403_v18  ;;  %2545 = vmatmul.mubr.f32.gmra.mxu1 %v405_v20  ;;  %v504_v20 = vld [vmem:[%s5427_s18 + $0x600] sm:$0xff]  ;;  %v506_v21 = vld [vmem:[%s5427_s18 + $0x610] sm:$0xff] }
 0x13c   : > { %v1527_v38 = vadd.f32 %v4134_v27, %v6297_v2  ;;  %2404 = vmatprep.mubr.f32.mxu0 %v429_v23  ;;  %2549 = vmatprep.mubr.f32.mxu1 %v431_v25  ;;  %v1058_v2 = vld [vmem:[%s7704_s1 + $0xad0] sm:$0xff] }
 0x13d   : > { %v4136_v41 = vpop.f32.mrf.mxu0  ;;  %v4216_v43 = vpop.f32.mrf.mxu1  ;;  %4742 = vmatprep.subr.mxu0 %v1059_v50  ;;  %4819 = vmatpush3.msra.mxu1 %v1077_v37  ;;  %v1090_v27 = vld [vmem:[%s7704_s1 + $0xbd0] sm:$0xff]  ;;  %v505_v37 = vld [vmem:[%s5427_s18 + $0x608] sm:$0xff] }
 0x13e   : > { %v6601_v46 = vadd.f32 %v4214_v28, %v1527_v38  ;;  %v4137_v47 = vadd.f32 %v4136_v41, %v4135_v31  ;;  %v4217_v48 = vadd.f32 %v4216_v43, %v4215_v32  ;;  %4743 = vmatpush3.msra.mxu0 %v1043_v35  ;;  %4820 = vmatprep.subr.mxu1 %v1092_v51  ;;  %v1074_v31 = vld [vmem:[%s7704_s1 + $0xb50] sm:$0xff]  ;;  %v503_v35 = vld [vmem:[%s5427_s18 + $0x5f8] sm:$0xff] }
 0x13f   : > { %v4138_v52 = vpop.f32.mrf.mxu0  ;;  %v4218_v14 = vpop.f32.mrf.mxu1  ;;  %2405 = vmatmul.mubr.f32.gmra.mxu0 %v428_v39  ;;  %2550 = vmatmul.mubr.f32.gmra.mxu1 %v430_v40  ;;  %v529_v40 = vld [vmem:[%s5427_s18 + $0x6c8] sm:$0xff]  ;;  %v531_v41 = vld [vmem:[%s5427_s18 + $0x6d8] sm:$0xff] }
 0x140   : > { %v1532_v57 = vadd.f32 %v4137_v47, %v6316_v19  ;;  %2409 = vmatprep.mubr.f32.mxu0 %v454_v44  ;;  %2554 = vmatprep.mubr.f32.mxu1 %v456_v45  ;;  %v1057_v19 = vld [vmem:[%s7704_s1 + $0xac8] sm:$0xff]  ;;  %v1039_v51 = vld [vmem:[%s7704_s1 + $0xa38] sm:$0xff] }
 0x141   : > { %v4139_v61 = vpop.f32.mrf.mxu0  ;;  %v4219_v62 = vpop.f32.mrf.mxu1  ;;  %4744 = vmatprep.subr.mxu0 %v1058_v2  ;;  %4821 = vmatpush3.msra.mxu1 %v1076_v56  ;;  %v1089_v47 = vld [vmem:[%s7704_s1 + $0xbc8] sm:$0xff]  ;;  %v530_v56 = vld [vmem:[%s5427_s18 + $0x6d0] sm:$0xff] }
 0x142   : > { %v6620_v1 = vadd.f32 %v4217_v48, %v1532_v57  ;;  %v4140_v3 = vadd.f32 %v4139_v61, %v4138_v52  ;;  %v4220_v4 = vadd.f32 %v4219_v62, %v4218_v14  ;;  %4745 = vmatpush3.msra.mxu0 %v1042_v55  ;;  %4822 = vmatprep.subr.mxu1 %v1091_v7  ;;  %v1073_v52 = vld [vmem:[%s7704_s1 + $0xb48] sm:$0xff]  ;;  %v528_v55 = vld [vmem:[%s5427_s18 + $0x6c0] sm:$0xff]  ;;  %v1038_v7 = vld [vmem:[%s7704_s1 + $0xa30] sm:$0xff] }
 0x143   : > { %v4141_v8 = vpop.f32.mrf.mxu0  ;;  %v4221_v34 = vpop.f32.mrf.mxu1  ;;  %2410 = vmatmul.mubr.f32.gmra.mxu0 %v453_v58  ;;  %2555 = vmatmul.mubr.f32.gmra.mxu1 %v455_v59  ;;  %v554_v59 = vld [vmem:[%s5427_s18 + $0x790] sm:$0xff]  ;;  %v556_v61 = vld [vmem:[%s5427_s18 + $0x7a0] sm:$0xff] }
 0x144   : > { %v1537_v12 = vadd.f32 %v4140_v3, %v6335_v36  ;;  %2414 = vmatprep.mubr.f32.mxu0 %v479_v63  ;;  %2559 = vmatprep.mubr.f32.mxu1 %v481_v0  ;;  %v1056_v36 = vld [vmem:[%s7704_s1 + $0xac0] sm:$0xff] }
 0x145   : > { %v4142_v17 = vpop.f32.mrf.mxu0  ;;  %v4222_v18 = vpop.f32.mrf.mxu1  ;;  %4746 = vmatprep.subr.mxu0 %v1057_v19  ;;  %4823 = vmatpush3.msra.mxu1 %v1075_v11  ;;  %v1088_v3 = vld [vmem:[%s7704_s1 + $0xbc0] sm:$0xff]  ;;  %v555_v11 = vld [vmem:[%s5427_s18 + $0x798] sm:$0xff] }
 0x146   : > { %v6639_v22 = vadd.f32 %v4220_v4, %v1537_v12  ;;  %v4143_v23 = vadd.f32 %v4142_v17, %v4141_v8  ;;  %v4223_v25 = vadd.f32 %v4222_v18, %v4221_v34  ;;  %4747 = vmatpush3.msra.mxu0 %v1041_v10  ;;  %4824 = vmatprep.subr.mxu1 %v1090_v27  ;;  %v1072_v8 = vld [vmem:[%s7704_s1 + $0xb40] sm:$0xff]  ;;  %v553_v10 = vld [vmem:[%s5427_s18 + $0x788] sm:$0xff] }
 0x147   : > { %v4144_v28 = vpop.f32.mrf.mxu0  ;;  %v4224_v50 = vpop.f32.mrf.mxu1  ;;  %2415 = vmatmul.mubr.f32.gmra.mxu0 %v478_v13  ;;  %2560 = vmatmul.mubr.f32.gmra.mxu1 %v480_v16  ;;  %v579_v16 = vld [vmem:[%s5427_s18 + $0x858] sm:$0xff]  ;;  %v581_v17 = vld [vmem:[%s5427_s18 + $0x868] sm:$0xff] }
 0x148   : > { %v1542_v32 = vadd.f32 %v4143_v23, %v6354_v53  ;;  %2419 = vmatprep.mubr.f32.mxu0 %v504_v20  ;;  %2564 = vmatprep.mubr.f32.mxu1 %v506_v21  ;;  %v1055_v53 = vld [vmem:[%s7704_s1 + $0xab8] sm:$0xff]  ;;  %v1037_v27 = vld [vmem:[%s7704_s1 + $0xa28] sm:$0xff] }
 0x149   : > { %v4145_v38 = vpop.f32.mrf.mxu0  ;;  %v4225_v39 = vpop.f32.mrf.mxu1  ;;  %4748 = vmatprep.subr.mxu0 %v1056_v36  ;;  %4825 = vmatpush3.msra.mxu1 %v1074_v31  ;;  %v1087_v23 = vld [vmem:[%s7704_s1 + $0xbb8] sm:$0xff]  ;;  %v580_v31 = vld [vmem:[%s5427_s18 + $0x860] sm:$0xff] }
 0x14a   : > { %v6658_v43 = vadd.f32 %v4223_v25, %v1542_v32  ;;  %v4146_v44 = vadd.f32 %v4145_v38, %v4144_v28  ;;  %v4226_v45 = vadd.f32 %v4225_v39, %v4224_v50  ;;  %4749 = vmatpush3.msra.mxu0 %v1040_v30  ;;  %4826 = vmatprep.subr.mxu1 %v1089_v47  ;;  %v1071_v28 = vld [vmem:[%s7704_s1 + $0xb38] sm:$0xff]  ;;  %v578_v30 = vld [vmem:[%s5427_s18 + $0x850] sm:$0xff]  ;;  %v1036_v47 = vld [vmem:[%s7704_s1 + $0xa20] sm:$0xff] }
 0x14b   : > { %v4147_v48 = vpop.f32.mrf.mxu0  ;;  %v4227_v2 = vpop.f32.mrf.mxu1  ;;  %2420 = vmatmul.mubr.f32.gmra.mxu0 %v503_v35  ;;  %2565 = vmatmul.mubr.f32.gmra.mxu1 %v505_v37  ;;  %v604_v37 = vld [vmem:[%s5427_s18 + $0x920] sm:$0xff]  ;;  %v606_v38 = vld [vmem:[%s5427_s18 + $0x930] sm:$0xff] }
 0x14c   : > { %v1547_v14 = vadd.f32 %v4146_v44, %v6373_v6  ;;  %2424 = vmatprep.mubr.f32.mxu0 %v529_v40  ;;  %2569 = vmatprep.mubr.f32.mxu1 %v531_v41  ;;  %v1054_v6 = vld [vmem:[%s7704_s1 + $0xab0] sm:$0xff] }
 0x14d   : > { %v4148_v57 = vpop.f32.mrf.mxu0  ;;  %v4228_v58 = vpop.f32.mrf.mxu1  ;;  %4750 = vmatprep.subr.mxu0 %v1055_v53  ;;  %4827 = vmatpush3.msra.mxu1 %v1073_v52  ;;  %v1086_v44 = vld [vmem:[%s7704_s1 + $0xbb0] sm:$0xff]  ;;  %v605_v52 = vld [vmem:[%s5427_s18 + $0x928] sm:$0xff] }
 0x14e   : > { %v6677_v62 = vadd.f32 %v4226_v45, %v1547_v14  ;;  %v4149_v63 = vadd.f32 %v4148_v57, %v4147_v48  ;;  %v4229_v0 = vadd.f32 %v4228_v58, %v4227_v2  ;;  %4751 = vmatpush3.msra.mxu0 %v1039_v51  ;;  %4828 = vmatprep.subr.mxu1 %v1088_v3  ;;  %v1070_v48 = vld [vmem:[%s7704_s1 + $0xb30] sm:$0xff]  ;;  %v603_v51 = vld [vmem:[%s5427_s18 + $0x918] sm:$0xff] }
 0x14f   : > { %v4150_v4 = vpop.f32.mrf.mxu0  ;;  %v4230_v19 = vpop.f32.mrf.mxu1  ;;  %2425 = vmatmul.mubr.f32.gmra.mxu0 %v528_v55  ;;  %2570 = vmatmul.mubr.f32.gmra.mxu1 %v530_v56  ;;  %v629_v56 = vld [vmem:[%s5427_s18 + $0x9e8] sm:$0xff]  ;;  %v631_v57 = vld [vmem:[%s5427_s18 + $0x9f8] sm:$0xff] }
 0x150   : > { %v1552_v34 = vadd.f32 %v4149_v63, %v6392_v24  ;;  %2429 = vmatprep.mubr.f32.mxu0 %v554_v59  ;;  %2574 = vmatprep.mubr.f32.mxu1 %v556_v61  ;;  %v1053_v24 = vld [vmem:[%s7704_s1 + $0xaa8] sm:$0xff]  ;;  %v1035_v3 = vld [vmem:[%s7704_s1 + $0xa18] sm:$0xff] }
 0x151   : > { %v4151_v12 = vpop.f32.mrf.mxu0  ;;  %v4231_v13 = vpop.f32.mrf.mxu1  ;;  %4752 = vmatprep.subr.mxu0 %v1054_v6  ;;  %4829 = vmatpush3.msra.mxu1 %v1072_v8  ;;  %v1085_v63 = vld [vmem:[%s7704_s1 + $0xba8] sm:$0xff]  ;;  %v630_v8 = vld [vmem:[%s5427_s18 + $0x9f0] sm:$0xff] }
 0x152   : > { %v6696_v18 = vadd.f32 %v4229_v0, %v1552_v34  ;;  %v4152_v20 = vadd.f32 %v4151_v12, %v4150_v4  ;;  %v4232_v21 = vadd.f32 %v4231_v13, %v4230_v19  ;;  %4753 = vmatpush3.msra.mxu0 %v1038_v7  ;;  %4830 = vmatprep.subr.mxu1 %v1087_v23  ;;  %v1069_v4 = vld [vmem:[%s7704_s1 + $0xb28] sm:$0xff]  ;;  %v628_v7 = vld [vmem:[%s5427_s18 + $0x9e0] sm:$0xff]  ;;  %v1034_v23 = vld [vmem:[%s7704_s1 + $0xa10] sm:$0xff] }
 0x153   : > { %v4153_v25 = vpop.f32.mrf.mxu0  ;;  %v4233_v36 = vpop.f32.mrf.mxu1  ;;  %2430 = vmatmul.mubr.f32.gmra.mxu0 %v553_v10  ;;  %2575 = vmatmul.mubr.f32.gmra.mxu1 %v555_v11  ;;  %v654_v11 = vld [vmem:[%s5427_s18 + $0xab0] sm:$0xff]  ;;  %v656_v12 = vld [vmem:[%s5427_s18 + $0xac0] sm:$0xff] }
 0x154   : > { %v1557_v50 = vadd.f32 %v4152_v20, %v6411_v42  ;;  %2434 = vmatprep.mubr.f32.mxu0 %v579_v16  ;;  %2579 = vmatprep.mubr.f32.mxu1 %v581_v17  ;;  %v1052_v42 = vld [vmem:[%s7704_s1 + $0xaa0] sm:$0xff] }
 0x155   : > { %v4154_v32 = vpop.f32.mrf.mxu0  ;;  %v4234_v35 = vpop.f32.mrf.mxu1  ;;  %4754 = vmatprep.subr.mxu0 %v1053_v24  ;;  %4831 = vmatpush3.msra.mxu1 %v1071_v28  ;;  %v1084_v20 = vld [vmem:[%s7704_s1 + $0xba0] sm:$0xff]  ;;  %v655_v28 = vld [vmem:[%s5427_s18 + $0xab8] sm:$0xff] }
 0x156   : > { %v6715_v39 = vadd.f32 %v4232_v21, %v1557_v50  ;;  %v4155_v40 = vadd.f32 %v4154_v32, %v4153_v25  ;;  %v4235_v41 = vadd.f32 %v4234_v35, %v4233_v36  ;;  %4755 = vmatpush3.msra.mxu0 %v1037_v27  ;;  %4832 = vmatprep.subr.mxu1 %v1086_v44  ;;  %v1068_v25 = vld [vmem:[%s7704_s1 + $0xb20] sm:$0xff]  ;;  %v653_v27 = vld [vmem:[%s5427_s18 + $0xaa8] sm:$0xff] }
 0x157   : > { %v4156_v45 = vpop.f32.mrf.mxu0  ;;  %v4236_v53 = vpop.f32.mrf.mxu1  ;;  %2435 = vmatmul.mubr.f32.gmra.mxu0 %v578_v30  ;;  %2580 = vmatmul.mubr.f32.gmra.mxu1 %v580_v31  ;;  %v679_v31 = vld [vmem:[%s5427_s18 + $0xb78] sm:$0xff]  ;;  %v681_v32 = vld [vmem:[%s5427_s18 + $0xb88] sm:$0xff] }
 0x158   : > { %v1562_v2 = vadd.f32 %v4155_v40, %v6430_v60  ;;  %2439 = vmatprep.mubr.f32.mxu0 %v604_v37  ;;  %2584 = vmatprep.mubr.f32.mxu1 %v606_v38  ;;  %v1051_v60 = vld [vmem:[%s7704_s1 + $0xa98] sm:$0xff]  ;;  %v1033_v44 = vld [vmem:[%s7704_s1 + $0xa08] sm:$0xff] }
 0x159   : > { %v4157_v14 = vpop.f32.mrf.mxu0  ;;  %v4237_v55 = vpop.f32.mrf.mxu1  ;;  %4756 = vmatprep.subr.mxu0 %v1052_v42  ;;  %4833 = vmatpush3.msra.mxu1 %v1070_v48  ;;  %v1083_v40 = vld [vmem:[%s7704_s1 + $0xb98] sm:$0xff]  ;;  %v680_v48 = vld [vmem:[%s5427_s18 + $0xb80] sm:$0xff] }
 0x15a   : > { %v6734_v58 = vadd.f32 %v4235_v41, %v1562_v2  ;;  %v4158_v59 = vadd.f32 %v4157_v14, %v4156_v45  ;;  %v4238_v61 = vadd.f32 %v4237_v55, %v4236_v53  ;;  %4757 = vmatpush3.msra.mxu0 %v1036_v47  ;;  %4834 = vmatprep.subr.mxu1 %v1085_v63  ;;  %v1067_v45 = vld [vmem:[%s7704_s1 + $0xb18] sm:$0xff]  ;;  %v678_v47 = vld [vmem:[%s5427_s18 + $0xb70] sm:$0xff]  ;;  %v704_v14 = vld [vmem:[%s5427_s18 + $0xc40] sm:$0xff] }
 0x15b   : > { %v4159_v0 = vpop.f32.mrf.mxu0  ;;  %v4239_v6 = vpop.f32.mrf.mxu1  ;;  %2440 = vmatmul.mubr.f32.gmra.mxu0 %v603_v51  ;;  %2585 = vmatmul.mubr.f32.gmra.mxu1 %v605_v52  ;;  %v1082_v52 = vld [vmem:[%s7704_s1 + $0xb90] sm:$0xff]  ;;  %v1048_v63 = vld [vmem:[%s7704_s1 + $0xa80] sm:$0xff] }
 0x15c   : > { %v1567_v19 = vadd.f32 %v4158_v59, %v6449_v15  ;;  %2444 = vmatprep.mubr.f32.mxu0 %v629_v56  ;;  %2589 = vmatprep.mubr.f32.mxu1 %v631_v57  ;;  %v1050_v15 = vld [vmem:[%s7704_s1 + $0xa90] sm:$0xff] }
 0x15d   : > { %v4160_v34 = vpop.f32.mrf.mxu0  ;;  %v4240_v10 = vpop.f32.mrf.mxu1  ;;  %4758 = vmatprep.subr.mxu0 %v1051_v60  ;;  %4835 = vmatpush3.msra.mxu1 %v1069_v4  ;;  %v706_v57 = vld [vmem:[%s5427_s18 + $0xc50] sm:$0xff]  ;;  %v705_v4 = vld [vmem:[%s5427_s18 + $0xc48] sm:$0xff] }
 0x15e   : > { %v6753_v13 = vadd.f32 %v4238_v61, %v1567_v19  ;;  %v4161_v16 = vadd.f32 %v4160_v34, %v4159_v0  ;;  %v4241_v17 = vadd.f32 %v4240_v10, %v4239_v6  ;;  %4759 = vmatpush3.msra.mxu0 %v1035_v3  ;;  %4836 = vmatprep.subr.mxu1 %v1084_v20  ;;  %v1066_v59 = vld [vmem:[%s7704_s1 + $0xb10] sm:$0xff]  ;;  %v1081_v0 = vld [vmem:[%s7704_s1 + $0xb88] sm:$0xff]  ;;  %v703_v3 = vld [vmem:[%s5427_s18 + $0xc38] sm:$0xff] }
 0x15f   : > { %v4162_v21 = vpop.f32.mrf.mxu0  ;;  %v4242_v24 = vpop.f32.mrf.mxu1  ;;  %2445 = vmatmul.mubr.f32.gmra.mxu0 %v628_v7  ;;  %2590 = vmatmul.mubr.f32.gmra.mxu1 %v630_v8  ;;  %v1032_v8 = vld [vmem:[%s7704_s1 + $0xa00] sm:$0xff]  ;;  %v1065_v34 = vld [vmem:[%s7704_s1 + $0xb08] sm:$0xff] }
 0x160   : > { %v1572_v36 = vadd.f32 %v4161_v16, %v6468_v33  ;;  %2449 = vmatprep.mubr.f32.mxu0 %v654_v11  ;;  %2594 = vmatprep.mubr.f32.mxu1 %v656_v12  ;;  %v1049_v33 = vld [vmem:[%s7704_s1 + $0xa88] sm:$0xff]  ;;  %v1080_v12 = vld [vmem:[%s7704_s1 + $0xb80] sm:$0xff] }
 0x161   : > { %v4163_v50 = vpop.f32.mrf.mxu0  ;;  %v4243_v30 = vpop.f32.mrf.mxu1  ;;  %4760 = vmatprep.subr.mxu0 %v1050_v15  ;;  %4837 = vmatpush3.msra.mxu1 %v1068_v25  ;;  %v333_v16 = vld [vmem:[%s5427_s18 + $0xa8] sm:$0xff]  ;;  %v1064_v20 = vld [vmem:[%s7704_s1 + $0xb00] sm:$0xff]  ;;  %v334_v25 = vld [vmem:[%s5427_s18 + $0xb0] sm:$0xff] }
 0x162   : > { %v6772_v35 = vadd.f32 %v4241_v17, %v1572_v36  ;;  %v4164_v37 = vadd.f32 %v4163_v50, %v4162_v21  ;;  %v4244_v38 = vadd.f32 %v4243_v30, %v4242_v24  ;;  %4761 = vmatpush3.msra.mxu0 %v1034_v23  ;;  %4838 = vmatprep.subr.mxu1 %v1083_v40  ;;  %v335_v21 = vld [vmem:[%s5427_s18 + $0xb8] sm:$0xff]  ;;  %v332_v23 = vld [vmem:[%s5427_s18 + $0xa0] sm:$0xff]  ;;  %v358_v50 = vld [vmem:[%s5427_s18 + $0x170] sm:$0xff] }
 0x163   : > { %v4165_v41 = vpop.f32.mrf.mxu0  ;;  %v4245_v42 = vpop.f32.mrf.mxu1  ;;  %2450 = vmatmul.mubr.f32.gmra.mxu0 %v653_v27  ;;  %2595 = vmatmul.mubr.f32.gmra.mxu1 %v655_v28  ;;  %v1103_v28 = vld [vmem:[%s7704_s1 + $0xc38] sm:$0xff] }
 0x164   : > { %v1577_v53 = vadd.f32 %v4164_v37, %v6489_v54  ;;  %2454 = vmatprep.mubr.f32.mxu0 %v679_v31  ;;  %2599 = vmatprep.mubr.f32.mxu1 %v681_v32  ;;  %v360_v32 = vld [vmem:[%s5427_s18 + $0x180] sm:$0xff] }
 0x165   : > { %v4166_v2 = vpop.f32.mrf.mxu0  ;;  %v4246_v51 = vpop.f32.mrf.mxu1  ;;  %4762 = vmatprep.subr.mxu0 %v1049_v33  ;;  %4839 = vmatpush3.msra.mxu1 %v1067_v45  ;;  %v1102_v33 = vld [vmem:[%s7704_s1 + $0xc30] sm:$0xff] }
 0x166   : > { %v6793_v55 = vadd.f32 %v4244_v38, %v1577_v53  ;;  %v4167_v56 = vadd.f32 %v4166_v2, %v4165_v41  ;;  %v4247_v54 = vadd.f32 %v4246_v51, %v4245_v42  ;;  %4763 = vmatpush3.msra.mxu0 %v1033_v44  ;;  %4840 = vmatprep.subr.mxu1 %v1082_v52  ;;  %v357_v41 = vld [vmem:[%s5427_s18 + $0x168] sm:$0xff]  ;;  %v359_v42 = vld [vmem:[%s5427_s18 + $0x178] sm:$0xff] }
 0x167   : > { %v4168_v61 = vpop.f32.mrf.mxu0  ;;  %v4248_v60 = vpop.f32.mrf.mxu1  ;;  %2455 = vmatmul.mubr.f32.gmra.mxu0 %v678_v47  ;;  %2600 = vmatmul.mubr.f32.gmra.mxu1 %v680_v48  ;;  %v383_v53 = vld [vmem:[%s5427_s18 + $0x238] sm:$0xff]  ;;  %v385_v47 = vld [vmem:[%s5427_s18 + $0x248] sm:$0xff] }
 0x168   : > { %v1582_v6 = vadd.f32 %v4167_v56, %v6510_v9  ;;  %2459 = vmatprep.mubr.f32.mxu0 %v704_v14  ;;  %2604 = vmatprep.mubr.f32.mxu1 %v706_v57  ;;  %v1101_v14 = vld [vmem:[%s7704_s1 + $0xc28] sm:$0xff]  ;;  %v384_v57 = vld [vmem:[%s5427_s18 + $0x240] sm:$0xff] }
 0x169   : > { %v4169_v19 = vpop.f32.mrf.mxu0  ;;  %v4249_v7 = vpop.f32.mrf.mxu1  ;;  %4841 = vmatpush3.msra.mxu1 %v1066_v59  ;;  %4764 = vmatprep.subr.mxu0 %v1048_v63  ;;  %v410_v63 = vld [vmem:[%s5427_s18 + $0x310] sm:$0xff] }
 0x16a   : > { %v6814_v10 = vadd.f32 %v4247_v54, %v1582_v6  ;;  %v4170_v9 = vadd.f32 %v4169_v19, %v4168_v61  ;;  %v4250_v11 = vadd.f32 %v4249_v7, %v4248_v60  ;;  %4842 = vmatprep.subr.mxu1 %v1081_v0  ;;  %4765 = vmatpush3.msra.mxu0 %v1032_v8  ;;  %v382_v54 = vld [vmem:[%s5427_s18 + $0x230] sm:$0xff]  ;;  %v408_v60 = vld [vmem:[%s5427_s18 + $0x300] sm:$0xff]  ;;  %v407_v8 = vld [vmem:[%s5427_s18 + $0x2f8] sm:$0xff] }
 0x16b   : > { %v4171_v17 = vpop.f32.mrf.mxu0  ;;  %v4251_v15 = vpop.f32.mrf.mxu1  ;;  %2460 = vmatmul.mubr.f32.gmra.mxu0 %v703_v3  ;;  %2605 = vmatmul.mubr.f32.gmra.mxu1 %v705_v4  ;;  %v1100_v19 = vld [vmem:[%s7704_s1 + $0xc20] sm:$0xff] }
 0x16c   : > { %v1587_v24 = vadd.f32 %v4170_v9, %v6527_v29  ;;  %4843 = vmatpush3.msra.mxu1 %v1065_v34  ;;  %2674 = vmatprep.mubr.f32.mxu0 %v333_v16  ;;  %v409_v34 = vld [vmem:[%s5427_s18 + $0x308] sm:$0xff]  ;;  %v435_v16 = vld [vmem:[%s5427_s18 + $0x3d8] sm:$0xff] }
 0x16d   : > { %v4172_v36 = vpop.f32.mrf.mxu0  ;;  %v4252_v27 = vpop.f32.mrf.mxu1  ;;  %4844 = vmatprep.subr.mxu1 %v1080_v12  ;;  %2819 = vmatprep.mubr.f32.mxu1 %v335_v21  ;;  %v433_v12 = vld [vmem:[%s5427_s18 + $0x3c8] sm:$0xff] }
 0x16e   : > { %v6831_v30 = vadd.f32 %v4250_v11, %v1587_v24  ;;  %v4173_v31 = vadd.f32 %v4172_v36, %v4171_v17  ;;  %v4253_v29 = vadd.f32 %v4252_v27, %v4251_v15  ;;  %4845 = vmatpush3.msra.mxu1 %v1064_v20  ;;  %4958 = vmatprep.subr.mxu0 %v1103_v28  ;;  %v1099_v24 = vld [vmem:[%s7704_s1 + $0xc18] sm:$0xff]  ;;  %v434_v36 = vld [vmem:[%s5427_s18 + $0x3d0] sm:$0xff] }
 0x16f   : > { %v4286_v37 = vpop.f32.mrf.mxu0  ;;  %v4366_v38 = vpop.f32.mrf.mxu1  ;;  %2675 = vmatmul.mubr.f32.vlgmr.msra.gmra.mxu0 %v332_v23  ;;  %2820 = vmatmul.mubr.f32.vlgmr.msra.gmra.mxu1 %v334_v25  ;;  %v432_v25 = vld [vmem:[%s5427_s18 + $0x3c0] sm:$0xff] }
 0x170   : > { %v1592_v40 = vadd.f32 %v4173_v31, %v6546_v49  ;;  %2679 = vmatprep.mubr.f32.mxu0 %v358_v50  ;;  %4959 = vmatpush3.msra.mxu0 %v1103_v28  ;;  %v458_v50 = vld [vmem:[%s5427_s18 + $0x490] sm:$0xff]  ;;  %v460_v31 = vld [vmem:[%s5427_s18 + $0x4a0] sm:$0xff] }
 0x171   : > { %v4287_v44 = vpop.f32.mrf.mxu0  ;;  %v4367_v45 = vpop.f32.mrf.mxu1  ;;  %2824 = vmatprep.mubr.f32.mxu1 %v360_v32  ;;  %4960 = vmatprep.subr.mxu0 %v1102_v33 }
 0x172   : > { %v6842_v48 = vadd.f32 %v4253_v29, %v1592_v40  ;;  %v4288_v2 = vadd.f32 %v4287_v44, %v4286_v37  ;;  %v4368_v51 = vadd.f32 %v4367_v45, %v4366_v38  ;;  %5062 = vmatprep.subr.mxu1 %v1103_v28  ;;  %4961 = vmatpush3.msra.mxu0 %v1102_v33 }
 0x173   : > { %v4289_v49 = vpop.f32.mrf.mxu0  ;;  %v4369_v52 = vpop.f32.mrf.mxu1  ;;  %2680 = vmatmul.mubr.f32.gmra.mxu0 %v357_v41  ;;  %2825 = vmatmul.mubr.f32.gmra.mxu1 %v359_v42  ;;  %v457_v41 = vld [vmem:[%s5427_s18 + $0x488] sm:$0xff]  ;;  %v459_v42 = vld [vmem:[%s5427_s18 + $0x498] sm:$0xff] }
 0x174   : > { %v1807_v56 = vadd.f32 %v4288_v2, %v6563_v5  ;;  %2684 = vmatprep.mubr.f32.mxu0 %v383_v53  ;;  %2829 = vmatprep.mubr.f32.mxu1 %v385_v47  ;;  %v483_v53 = vld [vmem:[%s5427_s18 + $0x558] sm:$0xff]  ;;  %v485_v47 = vld [vmem:[%s5427_s18 + $0x568] sm:$0xff] }
 0x175   : > { %v4290_v59 = vpop.f32.mrf.mxu0  ;;  %v4370_v61 = vpop.f32.mrf.mxu1  ;;  %5070 = vmatpush3.msra.mxu1 %v1103_v28  ;;  %4962 = vmatprep.subr.mxu0 %v1101_v14 }
 0x176   : > { %v6852_v0 = vadd.f32 %v4368_v51, %v1807_v56  ;;  %v4291_v6 = vadd.f32 %v4290_v59, %v4289_v49  ;;  %v4371_v3 = vadd.f32 %v4370_v61, %v4369_v52  ;;  %5063 = vmatprep.subr.mxu1 %v1102_v33  ;;  %4963 = vmatpush3.msra.mxu0 %v1101_v14 }
 0x177   : > { %v4292_v5 = vpop.f32.mrf.mxu0  ;;  %v4372_v4 = vpop.f32.mrf.mxu1  ;;  %2685 = vmatmul.mubr.f32.gmra.mxu0 %v382_v54  ;;  %2830 = vmatmul.mubr.f32.gmra.mxu1 %v384_v57  ;;  %v482_v54 = vld [vmem:[%s5427_s18 + $0x550] sm:$0xff]  ;;  %v484_v57 = vld [vmem:[%s5427_s18 + $0x560] sm:$0xff] }
 0x178   : > { %v1812_v7 = vadd.f32 %v4291_v6, %v6582_v26  ;;  %2689 = vmatprep.mubr.f32.mxu0 %v408_v60  ;;  %2834 = vmatprep.mubr.f32.mxu1 %v410_v63  ;;  %v508_v60 = vld [vmem:[%s5427_s18 + $0x620] sm:$0xff]  ;;  %v510_v63 = vld [vmem:[%s5427_s18 + $0x630] sm:$0xff] }
 0x179   : > { %v4293_v9 = vpop.f32.mrf.mxu0  ;;  %v4373_v11 = vpop.f32.mrf.mxu1  ;;  %5071 = vmatpush3.msra.mxu1 %v1102_v33  ;;  %4964 = vmatprep.subr.mxu0 %v1100_v19  ;;  %v1098_v33 = vld [vmem:[%s7704_s1 + $0xc10] sm:$0xff] }
 0x17a   : > { %v6862_v17 = vadd.f32 %v4371_v3, %v1812_v7  ;;  %v4294_v15 = vadd.f32 %v4293_v9, %v4292_v5  ;;  %v4374_v20 = vadd.f32 %v4373_v11, %v4372_v4  ;;  %5064 = vmatprep.subr.mxu1 %v1101_v14  ;;  %4965 = vmatpush3.msra.mxu0 %v1100_v19 }
 0x17b   : > { %v4295_v26 = vpop.f32.mrf.mxu0  ;;  %v4375_v21 = vpop.f32.mrf.mxu1  ;;  %2690 = vmatmul.mubr.f32.gmra.mxu0 %v407_v8  ;;  %2835 = vmatmul.mubr.f32.gmra.mxu1 %v409_v34  ;;  %v507_v8 = vld [vmem:[%s5427_s18 + $0x618] sm:$0xff]  ;;  %v509_v34 = vld [vmem:[%s5427_s18 + $0x628] sm:$0xff] }
 0x17c   : > { %v1817_v23 = vadd.f32 %v4294_v15, %v6601_v46  ;;  %2694 = vmatprep.mubr.f32.mxu0 %v433_v12  ;;  %2839 = vmatprep.mubr.f32.mxu1 %v435_v16  ;;  %v533_v12 = vld [vmem:[%s5427_s18 + $0x6e8] sm:$0xff]  ;;  %v535_v16 = vld [vmem:[%s5427_s18 + $0x6f8] sm:$0xff] }
 0x17d   : > { %v4296_v27 = vpop.f32.mrf.mxu0  ;;  %v4376_v28 = vpop.f32.mrf.mxu1  ;;  %5072 = vmatpush3.msra.mxu1 %v1101_v14  ;;  %4966 = vmatprep.subr.mxu0 %v1099_v24  ;;  %v1097_v14 = vld [vmem:[%s7704_s1 + $0xc08] sm:$0xff] }
 0x17e   : > { %v6872_v29 = vadd.f32 %v4374_v20, %v1817_v23  ;;  %v4297_v32 = vadd.f32 %v4296_v27, %v4295_v26  ;;  %v4377_v37 = vadd.f32 %v4376_v28, %v4375_v21  ;;  %5065 = vmatprep.subr.mxu1 %v1100_v19  ;;  %4967 = vmatpush3.msra.mxu0 %v1099_v24  ;;  %v532_v23 = vld [vmem:[%s5427_s18 + $0x6e0] sm:$0xff]  ;;  %v558_v28 = vld [vmem:[%s5427_s18 + $0x7b0] sm:$0xff] }
 0x17f   : > { %v4298_v46 = vpop.f32.mrf.mxu0  ;;  %v4378_v38 = vpop.f32.mrf.mxu1  ;;  %2695 = vmatmul.mubr.f32.gmra.mxu0 %v432_v25  ;;  %2840 = vmatmul.mubr.f32.gmra.mxu1 %v434_v36  ;;  %v534_v25 = vld [vmem:[%s5427_s18 + $0x6f0] sm:$0xff] }
 0x180   : > { %v1822_v40 = vadd.f32 %v4297_v32, %v6620_v1  ;;  %2699 = vmatprep.mubr.f32.mxu0 %v458_v50  ;;  %2844 = vmatprep.mubr.f32.mxu1 %v460_v31  ;;  %v560_v50 = vld [vmem:[%s5427_s18 + $0x7c0] sm:$0xff] }
 0x181   : > { %v4299_v44 = vpop.f32.mrf.mxu0  ;;  %v4379_v45 = vpop.f32.mrf.mxu1  ;;  %5073 = vmatpush3.msra.mxu1 %v1100_v19  ;;  %4968 = vmatprep.subr.mxu0 %v1098_v33  ;;  %v1096_v19 = vld [vmem:[%s7704_s1 + $0xc00] sm:$0xff] }
 0x182   : > { %v6882_v2 = vadd.f32 %v4377_v37, %v1822_v40  ;;  %v4300_v51 = vadd.f32 %v4299_v44, %v4298_v46  ;;  %v4380_v49 = vadd.f32 %v4379_v45, %v4378_v38  ;;  %5066 = vmatprep.subr.mxu1 %v1099_v24  ;;  %4969 = vmatpush3.msra.mxu0 %v1098_v33  ;;  %v559_v40 = vld [vmem:[%s5427_s18 + $0x7b8] sm:$0xff]  ;;  %v585_v45 = vld [vmem:[%s5427_s18 + $0x888] sm:$0xff] }
 0x183   : > { %v4301_v1 = vpop.f32.mrf.mxu0  ;;  %v4381_v52 = vpop.f32.mrf.mxu1  ;;  %2700 = vmatmul.mubr.f32.gmra.mxu0 %v457_v41  ;;  %2845 = vmatmul.mubr.f32.gmra.mxu1 %v459_v42  ;;  %v583_v44 = vld [vmem:[%s5427_s18 + $0x878] sm:$0xff] }
 0x184   : > { %v1827_v56 = vadd.f32 %v4300_v51, %v6639_v22  ;;  %2704 = vmatprep.mubr.f32.mxu0 %v483_v53  ;;  %2849 = vmatprep.mubr.f32.mxu1 %v485_v47 }
 0x185   : > { %v4302_v59 = vpop.f32.mrf.mxu0  ;;  %v4382_v61 = vpop.f32.mrf.mxu1  ;;  %5074 = vmatpush3.msra.mxu1 %v1099_v24  ;;  %4970 = vmatprep.subr.mxu0 %v1097_v14 }
 0x186   : > { %v6892_v6 = vadd.f32 %v4380_v49, %v1827_v56  ;;  %v4303_v3 = vadd.f32 %v4302_v59, %v4301_v1  ;;  %v4383_v5 = vadd.f32 %v4382_v61, %v4381_v52  ;;  %5067 = vmatprep.subr.mxu1 %v1098_v33  ;;  %4971 = vmatpush3.msra.mxu0 %v1097_v14  ;;  %v582_v52 = vld [vmem:[%s5427_s18 + $0x870] sm:$0xff] }
 0x187   : > { %v4304_v22 = vpop.f32.mrf.mxu0  ;;  %v4384_v4 = vpop.f32.mrf.mxu1  ;;  %2705 = vmatmul.mubr.f32.gmra.mxu0 %v482_v54  ;;  %2850 = vmatmul.mubr.f32.gmra.mxu1 %v484_v57  ;;  %v608_v57 = vld [vmem:[%s5427_s18 + $0x940] sm:$0xff]  ;;  %v610_v59 = vld [vmem:[%s5427_s18 + $0x950] sm:$0xff] }
 0x188   : > { %v1832_v7 = vadd.f32 %v4303_v3, %v6658_v43  ;;  %2709 = vmatprep.mubr.f32.mxu0 %v508_v60  ;;  %2854 = vmatprep.mubr.f32.mxu1 %v510_v63 }
 0x189   : > { %v4305_v9 = vpop.f32.mrf.mxu0  ;;  %v4385_v11 = vpop.f32.mrf.mxu1  ;;  %5075 = vmatpush3.msra.mxu1 %v1098_v33  ;;  %4972 = vmatprep.subr.mxu0 %v1096_v19  ;;  %v557_v33 = vld [vmem:[%s5427_s18 + $0x7a8] sm:$0xff] }
 0x18a   : > { %v6902_v15 = vadd.f32 %v4383_v5, %v1832_v7  ;;  %v4306_v20 = vadd.f32 %v4305_v9, %v4304_v22  ;;  %v4386_v26 = vadd.f32 %v4385_v11, %v4384_v4  ;;  %5068 = vmatprep.subr.mxu1 %v1097_v14  ;;  %4973 = vmatpush3.msra.mxu0 %v1096_v19  ;;  %v607_v22 = vld [vmem:[%s5427_s18 + $0x938] sm:$0xff]  ;;  %v609_v4 = vld [vmem:[%s5427_s18 + $0x948] sm:$0xff] }
 0x18b   : > { %v4307_v43 = vpop.f32.mrf.mxu0  ;;  %v4387_v21 = vpop.f32.mrf.mxu1  ;;  %2710 = vmatmul.mubr.f32.gmra.mxu0 %v507_v8  ;;  %2855 = vmatmul.mubr.f32.gmra.mxu1 %v509_v34  ;;  %v633_v8 = vld [vmem:[%s5427_s18 + $0xa08] sm:$0xff]  ;;  %v635_v34 = vld [vmem:[%s5427_s18 + $0xa18] sm:$0xff] }
 0x18c   : > { %v1837_v24 = vadd.f32 %v4306_v20, %v6677_v62  ;;  %2714 = vmatprep.mubr.f32.mxu0 %v533_v12  ;;  %2859 = vmatprep.mubr.f32.mxu1 %v535_v16 }
 0x18d   : > { %v4308_v36 = vpop.f32.mrf.mxu0  ;;  %v4388_v27 = vpop.f32.mrf.mxu1  ;;  %5076 = vmatpush3.msra.mxu1 %v1097_v14  ;;  %v584_v14 = vld [vmem:[%s5427_s18 + $0x880] sm:$0xff] }
 0x18e   : > { %v6909_v31 = vadd.f32 %v4386_v26, %v1837_v24  ;;  %v4309_v32 = vadd.f32 %v4308_v36, %v4307_v43  ;;  %v4389_v37 = vadd.f32 %v4388_v27, %v4387_v21  ;;  %5069 = vmatprep.subr.mxu1 %v1096_v19  ;;  %v632_v26 = vld [vmem:[%s5427_s18 + $0xa00] sm:$0xff]  ;;  %v634_v43 = vld [vmem:[%s5427_s18 + $0xa10] sm:$0xff] }
 0x18f   : > { %v4310_v62 = vpop.f32.mrf.mxu0  ;;  %v4390_v46 = vpop.f32.mrf.mxu1  ;;  %2715 = vmatmul.mubr.f32.gmra.mxu0 %v532_v23  ;;  %2860 = vmatmul.mubr.f32.gmra.mxu1 %v534_v25  ;;  %v658_v23 = vld [vmem:[%s5427_s18 + $0xad0] sm:$0xff]  ;;  %v660_v25 = vld [vmem:[%s5427_s18 + $0xae0] sm:$0xff] }
 0x190   : > { %v1842_v38 = vadd.f32 %v4309_v32, %v6696_v18  ;;  %2719 = vmatprep.mubr.f32.mxu0 %v558_v28  ;;  %2864 = vmatprep.mubr.f32.mxu1 %v560_v50 }
 0x191   : > { %v4311_v41 = vpop.f32.mrf.mxu0  ;;  %v4391_v42 = vpop.f32.mrf.mxu1  ;;  %5077 = vmatpush3.msra.mxu1 %v1096_v19 }
 0x192   : > { %v6916_v53 = vadd.f32 %v4389_v37, %v1842_v38  ;;  %v4312_v47 = vadd.f32 %v4311_v41, %v4310_v62  ;;  %v4392_v51 = vadd.f32 %v4391_v42, %v4390_v46  ;;  %v657_v37 = vld [vmem:[%s5427_s18 + $0xac8] sm:$0xff]  ;;  %v659_v62 = vld [vmem:[%s5427_s18 + $0xad8] sm:$0xff] }
 0x193   : > { %v4313_v49 = vpop.f32.mrf.mxu0  ;;  %v4393_v1 = vpop.f32.mrf.mxu1  ;;  %2720 = vmatmul.mubr.f32.gmra.mxu0 %v557_v33  ;;  %2865 = vmatmul.mubr.f32.gmra.mxu1 %v559_v40  ;;  %v683_v33 = vld [vmem:[%s5427_s18 + $0xb98] sm:$0xff]  ;;  %v685_v40 = vld [vmem:[%s5427_s18 + $0xba8] sm:$0xff] }
 0x194   : > { %v1847_v18 = vadd.f32 %v4312_v47, %v6715_v39  ;;  %2724 = vmatprep.mubr.f32.mxu0 %v583_v44  ;;  %2869 = vmatprep.mubr.f32.mxu1 %v585_v45 }
 0x195   : > { %v4314_v56 = vpop.f32.mrf.mxu0  ;;  %v4394_v54 = vpop.f32.mrf.mxu1 }
 0x196   : > { %v6923_v61 = vadd.f32 %v4392_v51, %v1847_v18  ;;  %v4315_v60 = vadd.f32 %v4314_v56, %v4313_v49  ;;  %v4395_v63 = vadd.f32 %v4394_v54, %v4393_v1  ;;  %v682_v51 = vld [vmem:[%s5427_s18 + $0xb90] sm:$0xff]  ;;  %v684_v49 = vld [vmem:[%s5427_s18 + $0xba0] sm:$0xff] }
 0x197   : > { %v4316_v3 = vpop.f32.mrf.mxu0  ;;  %v4396_v5 = vpop.f32.mrf.mxu1  ;;  %2725 = vmatmul.mubr.f32.gmra.mxu0 %v582_v52  ;;  %2870 = vmatmul.mubr.f32.gmra.mxu1 %v584_v14  ;;  %v708_v52 = vld [vmem:[%s5427_s18 + $0xc60] sm:$0xff]  ;;  %v710_v14 = vld [vmem:[%s5427_s18 + $0xc70] sm:$0xff] }
 0x198   : > { %v1852_v39 = vadd.f32 %v4315_v60, %v6734_v58  ;;  %2729 = vmatprep.mubr.f32.mxu0 %v608_v57  ;;  %2874 = vmatprep.mubr.f32.mxu1 %v610_v59 }
 0x199   : > { %v4317_v19 = vpop.f32.mrf.mxu0  ;;  %v4397_v7 = vpop.f32.mrf.mxu1 }
 0x19a   : > { %v6930_v9 = vadd.f32 %v4395_v63, %v1852_v39  ;;  %v4318_v11 = vadd.f32 %v4317_v19, %v4316_v3  ;;  %v4398_v12 = vadd.f32 %v4397_v7, %v4396_v5  ;;  %v707_v63 = vld [vmem:[%s5427_s18 + $0xc58] sm:$0xff]  ;;  %v709_v3 = vld [vmem:[%s5427_s18 + $0xc68] sm:$0xff] }
 0x19b   : > { %v4319_v16 = vpop.f32.mrf.mxu0  ;;  %v4399_v20 = vpop.f32.mrf.mxu1  ;;  %2730 = vmatmul.mubr.f32.gmra.mxu0 %v607_v22  ;;  %2875 = vmatmul.mubr.f32.gmra.mxu1 %v609_v4  ;;  %v336_v22 = vld [vmem:[%s5427_s18 + $0xc0] sm:$0xff] }
 0x19c   : > { %v1857_v58 = vadd.f32 %v4318_v11, %v6753_v13  ;;  %2734 = vmatprep.mubr.f32.mxu0 %v633_v8  ;;  %2879 = vmatprep.mubr.f32.mxu1 %v635_v34  ;;  %v536_v4 = vld [vmem:[%s5427_s18 + $0x700] sm:$0xff] }
 0x19d   : > { %v4320_v21 = vpop.f32.mrf.mxu0  ;;  %v4400_v24 = vpop.f32.mrf.mxu1 }
 0x19e   : > { %v6937_v36 = vadd.f32 %v4398_v12, %v1857_v58  ;;  %v4321_v27 = vadd.f32 %v4320_v21, %v4319_v16  ;;  %v4401_v28 = vadd.f32 %v4400_v24, %v4399_v20  ;;  %v361_v12 = vld [vmem:[%s5427_s18 + $0x188] sm:$0xff] }
 0x19f   : > { %v4322_v50 = vpop.f32.mrf.mxu0  ;;  %v4402_v32 = vpop.f32.mrf.mxu1  ;;  %2735 = vmatmul.mubr.f32.gmra.mxu0 %v632_v26  ;;  %2880 = vmatmul.mubr.f32.gmra.mxu1 %v634_v43  ;;  %v561_v16 = vld [vmem:[%s5427_s18 + $0x7c8] sm:$0xff]  ;;  %v386_v26 = vld [vmem:[%s5427_s18 + $0x250] sm:$0xff] }
 0x1a0   : > { %v1862_v13 = vadd.f32 %v4321_v27, %v6772_v35  ;;  %2739 = vmatprep.mubr.f32.mxu0 %v658_v23  ;;  %2884 = vmatprep.mubr.f32.mxu1 %v660_v25  ;;  %v586_v43 = vld [vmem:[%s5427_s18 + $0x890] sm:$0xff] }
 0x1a1   : > { %v4323_v46 = vpop.f32.mrf.mxu0  ;;  %v4403_v38 = vpop.f32.mrf.mxu1 }
 0x1a2   : > { %v6944_v41 = vadd.f32 %v4401_v28, %v1862_v13  ;;  %v4324_v42 = vadd.f32 %v4323_v46, %v4322_v50  ;;  %v4404_v44 = vadd.f32 %v4403_v38, %v4402_v32  ;;  %v411_v28 = vld [vmem:[%s5427_s18 + $0x318] sm:$0xff] }
 0x1a3   : > { %v4325_v45 = vpop.f32.mrf.mxu0  ;;  %v4405_v47 = vpop.f32.mrf.mxu1  ;;  %2740 = vmatmul.mubr.f32.gmra.mxu0 %v657_v37  ;;  %2885 = vmatmul.mubr.f32.gmra.mxu1 %v659_v62  ;;  %v611_v50 = vld [vmem:[%s5427_s18 + $0x958] sm:$0xff]  ;;  %v436_v37 = vld [vmem:[%s5427_s18 + $0x3e0] sm:$0xff] }
 0x1a4   : > { %v1867_v35 = vadd.f32 %v4324_v42, %v6793_v55  ;;  %2744 = vmatprep.mubr.f32.mxu0 %v683_v33  ;;  %2889 = vmatprep.mubr.f32.mxu1 %v685_v40  ;;  %v636_v62 = vld [vmem:[%s5427_s18 + $0xa20] sm:$0xff] }
 0x1a5   : > { %v4326_v1 = vpop.f32.mrf.mxu0  ;;  %v4406_v18 = vpop.f32.mrf.mxu1 }
 0x1a6   : > { %v6951_v56 = vadd.f32 %v4404_v44, %v1867_v35  ;;  %v4327_v54 = vadd.f32 %v4326_v1, %v4325_v45  ;;  %v4407_v57 = vadd.f32 %v4406_v18, %v4405_v47  ;;  %v461_v44 = vld [vmem:[%s5427_s18 + $0x4a8] sm:$0xff] }
 0x1a7   : > { %v4328_v59 = vpop.f32.mrf.mxu0  ;;  %v4408_v60 = vpop.f32.mrf.mxu1  ;;  %2745 = vmatmul.mubr.f32.gmra.mxu0 %v682_v51  ;;  %2890 = vmatmul.mubr.f32.gmra.mxu1 %v684_v49  ;;  %v661_v45 = vld [vmem:[%s5427_s18 + $0xae8] sm:$0xff]  ;;  %v486_v51 = vld [vmem:[%s5427_s18 + $0x570] sm:$0xff] }
 0x1a8   : > { %v1872_v55 = vadd.f32 %v4327_v54, %v6814_v10  ;;  %2749 = vmatprep.mubr.f32.mxu0 %v708_v52  ;;  %2894 = vmatprep.mubr.f32.mxu1 %v710_v14  ;;  %v686_v49 = vld [vmem:[%s5427_s18 + $0xbb0] sm:$0xff] }
 0x1a9   : > { %v4329_v5 = vpop.f32.mrf.mxu0  ;;  %v4409_v39 = vpop.f32.mrf.mxu1 }
 0x1aa   : > { %v6958_v19 = vadd.f32 %v4407_v57, %v1872_v55  ;;  %v4330_v7 = vadd.f32 %v4329_v5, %v4328_v59  ;;  %v4410_v8 = vadd.f32 %v4409_v39, %v4408_v60  ;;  %v511_v57 = vld [vmem:[%s5427_s18 + $0x638] sm:$0xff] }
 0x1ab   : > { %v4331_v34 = vpop.f32.mrf.mxu0  ;;  %v4411_v11 = vpop.f32.mrf.mxu1  ;;  %2750 = vmatmul.mubr.f32.gmra.mxu0 %v707_v63  ;;  %2895 = vmatmul.mubr.f32.gmra.mxu1 %v709_v3  ;;  %v711_v59 = vld [vmem:[%s5427_s18 + $0xc78] sm:$0xff]  ;;  %s7628_s18 = scalar_lea.vmem %s7708_s5, %s7584_s25 }
 0x1ac   : > { %v1877_v10 = vadd.f32 %v4330_v7, %v6831_v30  ;;  %4974 = vmatprep.mubr.msk.f32.mxu0 %vm1111_vm0, %v336_v22  ;;  %4986 = vmatprep.mubr.msk.f32.mxu1 %vm1111_vm0, %v536_v4 }
 0x1ad   : > { %v4332_v20 = vpop.f32.mrf.mxu0  ;;  %v4412_v58 = vpop.f32.mrf.mxu1 }
 0x1ae   : > { %v6967_v21 = vadd.f32 %v4410_v8, %v1877_v10  ;;  %v4333_v24 = vadd.f32 %v4332_v20, %v4331_v34  ;;  %v4413_v23 = vadd.f32 %v4412_v58, %v4411_v11 }
 0x1af   : > { %v4446_v25 = vpop.f32.mrf.mxu0  ;;  %v4526_v30 = vpop.f32.mrf.mxu1  ;;  %4975 = vmatmul.mubr.msk.f32.vlgmr.msra.gmra.mxu0 %vm1111_vm0, %v361_v12  ;;  %4987 = vmatmul.mubr.msk.f32.vlgmr.msra.gmra.mxu1 %vm1111_vm0, %v561_v16 }
 0x1b0   : > { %v1882_v27 = vadd.f32 %v4333_v24, %v6842_v48  ;;  %4977 = vmatprep.mubr.msk.f32.mxu0 %vm1111_vm0, %v386_v26  ;;  %4989 = vmatprep.mubr.msk.f32.mxu1 %vm1111_vm0, %v586_v43 }
 0x1b1   : > { %v4447_v32 = vpop.f32.mrf.mxu0  ;;  %v4527_v13 = vpop.f32.mrf.mxu1 }
 0x1b2   : > { %v6978_v46 = vadd.f32 %v4413_v23, %v1882_v27  ;;  %v4448_v38 = vadd.f32 %v4447_v32, %v4446_v25  ;;  %v4528_v33 = vadd.f32 %v4527_v13, %v4526_v30 }
 0x1b3   : > { %v4449_v40 = vpop.f32.mrf.mxu0  ;;  %v4529_v48 = vpop.f32.mrf.mxu1  ;;  %4978 = vmatmul.mubr.msk.f32.gmra.mxu0 %vm1111_vm0, %v411_v28  ;;  %4990 = vmatmul.mubr.msk.f32.gmra.mxu1 %vm1111_vm0, %v611_v50 }
 0x1b4   : > { %v2097_v42 = vadd.f32 %v4448_v38, %v6852_v0  ;;  %4980 = vmatprep.mubr.msk.f32.mxu0 %vm1111_vm0, %v436_v37  ;;  %4992 = vmatprep.mubr.msk.f32.mxu1 %vm1111_vm0, %v636_v62 }
 0x1b5   : > { %v4450_v47 = vpop.f32.mrf.mxu0  ;;  %v4530_v35 = vpop.f32.mrf.mxu1 }
 0x1b6   : > { %v6989_v1 = vadd.f32 %v4528_v33, %v2097_v42  ;;  %v4451_v18 = vadd.f32 %v4450_v47, %v4449_v40  ;;  %v4531_v52 = vadd.f32 %v4530_v35, %v4529_v48 }
 0x1b7   : > { %v4452_v14 = vpop.f32.mrf.mxu0  ;;  %v4532_v54 = vpop.f32.mrf.mxu1  ;;  %4981 = vmatmul.mubr.msk.f32.gmra.mxu0 %vm1111_vm0, %v461_v44  ;;  %4993 = vmatmul.mubr.msk.f32.gmra.mxu1 %vm1111_vm0, %v661_v45 }
 0x1b8   : > { %v2102_v0 = vadd.f32 %v4451_v18, %v6862_v17  ;;  %4983 = vmatprep.mubr.msk.f32.mxu0 %vm1111_vm0, %v486_v51  ;;  %4995 = vmatprep.mubr.msk.f32.mxu1 %vm1111_vm0, %v686_v49 }
 0x1b9   : > { %v4453_v60 = vpop.f32.mrf.mxu0  ;;  %v4533_v55 = vpop.f32.mrf.mxu1 }
 0x1ba   : > { %v6998_v63 = vadd.f32 %v4531_v52, %v2102_v0  ;;  %v4454_v3 = vadd.f32 %v4453_v60, %v4452_v14  ;;  %v4534_v5 = vadd.f32 %v4533_v55, %v4532_v54 }
 0x1bb   : > { %v4455_v39 = vpop.f32.mrf.mxu0  ;;  %v4535_v22 = vpop.f32.mrf.mxu1  ;;  %4984 = vmatmul.mubr.msk.f32.gmra.mxu0 %vm1111_vm0, %v511_v57  ;;  %4996 = vmatmul.mubr.msk.f32.gmra.mxu1 %vm1111_vm0, %v711_v59 }
 0x1bc   : > { %v2107_v17 = vadd.f32 %v4454_v3, %v6872_v29 }
 0x1bd   : > { %v4456_v4 = vpop.f32.mrf.mxu0  ;;  %v4536_v7 = vpop.f32.mrf.mxu1 }
 0x1be   : > { %v7003_v8 = vadd.f32 %v4534_v5, %v2107_v17  ;;  %v4457_v34 = vadd.f32 %v4456_v4, %v4455_v39  ;;  %v4537_v11 = vadd.f32 %v4536_v7, %v4535_v22 }
 0x1bf   : > { %v4458_v10 = vpop.f32.mrf.mxu0  ;;  %v4538_v12 = vpop.f32.mrf.mxu1 }
 0x1c0   : > { %v2112_v16 = vadd.f32 %v4457_v34, %v6882_v2 }
 0x1c1   : > { %v4459_v20 = vpop.f32.mrf.mxu0  ;;  %v4539_v58 = vpop.f32.mrf.mxu1 }
 0x1c2   : > { %v7006_v26 = vadd.f32 %v4537_v11, %v2112_v16  ;;  %v4460_v43 = vadd.f32 %v4459_v20, %v4458_v10  ;;  %v4540_v24 = vadd.f32 %v4539_v58, %v4538_v12 }
 0x1c3   : > { %v4461_v23 = vpop.f32.mrf.mxu0  ;;  %v4541_v25 = vpop.f32.mrf.mxu1 }
 0x1c4   : > { %v2117_v29 = vadd.f32 %v4460_v43, %v6892_v6 }
 0x1c5   : > { %v4462_v30 = vpop.f32.mrf.mxu0  ;;  %v4542_v27 = vpop.f32.mrf.mxu1 }
 0x1c6   : > { %v7009_v28 = vadd.f32 %v4540_v24, %v2117_v29  ;;  %v4463_v50 = vadd.f32 %v4462_v30, %v4461_v23  ;;  %v4543_v32 = vadd.f32 %v4542_v27, %v4541_v25 }
 0x1c7   : > { %v4464_v13 = vpop.f32.mrf.mxu0  ;;  %v4544_v37 = vpop.f32.mrf.mxu1 }
 0x1c8   : > { %v2122_v2 = vadd.f32 %v4463_v50, %v6902_v15 }
 0x1c9   : > { %v4465_v62 = vpop.f32.mrf.mxu0  ;;  %v4545_v38 = vpop.f32.mrf.mxu1 }
 0x1ca   : > { %v7012_v33 = vadd.f32 %v4543_v32, %v2122_v2  ;;  %v4466_v40 = vadd.f32 %v4465_v62, %v4464_v13  ;;  %v4546_v48 = vadd.f32 %v4545_v38, %v4544_v37 }
 0x1cb   : > { %v4467_v42 = vpop.f32.mrf.mxu0  ;;  %v4547_v44 = vpop.f32.mrf.mxu1 }
 0x1cc   : > { %v2127_v6 = vadd.f32 %v4466_v40, %v6909_v31 }
 0x1cd   : > { %v4468_v45 = vpop.f32.mrf.mxu0  ;;  %v4548_v47 = vpop.f32.mrf.mxu1 }
 0x1ce   : > { %v7015_v35 = vadd.f32 %v4546_v48, %v2127_v6  ;;  %v4469_v51 = vadd.f32 %v4468_v45, %v4467_v42  ;;  %v4549_v49 = vadd.f32 %v4548_v47, %v4547_v44 }
 0x1cf   : > { %v4470_v18 = vpop.f32.mrf.mxu0  ;;  %v4550_v52 = vpop.f32.mrf.mxu1 }
 0x1d0   : > { %v2132_v15 = vadd.f32 %v4469_v51, %v6916_v53 }
 0x1d1   : > { %v4471_v14 = vpop.f32.mrf.mxu0  ;;  %v4551_v54 = vpop.f32.mrf.mxu1 }
 0x1d2   : > { %v7018_v0 = vadd.f32 %v4549_v49, %v2132_v15  ;;  %v4472_v57 = vadd.f32 %v4471_v14, %v4470_v18  ;;  %v4552_v59 = vadd.f32 %v4551_v54, %v4550_v52 }
 0x1d3   : > { %v4473_v60 = vpop.f32.mrf.mxu0  ;;  %v4553_v55 = vpop.f32.mrf.mxu1 }
 0x1d4   : > { %v2137_v31 = vadd.f32 %v4472_v57, %v6923_v61 }
 0x1d5   : > { %v4474_v3 = vpop.f32.mrf.mxu0  ;;  %v4554_v5 = vpop.f32.mrf.mxu1 }
 0x1d6   : > { %v7021_v39 = vadd.f32 %v4552_v59, %v2137_v31  ;;  %v4475_v22 = vadd.f32 %v4474_v3, %v4473_v60  ;;  %v4555_v17 = vadd.f32 %v4554_v5, %v4553_v55 }
 0x1d7   : > { %v4476_v4 = vpop.f32.mrf.mxu0  ;;  %v4556_v7 = vpop.f32.mrf.mxu1 }
 0x1d8   : > { %v2142_v53 = vadd.f32 %v4475_v22, %v6930_v9 }
 0x1d9   : > { %v4477_v34 = vpop.f32.mrf.mxu0  ;;  %v4557_v11 = vpop.f32.mrf.mxu1 }
 0x1da   : > { %v7024_v10 = vadd.f32 %v4555_v17, %v2142_v53  ;;  %v4478_v12 = vadd.f32 %v4477_v34, %v4476_v4  ;;  %v4558_v16 = vadd.f32 %v4557_v11, %v4556_v7 }
 0x1db   : > { %v4479_v20 = vpop.f32.mrf.mxu0  ;;  %v4559_v58 = vpop.f32.mrf.mxu1 }
 0x1dc   : > { %v2147_v61 = vadd.f32 %v4478_v12, %v6937_v36 }
 0x1dd   : > { %v4480_v43 = vpop.f32.mrf.mxu0  ;;  %v4560_v24 = vpop.f32.mrf.mxu1 }
 0x1de   : > { %v7027_v23 = vadd.f32 %v4558_v16, %v2147_v61  ;;  %v4481_v25 = vadd.f32 %v4480_v43, %v4479_v20  ;;  %v4561_v29 = vadd.f32 %v4560_v24, %v4559_v58 }
 0x1df   : > { %v4482_v30 = vpop.f32.mrf.mxu0  ;;  %v4562_v27 = vpop.f32.mrf.mxu1 }
 0x1e0   : > { %v2152_v9 = vadd.f32 %v4481_v25, %v6944_v41 }
 0x1e1   : > { %v4483_v50 = vpop.f32.mrf.mxu0  ;;  %v4563_v32 = vpop.f32.mrf.mxu1 }
 0x1e2   : > { %v7030_v13 = vadd.f32 %v4561_v29, %v2152_v9  ;;  %v4484_v37 = vadd.f32 %v4483_v50, %v4482_v30  ;;  %v4564_v2 = vadd.f32 %v4563_v32, %v4562_v27 }
 0x1e3   : > { %v4485_v62 = vpop.f32.mrf.mxu0  ;;  %v4565_v38 = vpop.f32.mrf.mxu1 }
 0x1e4   : > { %v2157_v36 = vadd.f32 %v4484_v37, %v6951_v56 }
 0x1e5   : > { %v4486_v40 = vpop.f32.mrf.mxu0  ;;  %v4566_v48 = vpop.f32.mrf.mxu1 }
 0x1e6   : > { %v7033_v42 = vadd.f32 %v4564_v2, %v2157_v36  ;;  %v4487_v44 = vadd.f32 %v4486_v40, %v4485_v62  ;;  %v4567_v6 = vadd.f32 %v4566_v48, %v4565_v38 }
 0x1e7   : > { %v4488_v45 = vpop.f32.mrf.mxu0  ;;  %v4568_v47 = vpop.f32.mrf.mxu1 }
 0x1e8   : > { %v2162_v41 = vadd.f32 %v4487_v44, %v6958_v19 }
 0x1e9   : > { %v4489_v51 = vpop.f32.mrf.mxu0  ;;  %v4569_v49 = vpop.f32.mrf.mxu1 }
 0x1ea   : > { %v7036_v18 = vadd.f32 %v4567_v6, %v2162_v41  ;;  %v4490_v52 = vadd.f32 %v4489_v51, %v4488_v45  ;;  %v4570_v15 = vadd.f32 %v4569_v49, %v4568_v47 }
 0x1eb   : > { %v4491_v14 = vpop.f32.mrf.mxu0  ;;  %v4571_v54 = vpop.f32.mrf.mxu1 }
 0x1ec   : > { %v2167_v56 = vadd.f32 %v4490_v52, %v6967_v21 }
 0x1ed   : > { %v4492_v57 = vpop.f32.mrf.mxu0  ;;  %v4572_v59 = vpop.f32.mrf.mxu1 }
 0x1ee   : > { %v7039_v60 = vadd.f32 %v4570_v15, %v2167_v56  ;;  %v4493_v55 = vadd.f32 %v4492_v57, %v4491_v14  ;;  %v4573_v31 = vadd.f32 %v4572_v59, %v4571_v54 }
 0x1ef   : > { %v4606_v3 = vpop.f32.mrf.mxu0  ;;  %v4686_v5 = vpop.f32.mrf.mxu1 }
 0x1f0   : > { %v2172_v19 = vadd.f32 %v4493_v55, %v6978_v46 }
 0x1f1   : > { %v4607_v22 = vpop.f32.mrf.mxu0  ;;  %v4687_v17 = vpop.f32.mrf.mxu1 }
 0x1f2   : > { %v7042_v4 = vadd.f32 %v4573_v31, %v2172_v19  ;;  %v4608_v7 = vadd.f32 %v4607_v22, %v4606_v3  ;;  %v4688_v53 = vadd.f32 %v4687_v17, %v4686_v5 }
 0x1f3   : > { %v4609_v34 = vpop.f32.mrf.mxu0  ;;  %v4689_v11 = vpop.f32.mrf.mxu1 }
 0x1f4   : > { %v2387_v21 = vadd.f32 %v4608_v7, %v6989_v1 }
 0x1f5   : > { %v4610_v12 = vpop.f32.mrf.mxu0  ;;  %v4690_v16 = vpop.f32.mrf.mxu1 }
 0x1f6   : > { %v7045_v20 = vadd.f32 %v4688_v53, %v2387_v21  ;;  %v4611_v58 = vadd.f32 %v4610_v12, %v4609_v34  ;;  %v4691_v61 = vadd.f32 %v4690_v16, %v4689_v11 }
 0x1f7   : > { %v4612_v43 = vpop.f32.mrf.mxu0  ;;  %v4692_v24 = vpop.f32.mrf.mxu1 }
 0x1f8   : > { %v2392_v46 = vadd.f32 %v4611_v58, %v6998_v63 }
 0x1f9   : > { %v4613_v25 = vpop.f32.mrf.mxu0  ;;  %v4693_v29 = vpop.f32.mrf.mxu1 }
 0x1fa   : > { %v7048_v30 = vadd.f32 %v4691_v61, %v2392_v46  ;;  %v4614_v27 = vadd.f32 %v4613_v25, %v4612_v43  ;;  %v4694_v9 = vadd.f32 %v4693_v29, %v4692_v24 }
 0x1fb   : > { %v4615_v50 = vpop.f32.mrf.mxu0  ;;  %v4695_v32 = vpop.f32.mrf.mxu1 }
 0x1fc   : > { %v2397_v1 = vadd.f32 %v4614_v27, %v7003_v8 }
 0x1fd   : > { %v4616_v37 = vpop.f32.mrf.mxu0  ;;  %v4696_v2 = vpop.f32.mrf.mxu1 }
 0x1fe   : > { %v7051_v62 = vadd.f32 %v4694_v9, %v2397_v1  ;;  %v4617_v38 = vadd.f32 %v4616_v37, %v4615_v50  ;;  %v4697_v36 = vadd.f32 %v4696_v2, %v4695_v32 }
 0x1ff   : > { %v4618_v40 = vpop.f32.mrf.mxu0  ;;  %v4698_v48 = vpop.f32.mrf.mxu1 }
 0x200   : > { %v2402_v63 = vadd.f32 %v4617_v38, %v7006_v26 }
 0x201   : > { %v4619_v44 = vpop.f32.mrf.mxu0  ;;  %v4699_v6 = vpop.f32.mrf.mxu1 }
 0x202   : > { %v7054_v45 = vadd.f32 %v4697_v36, %v2402_v63  ;;  %v4620_v47 = vadd.f32 %v4619_v44, %v4618_v40  ;;  %v4700_v41 = vadd.f32 %v4699_v6, %v4698_v48 }
 0x203   : > { %v4621_v51 = vpop.f32.mrf.mxu0  ;;  %v4701_v49 = vpop.f32.mrf.mxu1 }
 0x204   : > { %v2407_v8 = vadd.f32 %v4620_v47, %v7009_v28 }
 0x205   : > { %v4622_v52 = vpop.f32.mrf.mxu0  ;;  %v4702_v15 = vpop.f32.mrf.mxu1 }
 0x206   : > { %v7057_v14 = vadd.f32 %v4700_v41, %v2407_v8  ;;  %v4623_v54 = vadd.f32 %v4622_v52, %v4621_v51  ;;  %v4703_v56 = vadd.f32 %v4702_v15, %v4701_v49 }
 0x207   : > { %v4624_v57 = vpop.f32.mrf.mxu0  ;;  %v4704_v59 = vpop.f32.mrf.mxu1 }
 0x208   : > { %v2412_v26 = vadd.f32 %v4623_v54, %v7012_v33 }
 0x209   : > { %v4625_v55 = vpop.f32.mrf.mxu0  ;;  %v4705_v31 = vpop.f32.mrf.mxu1 }
 0x20a   : > { %v7060_v3 = vadd.f32 %v4703_v56, %v2412_v26  ;;  %v4626_v5 = vadd.f32 %v4625_v55, %v4624_v57  ;;  %v4706_v19 = vadd.f32 %v4705_v31, %v4704_v59 }
 0x20b   : > { %v4627_v22 = vpop.f32.mrf.mxu0  ;;  %v4707_v17 = vpop.f32.mrf.mxu1 }
 0x20c   : > { %v2417_v28 = vadd.f32 %v4626_v5, %v7015_v35 }
 0x20d   : > { %v4628_v7 = vpop.f32.mrf.mxu0  ;;  %v4708_v53 = vpop.f32.mrf.mxu1 }
 0x20e   : > { %v7063_v34 = vadd.f32 %v4706_v19, %v2417_v28  ;;  %v4629_v11 = vadd.f32 %v4628_v7, %v4627_v22  ;;  %v4709_v21 = vadd.f32 %v4708_v53, %v4707_v17 }
 0x20f   : > { %v4630_v12 = vpop.f32.mrf.mxu0  ;;  %v4710_v16 = vpop.f32.mrf.mxu1 }
 0x210   : > { %v2422_v33 = vadd.f32 %v4629_v11, %v7018_v0 }
 0x211   : > { %v4631_v58 = vpop.f32.mrf.mxu0  ;;  %v4711_v61 = vpop.f32.mrf.mxu1 }
 0x212   : > { %v7066_v43 = vadd.f32 %v4709_v21, %v2422_v33  ;;  %v4632_v24 = vadd.f32 %v4631_v58, %v4630_v12  ;;  %v4712_v46 = vadd.f32 %v4711_v61, %v4710_v16 }
 0x213   : > { %v4633_v25 = vpop.f32.mrf.mxu0  ;;  %v4713_v29 = vpop.f32.mrf.mxu1 }
 0x214   : > { %v2427_v35 = vadd.f32 %v4632_v24, %v7021_v39 }
 0x215   : > { %v4634_v27 = vpop.f32.mrf.mxu0  ;;  %v4714_v9 = vpop.f32.mrf.mxu1 }
 0x216   : > { %v7069_v50 = vadd.f32 %v4712_v46, %v2427_v35  ;;  %v4635_v32 = vadd.f32 %v4634_v27, %v4633_v25  ;;  %v4715_v1 = vadd.f32 %v4714_v9, %v4713_v29 }
 0x217   : > { %v4636_v37 = vpop.f32.mrf.mxu0  ;;  %v4716_v2 = vpop.f32.mrf.mxu1 }
 0x218   : > { %v2432_v0 = vadd.f32 %v4635_v32, %v7024_v10 }
 0x219   : > { %v4637_v38 = vpop.f32.mrf.mxu0  ;;  %v4717_v36 = vpop.f32.mrf.mxu1 }
 0x21a   : > { %v7072_v40 = vadd.f32 %v4715_v1, %v2432_v0  ;;  %v4638_v48 = vadd.f32 %v4637_v38, %v4636_v37  ;;  %v4718_v63 = vadd.f32 %v4717_v36, %v4716_v2 }
 0x21b   : > { %v4639_v44 = vpop.f32.mrf.mxu0  ;;  %v4719_v6 = vpop.f32.mrf.mxu1 }
 0x21c   : > { %7711 = vst [vmem:[#allocation2_spill] sm:$0xff] %v7072_v40  ;;  %v2437_v39 = vadd.f32 %v4638_v48, %v7027_v23 }
 0x21d   : > { %v4640_v47 = vpop.f32.mrf.mxu0  ;;  %v4720_v41 = vpop.f32.mrf.mxu1 }
 0x21e   : > { %v7075_v51 = vadd.f32 %v4718_v63, %v2437_v39  ;;  %v4641_v49 = vadd.f32 %v4640_v47, %v4639_v44  ;;  %v4721_v8 = vadd.f32 %v4720_v41, %v4719_v6 }
 0x21f   : > { %v4642_v52 = vpop.f32.mrf.mxu0  ;;  %v4722_v15 = vpop.f32.mrf.mxu1 }
 0x220   : > { %7712 = vst [vmem:[#allocation3_spill] sm:$0xff] %v7075_v51  ;;  %v2442_v10 = vadd.f32 %v4641_v49, %v7030_v13 }
 0x221   : > { %v4643_v54 = vpop.f32.mrf.mxu0  ;;  %v4723_v56 = vpop.f32.mrf.mxu1 }
 0x222   : > { %v7078_v57 = vadd.f32 %v4721_v8, %v2442_v10  ;;  %v4644_v59 = vadd.f32 %v4643_v54, %v4642_v52  ;;  %v4724_v26 = vadd.f32 %v4723_v56, %v4722_v15 }
 0x223   : > { %v4645_v55 = vpop.f32.mrf.mxu0  ;;  %v4725_v31 = vpop.f32.mrf.mxu1 }
 0x224   : > { %7713 = vst [vmem:[#allocation4_spill] sm:$0xff] %v7078_v57  ;;  %v2447_v23 = vadd.f32 %v4644_v59, %v7033_v42 }
 0x225   : > { %v4646_v5 = vpop.f32.mrf.mxu0  ;;  %v4726_v19 = vpop.f32.mrf.mxu1 }
 0x226   : > { %v7081_v22 = vadd.f32 %v4724_v26, %v2447_v23  ;;  %v4647_v17 = vadd.f32 %v4646_v5, %v4645_v55  ;;  %v4727_v28 = vadd.f32 %v4726_v19, %v4725_v31 }
 0x227   : > { %v4648_v7 = vpop.f32.mrf.mxu0  ;;  %v4728_v53 = vpop.f32.mrf.mxu1 }
 0x228   : > { %7714 = vst [vmem:[#allocation5_spill] sm:$0xff] %v7081_v22  ;;  %v2452_v13 = vadd.f32 %v4647_v17, %v7036_v18 }
 0x229   : > { %v4649_v11 = vpop.f32.mrf.mxu0  ;;  %v4729_v21 = vpop.f32.mrf.mxu1 }
 0x22a   : > { %v7084_v12 = vadd.f32 %v4727_v28, %v2452_v13  ;;  %v4650_v16 = vadd.f32 %v4649_v11, %v4648_v7  ;;  %v4730_v33 = vadd.f32 %v4729_v21, %v4728_v53 }
 0x22b   : > { %v4651_v58 = vpop.f32.mrf.mxu0  ;;  %v4731_v61 = vpop.f32.mrf.mxu1 }
 0x22c   : > { %7715 = vst [vmem:[#allocation6_spill] sm:$0xff] %v7084_v12  ;;  %v2457_v42 = vadd.f32 %v4650_v16, %v7039_v60 }
 0x22d   : > { %v4652_v24 = vpop.f32.mrf.mxu0  ;;  %v4732_v46 = vpop.f32.mrf.mxu1 }
 0x22e   : > { %v7087_v25 = vadd.f32 %v4730_v33, %v2457_v42  ;;  %v4653_v29 = vadd.f32 %v4652_v24, %v4651_v58  ;;  %v4733_v35 = vadd.f32 %v4732_v46, %v4731_v61 }
 0x22f   : > { %v4766_v27 = vpop.f32.mrf.mxu0  ;;  %v7089_v9 = vpop.f32.mrf.mxu1 }
 0x230   : > { %7716 = vst [vmem:[#allocation7_spill] sm:$0xff] %v7087_v25  ;;  %v2462_v18 = vadd.f32 %v4653_v29, %v7042_v4 }
 0x231   : > { %v4767_v32 = vpop.f32.mrf.mxu0  ;;  %v7092_v1 = vpop.f32.mrf.mxu1 }
 0x232   : > { %v7094_v37 = vadd.f32 %v4733_v35, %v2462_v18 }
 0x233   : > { %v4769_v2 = vpop.f32.mrf.mxu0  ;;  %v7096_v0 = vpop.f32.mrf.mxu1 }
 0x234   : > { %7717 = vst [vmem:[#allocation8_spill] sm:$0xff] %v7094_v37 }
 0x235   : > { %v4770_v60 = vpop.f32.mrf.mxu0  ;;  %v4850_v38 = vpop.f32.mrf.mxu1 }
 0x237   : > { %v4772_v36 = vpop.f32.mrf.mxu0  ;;  %v7098_v48 = vpop.f32.mrf.mxu1 }
 0x239   : > { %v4773_v63 = vpop.f32.mrf.mxu0  ;;  %v4853_v44 = vpop.f32.mrf.mxu1 }
 0x23b   : > { %v4775_v6 = vpop.f32.mrf.mxu0  ;;  %v7100_v39 = vpop.f32.mrf.mxu1 }
 0x23d   : > { %v4776_v47 = vpop.f32.mrf.mxu0  ;;  %v7102_v4 = vpop.f32.mrf.mxu1 }
 0x23f   : > { %v4778_v41 = vpop.f32.mrf.mxu0  ;;  %v7104_v49 = vpop.f32.mrf.mxu1 }
 0x241   : > { %v4779_v8 = vpop.f32.mrf.mxu0  ;;  %v7106_v52 = vpop.f32.mrf.mxu1 }
 0x243   : > { %v7108_v15 = vpop.f32.mrf.mxu0  ;;  %v7110_v10 = vpop.f32.mrf.mxu1 }
 0x245   : > { %v4782_v54 = vpop.f32.mrf.mxu0  ;;  %v7112_v56 = vpop.f32.mrf.mxu1 }
 0x247   : > { %v4784_v59 = vpop.f32.mrf.mxu0  ;;  %v7114_v26 = vpop.f32.mrf.mxu1 }
 0x249   : > { %v4785_v55 = vpop.f32.mrf.mxu0  ;;  %v7116_v31 = vpop.f32.mrf.mxu1 }
 0x24b   : > { %v4787_v23 = vpop.f32.mrf.mxu0  ;;  %v7118_v5 = vpop.f32.mrf.mxu1 }
 0x24d   : > { %v4788_v19 = vpop.f32.mrf.mxu0  ;;  %v7120_v17 = vpop.f32.mrf.mxu1 }
 0x24f   : > { %v4790_v28 = vpop.f32.mrf.mxu0  ;;  %v7122_v7 = vpop.f32.mrf.mxu1 }
 0x251   : > { %v4791_v53 = vpop.f32.mrf.mxu0  ;;  %v7124_v13 = vpop.f32.mrf.mxu1 }
 0x253   : > { %v7126_v11 = vpop.f32.mrf.mxu0  ;;  %v7128_v21 = vpop.f32.mrf.mxu1 }
 0x255   : > { %v7130_v16 = vpop.f32.mrf.mxu0  ;;  %v7132_v33 = vpop.f32.mrf.mxu1 }
 0x257   : > { %v7134_v58 = vpop.f32.mrf.mxu0  ;;  %v7136_v61 = vpop.f32.mrf.mxu1 }
 0x258   : > { %7718 = vst [vmem:[#allocation9_spill] sm:$0xff] %v7136_v61 }
 0x259   : > { %v7138_v42 = vpop.f32.mrf.mxu0  ;;  %v7140_v24 = vpop.f32.mrf.mxu1 }
 0x25a   : > { %7719 = vst [vmem:[#allocation10_spill] sm:$0xff] %v7140_v24 }
 0x25b   : > { %v7142_v46 = vpop.f32.mrf.mxu0  ;;  %v7144_v29 = vpop.f32.mrf.mxu1 }
 0x25c   : > { %7720 = vst [vmem:[#allocation11_spill] sm:$0xff] %v7144_v29 }
 0x25d   : > { %v7146_v35 = vpop.f32.mrf.mxu0  ;;  %v7148_v18 = vpop.f32.mrf.mxu1 }
 0x25e   : > { %7721 = vst [vmem:[#allocation12_spill] sm:$0xff] %v7146_v35  ;;  %7722 = vst [vmem:[#allocation13_spill] sm:$0xff] %v7148_v18  ;;  %v4768_v18 = vadd.f32 %v4767_v32, %v4766_v27 }
 0x25f   : > { %v7150_v37 = vpop.f32.mrf.mxu0  ;;  %v7152_v25 = vpop.f32.mrf.mxu1 }
 0x260   : > { %7723 = vst [vmem:[#allocation14_spill] sm:$0xff] %v7150_v37  ;;  %7724 = vst [vmem:[#allocation15_spill] sm:$0xff] %v7152_v25  ;;  %v4771_v37 = vadd.f32 %v4770_v60, %v4769_v2  ;;  %v4777_v2 = vadd.f32 %v4776_v47, %v4775_v6 }
 0x261   : > { %v7154_v12 = vpop.f32.mrf.mxu0  ;;  %v7156_v22 = vpop.f32.mrf.mxu1 }
 0x262   : > { %7725 = vst [vmem:[#allocation16_spill] sm:$0xff] %v7154_v12  ;;  %7726 = vst [vmem:[#allocation17_spill] sm:$0xff] %v7156_v22  ;;  %v4774_v12 = vadd.f32 %v4773_v63, %v4772_v36  ;;  %v4854_v36 = vadd.f32 %v4853_v44, %v7098_v48 }
 0x263   : > { %v7158_v57 = vpop.f32.mrf.mxu0  ;;  %v7160_v61 = vpop.f32.mrf.mxu1 }
 0x264   : > { %7727 = vst [vmem:[#allocation18_spill] sm:$0xff] %v7158_v57  ;;  %7728 = vst [vmem:[#allocation19_spill] sm:$0xff] %v7160_v61  ;;  %v2677_v61 = vadd.f32 %v4768_v18, %v7045_v20  ;;  %v2687_v60 = vadd.f32 %v4774_v12, %v7051_v62  ;;  %v4780_v20 = vadd.f32 %v4779_v8, %v4778_v41 }
 0x265   : > { %v7162_v24 = vpop.f32.mrf.mxu0  ;;  %v7164_v51 = vpop.f32.mrf.mxu1  ;;  %v4786_v62 = vadd.f32 %v4785_v55, %v4784_v59  ;;  %v4789_v12 = vadd.f32 %v4788_v19, %v4787_v23  ;;  %v4863_v8 = vadd.f32 %v7112_v56, %v7110_v10  ;;  %v4795_v23 = vadd.f32 %v7130_v16, %v7126_v11  ;;  %v7734_v16 = vld [vmem:[#allocation12_spill] sm:$0xff] }
 0x266   : > { %7729 = vst [vmem:[#allocation20_spill] sm:$0xff] %v7164_v51  ;;  %v4848_v51 = vadd.f32 %v7092_v1, %v7089_v9  ;;  %v2832_v44 = vadd.f32 %v4854_v36, %v2687_v60  ;;  %v2697_v6 = vadd.f32 %v4780_v20, %v7057_v14  ;;  %v7738_v20 = vld [vmem:[#allocation3_spill] sm:$0xff] }
 0x267   : > { %v7166_v29 = vpop.f32.mrf.mxu0  ;;  %v7168_v40 = vpop.f32.mrf.mxu1 }
 0x268   : > { %7730 = vst [vmem:[#allocation21_spill] sm:$0xff] %v7166_v29  ;;  %7731 = vst [vmem:[#allocation22_spill] sm:$0xff] %v7168_v40  ;;  %v2682_v29 = vadd.f32 %v4771_v37, %v7048_v30  ;;  %v4851_v40 = vadd.f32 %v4850_v38, %v7096_v0  ;;  %v2822_v18 = vadd.f32 %v4848_v51, %v2677_v61 }
 0x269   : > { %v7170_v35 = vpop.f32.mrf.mxu0  ;;  %v7172_v25 = vpop.f32.mrf.mxu1  ;;  %v2692_v30 = vadd.f32 %v4777_v2, %v7054_v45  ;;  %v4857_v37 = vadd.f32 %v7102_v4, %v7100_v39  ;;  %v4783_v0 = vadd.f32 %v4782_v54, %v7108_v15  ;;  %v4792_v39 = vadd.f32 %v4791_v53, %v4790_v28 }
 0x26a   : > { %v4869_v54 = vadd.f32 %v7120_v17, %v7118_v5  ;;  %v4798_v5 = vadd.f32 %v7138_v42, %v7134_v58  ;;  %v4801_v58 = vadd.f32 %v7734_v16, %v7142_v46  ;;  %v7735_v42 = vld [vmem:[#allocation14_spill] sm:$0xff] }
 0x26b   : > { %v7174_v22 = vpop.f32.mrf.mxu0  ;;  %v7176_v57 = vpop.f32.mrf.mxu1  ;;  %v2702_v41 = vadd.f32 %v4783_v0, %v7060_v3  ;;  %v2837_v15 = vadd.f32 %v4857_v37, %v2692_v30  ;;  %v7740_v30 = vld [vmem:[#allocation10_spill] sm:$0xff] }
 0x26c   : > { %7732 = vst [vmem:[#allocation23_spill] sm:$0xff] %v7174_v22  ;;  %7733 = vst [vmem:[#allocation24_spill] sm:$0xff] %v7176_v57  ;;  %v2827_v22 = vadd.f32 %v4851_v40, %v2682_v29  ;;  %v4860_v40 = vadd.f32 %v7106_v52, %v7104_v49  ;;  %v2707_v49 = vadd.f32 %v4786_v62, %v7063_v34  ;;  %v7736_v29 = vld [vmem:[#allocation16_spill] sm:$0xff]  ;;  %v7741_v62 = vld [vmem:[#allocation11_spill] sm:$0xff] }
 0x26d   : > { %v7183_v27 = vpop.f32.mrf.mxu0  ;;  %v7185_v32 = vpop.f32.mrf.mxu1  ;;  %v2712_v52 = vadd.f32 %v4789_v12, %v7066_v43  ;;  %v2717_v34 = vadd.f32 %v4792_v39, %v7069_v50  ;;  %v2847_v19 = vadd.f32 %v4863_v8, %v2702_v41  ;;  %v4875_v50 = vadd.f32 %v7132_v33, %v7128_v21  ;;  %v7737_v21 = vld [vmem:[#allocation2_spill] sm:$0xff]  ;;  %v7742_v12 = vld [vmem:[#allocation13_spill] sm:$0xff]  ;;  %v7745_v8 = vld [vmem:[#allocation15_spill] sm:$0xff] }
 0x26e   : > { %v2842_v3 = vadd.f32 %v4860_v40, %v2697_v6  ;;  %v4804_v2 = vadd.f32 %v7736_v29, %v7735_v42  ;;  %v2722_v33 = vadd.f32 %v4795_v23, %v7737_v21  ;;  %v4881_v46 = vadd.f32 %v7742_v12, %v7741_v62  ;;  %v7749_v23 = vld [vmem:[#allocation19_spill] sm:$0xff] }
 0x26f   : > { %v4976_v63 = vpop.f32.mrf.mxu0  ;;  %v7189_v57 = vpop.f32.mrf.mxu1  ;;  %v2857_v28 = vadd.f32 %v4869_v54, %v2712_v52  ;;  %v7748_v54 = vld [vmem:[#allocation21_spill] sm:$0xff] }
 0x270   : > { %v7200_v51 = vadd.f32 %v4976_v63, %v2827_v22  ;;  %v4866_v22 = vadd.f32 %v7116_v31, %v7114_v26  ;;  %v4872_v26 = vadd.f32 %v7124_v13, %v7122_v7 }
 0x271   : > { %v2966_v9 = vpop.f32.mrf.mxu0  ;;  %v3006_v1 = vpop.f32.mrf.mxu1 }
 0x272   : > { %v7195_v38 = vadd.f32 %v2966_v9, %v2822_v18  ;;  %v3049_v56 = vsel %vm3045_vm1, %v7200_v51, -inf  ;;  %v2852_v61 = vadd.f32 %v4866_v22, %v2707_v49  ;;  %v2862_v60 = vadd.f32 %v4872_v26, %v2717_v34  ;;  %v7739_v9 = vld [vmem:[#allocation9_spill] sm:$0xff] }
 0x273   : > { %v4979_v48 = vpop.f32.mrf.mxu0  ;;  %v7204_v47 = vpop.f32.mrf.mxu1  ;;  %v2727_v18 = vadd.f32 %v4798_v5, %v7738_v20  ;;  %v4878_v37 = vadd.f32 %v7740_v30, %v7739_v9  ;;  %v7750_v5 = vld [vmem:[#allocation20_spill] sm:$0xff] }
 0x274   : > { %v3046_v45 = vsel %vm3045_vm1, %v7195_v38, -inf  ;;  %v7217_v55 = vadd.f32 %v4979_v48, %v2837_v15  ;;  %v7252_v48 = vadd.f32 %v3006_v1, %v2862_v60  ;;  %v7746_v15 = vld [vmem:[#allocation17_spill] sm:$0xff]  ;;  %v7747_v1 = vld [vmem:[#allocation18_spill] sm:$0xff] }
 0x275   : > { %v2976_v4 = vpop.f32.mrf.mxu0  ;;  %3047 = vmax.xlane.f32.xlu0 %v3046_v45  ;;  %v3016_v31 = vpop.f32.mrf.mxu1  ;;  %v7743_v45 = vld [vmem:[#allocation4_spill] sm:$0xff]  ;;  %v4884_v49 = vadd.f32 %v7746_v15, %v7745_v8  ;;  %v4807_v52 = vadd.f32 %v7162_v24, %v7747_v1 }
 0x276   : > { %v7209_v14 = vadd.f32 %v2976_v4, %v2832_v44  ;;  %v3055_v13 = vsel %vm3045_vm1, %v7217_v55, -inf  ;;  %v2732_v39 = vadd.f32 %v4801_v58, %v7743_v45  ;;  %v7744_v4 = vld [vmem:[#allocation5_spill] sm:$0xff] }
 0x277   : > { %v4982_v59 = vpop.f32.mrf.mxu0  ;;  %v4994_v36 = vpop.f32.mrf.mxu1  ;;  %v2737_v41 = vadd.f32 %v4804_v2, %v7744_v4 }
 0x278   : > { %v3052_v10 = vsel %vm3045_vm1, %v7209_v14, -inf  ;;  %v7234_v7 = vadd.f32 %v4982_v59, %v2847_v19  ;;  %v4810_v59 = vadd.f32 %v7170_v35, %v7748_v54  ;;  %v4887_v19 = vadd.f32 %v7750_v5, %v7749_v23  ;;  %v7751_v35 = vld [vmem:[#allocation6_spill] sm:$0xff] }
 0x279   : > { %v2986_v43 = vpop.f32.mrf.mxu0  ;;  %3053 = vmax.xlane.f32.xlu1 %v3052_v10  ;;  %3050 = vmax.xlane.f32.xlu0 %v3049_v56  ;;  %v3026_v22 = vpop.f32.mrf.mxu1  ;;  %v2872_v10 = vadd.f32 %v4878_v37, %v2727_v18  ;;  %v2877_v24 = vadd.f32 %v4881_v46, %v2732_v39 }
 0x27a   : > { %v7230_v17 = vadd.f32 %v2986_v43, %v2842_v3  ;;  %v3061_v6 = vsel %vm3045_vm1, %v7234_v7, -inf  ;;  %v2867_v3 = vadd.f32 %v4875_v50, %v2722_v33  ;;  %v3070_v43 = vsel %vm3045_vm1, %v7252_v48, -inf }
 0x27b   : > { %v4985_v53 = vpop.f32.mrf.mxu0  ;;  %v7271_v34 = vadd.f32 %v3016_v31, %v2872_v10  ;;  %v7753_v31 = vld [vmem:[#allocation22_spill] sm:$0xff]  ;;  %v7286_v58 = vadd.f32 %v7204_v47, %v2877_v24 }
 0x27c   : > { %v3058_v11 = vsel %vm3045_vm1, %v7230_v17, -inf  ;;  %v7254_v44 = vadd.f32 %v4985_v53, %v2857_v28  ;;  %v7269_v56 = vadd.f32 %v7189_v57, %v2867_v3  ;;  %v2882_v28 = vadd.f32 %v4884_v49, %v2737_v41  ;;  %v4997_v53 = vpop.f32.mrf.mxu1  ;;  %v7752_v57 = vld [vmem:[#allocation7_spill] sm:$0xff] }
 0x27d   : > { %v2996_v63 = vpop.f32.mrf.mxu0  ;;  %3056 = vmax.xlane.f32.xlu1 %v3055_v13  ;;  %3059 = vmax.xlane.f32.xlu0 %v3058_v11  ;;  %v2747_v50 = vadd.f32 %v4810_v59, %v7752_v57  ;;  %v4890_v13 = vadd.f32 %v7172_v25, %v7753_v31  ;;  %v7754_v11 = vld [vmem:[#allocation23_spill] sm:$0xff]  ;;  %v3076_v2 = vsel %vm3045_vm1, %v7271_v34, -inf  ;;  %v7756_v25 = vld [vmem:[#allocation24_spill] sm:$0xff]  ;;  %v3079_v9 = vsel %vm3045_vm1, %v7286_v58, -inf }
 0x27e   : > { %v7248_v0 = vadd.f32 %v2996_v63, %v2852_v61  ;;  %v3067_v26 = vsel %vm3045_vm1, %v7254_v44, -inf  ;;  %v2742_v61 = vadd.f32 %v4807_v52, %v7751_v35  ;;  %v4813_v16 = vadd.f32 %v7183_v27, %v7754_v11  ;;  %v3036_v60 = vpop.f32.mrf.mxu1  ;;  %v7755_v63 = vld [vmem:[#allocation8_spill] sm:$0xff] }
 0x27f   : > { %v7288_v42 = vadd.f32 %v3026_v22, %v2882_v28  ;;  %v3073_v29 = vsel %vm3045_vm1, %v7269_v56, -inf  ;;  %v4893_v33 = vadd.f32 %v7185_v32, %v7756_v25  ;;  %v2892_v20 = vadd.f32 %v4890_v13, %v2747_v50 }
 0x280   : > { %v3064_v40 = vsel %vm3045_vm1, %v7248_v0, -inf  ;;  %v2752_v21 = vadd.f32 %v4813_v16, %v7755_v63  ;;  %v2887_v27 = vadd.f32 %v4887_v19, %v2742_v61 }
 0x281   : > { %3062 = vmax.xlane.f32.xlu1 %v3061_v6  ;;  %3065 = vmax.xlane.f32.xlu0 %v3064_v40  ;;  %v7299_v18 = vadd.f32 %v3036_v60, %v2892_v20  ;;  %v3082_v30 = vsel %vm3045_vm1, %v7288_v42, -inf }
 0x282   : > { %v7297_v47 = vadd.f32 %v4994_v36, %v2887_v27  ;;  %v2897_v37 = vadd.f32 %v4893_v33, %v2752_v21 }
 0x283   : > { %v3088_v36 = vsel %vm3045_vm1, %v7299_v18, -inf }
 0x284   : > { %v7305_v62 = vadd.f32 %v4997_v53, %v2897_v37  ;;  %v3085_v32 = vsel %vm3045_vm1, %v7297_v47, -inf }
 0x285   : > { %3068 = vmax.xlane.f32.xlu1 %v3067_v26  ;;  %3071 = vmax.xlane.f32.xlu0 %v3070_v43 }
 0x286   : > { %v3091_v12 = vsel %vm3045_vm1, %v7305_v62, -inf }
 0x289   : > { %3074 = vmax.xlane.f32.xlu1 %v3073_v29  ;;  %3077 = vmax.xlane.f32.xlu0 %v3076_v2 }
 0x28d   : > { %3080 = vmax.xlane.f32.xlu1 %v3079_v9  ;;  %3083 = vmax.xlane.f32.xlu0 %v3082_v30 }
 0x291   : > { %3086 = vmax.xlane.f32.xlu1 %v3085_v32  ;;  %3089 = vmax.xlane.f32.xlu0 %v3088_v36 }
 0x295   : > { %3092 = vmax.xlane.f32.xlu1 %v3091_v12 }
 0x2fe   : > { %v3048_v46 = vpop.xlane.xlu0 %3047 }
 0x2ff   : > { %v7314_v6 = vsub.f32 %v7195_v38, %v3048_v46 }
 0x301   : > { %v3110_v40 = vmul.f32 1.442695, %v7314_v6 }
 0x302   : > { %v3054_v45 = vpop.xlane.xlu1 %3053  ;;  %v3051_v39 = vpop.xlane.xlu0 %3050 }
 0x303   : > { %5087 = vpow2.f32 %v3110_v40  ;;  %v7318_v4 = vsub.f32 %v7209_v14, %v3054_v45  ;;  %v7321_v41 = vsub.f32 %v7200_v51, %v3051_v39 }
 0x305   : > { %v3114_v8 = vmul.f32 1.442695, %v7318_v4  ;;  %v3112_v15 = vmul.f32 1.442695, %v7321_v41 }
 0x306   : > { %v3057_v49 = vpop.xlane.xlu1 %3056  ;;  %v3060_v22 = vpop.xlane.xlu0 %3059 }
 0x307   : > { %5089 = vpow2.f32 %v3114_v8  ;;  %v7326_v38 = vsub.f32 %v7217_v55, %v3057_v49  ;;  %v7329_v1 = vsub.f32 %v7230_v17, %v3060_v22 }
 0x308   : > { %5091 = vpow2.f32 %v3112_v15 }
 0x309   : > { %v3116_v14 = vmul.f32 1.442695, %v7326_v38  ;;  %v3118_v52 = vmul.f32 1.442695, %v7329_v1 }
 0x30a   : > { %v3063_v51 = vpop.xlane.xlu1 %3062  ;;  %v3066_v54 = vpop.xlane.xlu0 %3065 }
 0x30b   : > { %5093 = vpow2.f32 %v3116_v14  ;;  %v7334_v59 = vsub.f32 %v7234_v7, %v3063_v51  ;;  %v7337_v3 = vsub.f32 %v7248_v0, %v3066_v54  ;;  %v3273_v51 = vld [vmem:[%s7706_s3 + $0x18] sm:$0xff] }
 0x30c   : > { %5095 = vpow2.f32 %v3118_v52  ;;  %v3487_v54 = vld [vmem:[%s7707_s4 + $0x18] sm:$0xff]  ;;  %4998 = vmatprep.subr.mxu1 %v3273_v51 }
 0x30d   : > { %v3120_v55 = vmul.f32 1.442695, %v7334_v59  ;;  %v3122_v17 = vmul.f32 1.442695, %v7337_v3  ;;  %5030 = vmatprep.subr.mxu0 %v3487_v54  ;;  %4999 = vmatpush3.msra.mxu1 %v3273_v51 }
 0x30e   : > { %v3069_v10 = vpop.xlane.xlu1 %3068  ;;  %v3072_v26 = vpop.xlane.xlu0 %3071  ;;  %5031 = vmatpush3.msra.mxu0 %v3487_v54 }
 0x30f   : > { %5097 = vpow2.f32 %v3120_v55  ;;  %v7342_v43 = vsub.f32 %v7254_v44, %v3069_v10  ;;  %v7345_v23 = vsub.f32 %v7252_v48, %v3072_v26  ;;  %v3272_v26 = vld [vmem:[%s7706_s3 + $0x10] sm:$0xff] }
 0x310   : > { %v7347_v5 = vpop.eup %5087  ;;  %5099 = vpow2.f32 %v3122_v17  ;;  %5000 = vmatprep.subr.mxu1 %v3272_v26 }
 0x311   : > { %v3124_v7 = vmul.f32 1.442695, %v7342_v43  ;;  %v3126_v0 = vmul.f32 1.442695, %v7345_v23  ;;  %v3142_v19 = vsel %vm3045_vm1, %v7347_v5, 0.0  ;;  %5001 = vmatpush3.msra.mxu1 %v3272_v26 }
 0x312   : > { %v3075_v24 = vpop.xlane.xlu1 %3074  ;;  %3143 = vadd.xlane.f32.xlu0 %v3142_v19  ;;  %v3078_v28 = vpop.xlane.xlu0 %3077  ;;  %v3271_v19 = vld [vmem:[%s7706_s3 + $0x8] sm:$0xff] }
 0x313   : > { %5101 = vpow2.f32 %v3124_v7  ;;  %v7354_v44 = vsub.f32 %v7269_v56, %v3075_v24  ;;  %v7357_v48 = vsub.f32 %v7271_v34, %v3078_v28  ;;  %v3486_v7 = vld [vmem:[%s7707_s4 + $0x10] sm:$0xff]  ;;  %v3485_v24 = vld [vmem:[%s7707_s4 + $0x8] sm:$0xff]  ;;  %5002 = vmatprep.subr.mxu1 %v3271_v19 }
 0x314   : > { %v7359_v53 = vpop.eup %5089  ;;  %5103 = vpow2.f32 %v3126_v0  ;;  %5032 = vmatprep.subr.mxu0 %v3486_v7  ;;  %5003 = vmatpush3.msra.mxu1 %v3271_v19 }
 0x315   : > { %v7361_v35 = vpop.eup %5091  ;;  %v3128_v61 = vmul.f32 1.442695, %v7354_v44  ;;  %v3130_v57 = vmul.f32 1.442695, %v7357_v48  ;;  %v3148_v50 = vsel %vm3045_vm1, %v7359_v53, 0.0  ;;  %5033 = vmatpush3.msra.mxu0 %v3486_v7 }
 0x316   : > { %v3081_v31 = vpop.xlane.xlu1 %3080  ;;  %3149 = vadd.xlane.f32.xlu0 %v3148_v50  ;;  %v3145_v56 = vsel %vm3045_vm1, %v7361_v35, 0.0  ;;  %v3084_v13 = vpop.xlane.xlu0 %3083  ;;  %5034 = vmatprep.subr.mxu0 %v3485_v24  ;;  %v3484_v50 = vld [vmem:[%s7707_s4] sm:$0xff] }
 0x317   : > { %5105 = vpow2.f32 %v3128_v61  ;;  %v7370_v34 = vsub.f32 %v7286_v58, %v3081_v31  ;;  %3146 = vadd.xlane.f32.xlu1 %v3145_v56  ;;  %v7373_v11 = vsub.f32 %v7288_v42, %v3084_v13  ;;  %5035 = vmatpush3.msra.mxu0 %v3485_v24 }
 0x318   : > { %v7375_v16 = vpop.eup %5093  ;;  %5107 = vpow2.f32 %v3130_v57  ;;  %v3270_v57 = vld [vmem:[%s7706_s3] sm:$0xff]  ;;  %5036 = vmatprep.subr.mxu0 %v3484_v50 }
 0x319   : > { %v7377_v29 = vpop.eup %5095  ;;  %v3132_v2 = vmul.f32 1.442695, %v7370_v34  ;;  %v3134_v60 = vmul.f32 1.442695, %v7373_v11  ;;  %v3151_v63 = vsel %vm3045_vm1, %v7375_v16, 0.0  ;;  %5004 = vmatprep.subr.mxu1 %v3270_v57  ;;  %5037 = vmatpush3.msra.mxu0 %v3484_v50 }
 0x31a   : > { %v3087_v21 = vpop.xlane.xlu1 %3086  ;;  %v3154_v58 = vsel %vm3045_vm1, %v7377_v29, 0.0  ;;  %v3090_v25 = vpop.xlane.xlu0 %3089  ;;  %5005 = vmatpush3.msra.mxu1 %v3270_v57 }
 0x31b   : > { %5109 = vpow2.f32 %v3132_v2  ;;  %v7386_v42 = vsub.f32 %v7297_v47, %v3087_v21  ;;  %3152 = vadd.xlane.f32.xlu1 %v3151_v63  ;;  %3155 = vadd.xlane.f32.xlu0 %v3154_v58  ;;  %v7389_v33 = vsub.f32 %v7299_v18, %v3090_v25 }
 0x31c   : > { %v7391_v27 = vpop.eup %5097  ;;  %5111 = vpow2.f32 %v3134_v60 }
 0x31d   : > { %v7393_v20 = vpop.eup %5099  ;;  %v3136_v9 = vmul.f32 1.442695, %v7386_v42  ;;  %v3138_v30 = vmul.f32 1.442695, %v7389_v33  ;;  %v3157_v37 = vsel %vm3045_vm1, %v7391_v27, 0.0 }
 0x31e   : > { %v3093_v32 = vpop.xlane.xlu1 %3092  ;;  %v3160_v47 = vsel %vm3045_vm1, %v7393_v20, 0.0 }
 0x31f   : > { %5113 = vpow2.f32 %v3136_v9  ;;  %v7402_v18 = vsub.f32 %v7305_v62, %v3093_v32  ;;  %3158 = vadd.xlane.f32.xlu1 %v3157_v37  ;;  %3161 = vadd.xlane.f32.xlu0 %v3160_v47 }
 0x320   : > { %v7404_v36 = vpop.eup %5101  ;;  %5115 = vpow2.f32 %v3138_v30 }
 0x321   : > { %v7406_v12 = vpop.eup %5103  ;;  %v3140_v46 = vmul.f32 1.442695, %v7402_v18  ;;  %v3163_v40 = vsel %vm3045_vm1, %v7404_v36, 0.0 }
 0x322   : > { %v3166_v45 = vsel %vm3045_vm1, %v7406_v12, 0.0 }
 0x323   : > { %5117 = vpow2.f32 %v3140_v46  ;;  %3164 = vadd.xlane.f32.xlu1 %v3163_v40  ;;  %3167 = vadd.xlane.f32.xlu0 %v3166_v45 }
 0x324   : > { %v7413_v62 = vpop.eup %5105 }
 0x325   : > { %v7415_v39 = vpop.eup %5107  ;;  %v3169_v8 = vsel %vm3045_vm1, %v7413_v62, 0.0 }
 0x326   : > { %v3172_v15 = vsel %vm3045_vm1, %v7415_v39, 0.0 }
 0x327   : > { %3170 = vadd.xlane.f32.xlu1 %v3169_v8  ;;  %3173 = vadd.xlane.f32.xlu0 %v3172_v15 }
 0x328   : > { %v7421_v49 = vpop.eup %5109 }
 0x329   : > { %v7423_v22 = vpop.eup %5111  ;;  %v3175_v14 = vsel %vm3045_vm1, %v7421_v49, 0.0 }
 0x32a   : > { %v3178_v52 = vsel %vm3045_vm1, %v7423_v22, 0.0 }
 0x32b   : > { %3176 = vadd.xlane.f32.xlu1 %v3175_v14  ;;  %3179 = vadd.xlane.f32.xlu0 %v3178_v52 }
 0x32c   : > { %v7435_v55 = vpop.eup %5113 }
 0x32d   : > { %v7437_v17 = vpop.eup %5115  ;;  %v3181_v10 = vsel %vm3045_vm1, %v7435_v55, 0.0 }
 0x32e   : > { %v3184_v0 = vsel %vm3045_vm1, %v7437_v17, 0.0 }
 0x32f   : > { %3182 = vadd.xlane.f32.xlu1 %v3181_v10  ;;  %3185 = vadd.xlane.f32.xlu0 %v3184_v0 }
 0x330   : > { %v7455_v28 = vpop.eup %5117 }
 0x331   : > { %v3187_v61 = vsel %vm3045_vm1, %v7455_v28, 0.0 }
 0x333   : > { %3188 = vadd.xlane.f32.xlu1 %v3187_v61 }
 0x39b   : > { %v3144_v31 = vpop.xlane.xlu0 %3143 }
 0x39c   : > { %5119 = vlog2.f32 %v3144_v31 }
 0x39d   : > { %5121 = vrcp.f32 %v3144_v31 }
 0x39f   : > { %v3150_v56 = vpop.xlane.xlu0 %3149 }
 0x3a0   : > { %v3147_v13 = vpop.xlane.xlu1 %3146 }
 0x3a1   : > { %5123 = vlog2.f32 %v3147_v13 }
 0x3a2   : > { %5125 = vrcp.f32 %v3147_v13 }
 0x3a3   : > { %5127 = vrcp.f32 %v3150_v56 }
 0x3a4   : > { %v3153_v2 = vpop.xlane.xlu1 %3152  ;;  %v3156_v60 = vpop.xlane.xlu0 %3155 }
 0x3a5   : > { %5129 = vrcp.f32 %v3153_v2 }
 0x3a6   : > { %5131 = vlog2.f32 %v3150_v56 }
 0x3a7   : > { %5133 = vrcp.f32 %v3156_v60 }
 0x3a8   : > { %v3159_v63 = vpop.xlane.xlu1 %3158  ;;  %v7465_v21 = vpop.xlane.xlu0 %3161  ;;  %5135 = vlog2.f32 %v3153_v2 }
 0x3a9   : > { %v5120_v58 = vpop.eup %5119  ;;  %5137 = vrcp.f32 %v3159_v63 }
 0x3aa   : > { %v5122_v25 = vpop.eup %5121  ;;  %v3191_v9 = vmul.f32 0.6931472, %v5120_v58  ;;  %5139 = vlog2.f32 %v3156_v60 }
 0x3ab   : > { %v3239_v30 = vmul.f32 %v5122_v25, %v7347_v5  ;;  %5141 = vrcp.f32 %v7465_v21 }
 0x3ac   : > { %v7469_v37 = vpop.xlane.xlu1 %3164  ;;  %v3168_v32 = vpop.xlane.xlu0 %3167  ;;  %v3222_v47 = vsub.f32 %v7314_v6, %v3191_v9  ;;  %5143 = vlog2.f32 %v3159_v63 }
 0x3ad   : > { %5006 = vmatprep.mubr.msk.f32.mxu1 %vm3045_vm1, %v3239_v30  ;;  %5038 = vmatprep.mubr.msk.f32.mxu0 %vm3045_vm1, %v3239_v30  ;;  %5145 = vrcp.f32 %v7469_v37 }
 0x3ae   : > { %v5124_v46 = vpop.eup %5123  ;;  %v3649_v40 = vmul.f32 %v3239_v30, %v3222_v47  ;;  %5147 = vlog2.f32 %v3168_v32 }
 0x3af   : > { %v5126_v45 = vpop.eup %5125  ;;  %v3193_v8 = vmul.f32 0.6931472, %v5124_v46  ;;  %5149 = vrcp.f32 %v3168_v32 }
 0x3b0   : > { %v5128_v5 = vpop.eup %5127  ;;  %v3241_v15 = vmul.f32 %v5126_v45, %v7361_v35  ;;  %v3171_v14 = vpop.xlane.xlu1 %3170  ;;  %v3665_v6 = vsel %vm3045_vm1, %v3649_v40, 0.0 }
 0x3b1   : > { %v3174_v52 = vpop.xlane.xlu0 %3173  ;;  %5151 = vlog2.f32 %v3171_v14  ;;  %3666 = vadd.xlane.f32.xlu0 %v3665_v6  ;;  %v7478_v51 = vmul.f32 %v5128_v5, %v7359_v53  ;;  %v3223_v54 = vsub.f32 %v7321_v41, %v3193_v8 }
 0x3b2   : > { %5153 = vrcp.f32 %v3171_v14  ;;  %5007 = vmatmul.mubr.msk.f32.vlgmr.msra.gmra.mxu1 %vm3045_vm1, %v3241_v15  ;;  %5039 = vmatmul.mubr.msk.f32.vlgmr.msra.gmra.mxu0 %vm3045_vm1, %v3241_v15  ;;  %v5130_v10 = vpop.eup %5129 }
 0x3b3   : > { %5155 = vlog2.f32 %v3174_v52  ;;  %5009 = vmatprep.mubr.msk.f32.mxu1 %vm3045_vm1, %v7478_v51  ;;  %5041 = vmatprep.mubr.msk.f32.mxu0 %vm3045_vm1, %v7478_v51  ;;  %v3650_v35 = vmul.f32 %v3241_v15, %v3223_v54  ;;  %v5132_v26 = vpop.eup %5131  ;;  %v7488_v41 = vmul.f32 %v5130_v10, %v7375_v16 }
 0x3b4   : > { %5157 = vrcp.f32 %v3174_v52  ;;  %v3177_v53 = vpop.xlane.xlu1 %3176  ;;  %v5134_v0 = vpop.eup %5133  ;;  %v3195_v13 = vmul.f32 0.6931472, %v5132_v26 }
 0x3b5   : > { %v3180_v7 = vpop.xlane.xlu0 %3179  ;;  %5159 = vlog2.f32 %v3177_v53  ;;  %v3668_v19 = vsel %vm3045_vm1, %v3650_v35, 0.0  ;;  %v5136_v24 = vpop.eup %5135  ;;  %v7496_v61 = vmul.f32 %v5134_v0, %v7377_v29 }
 0x3b6   : > { %5161 = vrcp.f32 %v3177_v53  ;;  %5010 = vmatmul.mubr.msk.f32.gmra.mxu1 %vm3045_vm1, %v7488_v41  ;;  %5042 = vmatmul.mubr.msk.f32.gmra.mxu0 %vm3045_vm1, %v7488_v41  ;;  %v5138_v57 = vpop.eup %5137  ;;  %v3224_v30 = vsub.f32 %v7318_v4, %v3195_v13 }
 0x3b7   : > { %5163 = vlog2.f32 %v3180_v7  ;;  %3669 = vadd.xlane.f32.xlu1 %v3668_v19  ;;  %v5140_v16 = vpop.eup %5139  ;;  %5012 = vmatprep.mubr.msk.f32.mxu1 %vm3045_vm1, %v7496_v61  ;;  %v7503_v31 = vmul.f32 %v5138_v57, %v7391_v27 }
 0x3b8   : > { %5165 = vrcp.f32 %v3180_v7  ;;  %5044 = vmatprep.mubr.msk.f32.mxu0 %vm3045_vm1, %v7496_v61  ;;  %v3183_v50 = vpop.xlane.xlu1 %3182  ;;  %v5142_v56 = vpop.eup %5141  ;;  %v3651_v14 = vmul.f32 %v7478_v51, %v3224_v30  ;;  %v3199_v52 = vmul.f32 0.6931472, %v5140_v16 }
 0x3b9   : > { %5167 = vlog2.f32 %v3183_v50  ;;  %v3186_v29 = vpop.xlane.xlu0 %3185  ;;  %v5144_v2 = vpop.eup %5143  ;;  %v7510_v60 = vmul.f32 %v5142_v56, %v7393_v20 }
 0x3ba   : > { %5169 = vrcp.f32 %v3183_v50  ;;  %5013 = vmatmul.mubr.msk.f32.gmra.mxu1 %vm3045_vm1, %v7503_v31  ;;  %5045 = vmatmul.mubr.msk.f32.gmra.mxu0 %vm3045_vm1, %v7503_v31  ;;  %v5146_v63 = vpop.eup %5145  ;;  %v3201_v7 = vmul.f32 0.6931472, %v5144_v2  ;;  %v3226_v50 = vsub.f32 %v7329_v1, %v3199_v52 }
 0x3bb   : > { %5171 = vlog2.f32 %v7465_v21  ;;  %v5148_v27 = vpop.eup %5147  ;;  %5015 = vmatprep.mubr.msk.f32.mxu1 %vm3045_vm1, %v7510_v60  ;;  %5047 = vmatprep.mubr.msk.f32.mxu0 %vm3045_vm1, %v7510_v60  ;;  %v7518_v25 = vmul.f32 %v5146_v63, %v7404_v36  ;;  %v3197_v21 = vmul.f32 0.6931472, %v5136_v24 }
 0x3bc   : > { %5173 = vrcp.f32 %v3186_v29  ;;  %v3189_v58 = vpop.xlane.xlu1 %3188  ;;  %v5150_v9 = vpop.eup %5149  ;;  %v3207_v20 = vmul.f32 0.6931472, %v5148_v27 }
 0x3bd   : > { %5175 = vlog2.f32 %v7469_v37  ;;  %v3255_v47 = vmul.f32 %v5150_v9, %v7406_v12  ;;  %v3225_v6 = vsub.f32 %v7326_v38, %v3197_v21  ;;  %v3653_v9 = vmul.f32 %v7496_v61, %v3226_v50 }
 0x3be   : > { %v5152_v32 = vpop.eup %5151  ;;  %5177 = vrcp.f32 %v3189_v58  ;;  %5016 = vmatmul.mubr.msk.f32.gmra.mxu1 %vm3045_vm1, %v7518_v25  ;;  %5048 = vmatmul.mubr.msk.f32.gmra.mxu0 %vm3045_vm1, %v7518_v25  ;;  %v3230_v40 = vsub.f32 %v7345_v23, %v3207_v20 }
 0x3bf   : > { %v5154_v46 = vpop.eup %5153  ;;  %v3209_v36 = vmul.f32 0.6931472, %v5152_v32  ;;  %5179 = vlog2.f32 %v3186_v29  ;;  %5018 = vmatprep.mubr.msk.f32.mxu1 %vm3045_vm1, %v3255_v47  ;;  %5050 = vmatprep.mubr.msk.f32.mxu0 %vm3045_vm1, %v3255_v47 }
 0x3c0   : > { %v5156_v37 = vpop.eup %5155  ;;  %v3257_v4 = vmul.f32 %v5154_v46, %v7413_v62  ;;  %v3657_v5 = vmul.f32 %v3255_v47, %v3230_v40  ;;  %5181 = vlog2.f32 %v3189_v58  ;;  %v3677_v46 = vsel %vm3045_vm1, %v3653_v9, 0.0 }
 0x3c1   : > { %v5158_v45 = vpop.eup %5157  ;;  %v3211_v8 = vmul.f32 0.6931472, %v5156_v37  ;;  %v3231_v15 = vsub.f32 %v7354_v44, %v3209_v36 }
 0x3c2   : > { %v5160_v12 = vpop.eup %5159  ;;  %5019 = vmatmul.mubr.msk.f32.gmra.mxu1 %vm3045_vm1, %v3257_v4  ;;  %5051 = vmatmul.mubr.msk.f32.gmra.mxu0 %vm3045_vm1, %v3257_v4  ;;  %v3259_v23 = vmul.f32 %v5158_v45, %v7415_v39  ;;  %v3689_v10 = vsel %vm3045_vm1, %v3657_v5, 0.0 }
 0x3c3   : > { %v5162_v54 = vpop.eup %5161  ;;  %v3213_v62 = vmul.f32 0.6931472, %v5160_v12  ;;  %v3658_v35 = vmul.f32 %v3257_v4, %v3231_v15  ;;  %v3232_v44 = vsub.f32 %v7357_v48, %v3211_v8  ;;  %3690 = vadd.xlane.f32.xlu0 %v3689_v10  ;;  %v3652_v48 = vmul.f32 %v7488_v41, %v3225_v6 }
 0x3c4   : > { %v5164_v26 = vpop.eup %5163  ;;  %5021 = vmatprep.mubr.msk.f32.mxu1 %vm3045_vm1, %v3259_v23  ;;  %v3261_v51 = vmul.f32 %v5162_v54, %v7421_v49  ;;  %5053 = vmatprep.mubr.msk.f32.mxu0 %vm3045_vm1, %v3259_v23  ;;  %v3671_v49 = vsel %vm3045_vm1, %v3651_v14, 0.0 }
 0x3c5   : > { %v5166_v53 = vpop.eup %5165  ;;  %v3692_v39 = vsel %vm3045_vm1, %v3658_v35, 0.0  ;;  %v3233_v19 = vsub.f32 %v7370_v34, %v3213_v62  ;;  %v3215_v57 = vmul.f32 0.6931472, %v5164_v26  ;;  %v3659_v16 = vmul.f32 %v3259_v23, %v3232_v44 }
 0x3c6   : > { %v5168_v38 = vpop.eup %5167  ;;  %5022 = vmatmul.mubr.msk.f32.gmra.mxu1 %vm3045_vm1, %v3261_v51  ;;  %5054 = vmatmul.mubr.msk.f32.gmra.mxu0 %vm3045_vm1, %v3261_v51  ;;  %v3263_v0 = vmul.f32 %v5166_v53, %v7423_v22  ;;  %v3227_v22 = vsub.f32 %v7334_v59, %v3201_v7  ;;  %v3674_v2 = vsel %vm3045_vm1, %v3652_v48, 0.0 }
 0x3c7   : > { %v5170_v24 = vpop.eup %5169  ;;  %3693 = vadd.xlane.f32.xlu1 %v3692_v39  ;;  %3672 = vadd.xlane.f32.xlu0 %v3671_v49  ;;  %v3217_v41 = vmul.f32 0.6931472, %v5168_v38  ;;  %v3660_v63 = vmul.f32 %v3261_v51, %v3233_v19  ;;  %v3234_v59 = vsub.f32 %v7373_v11, %v3215_v57 }
 0x3c8   : > { %v5172_v56 = vpop.eup %5171  ;;  %5024 = vmatprep.mubr.msk.f32.mxu1 %vm3045_vm1, %v3263_v0  ;;  %v3265_v13 = vmul.f32 %v5170_v24, %v7435_v55  ;;  %5056 = vmatprep.mubr.msk.f32.mxu0 %vm3045_vm1, %v3263_v0  ;;  %v3695_v55 = vsel %vm3045_vm1, %v3659_v16, 0.0  ;;  %v3654_v21 = vmul.f32 %v7503_v31, %v3227_v22 }
 0x3c9   : > { %v5174_v29 = vpop.eup %5173  ;;  %v3203_v58 = vmul.f32 0.6931472, %v5172_v56  ;;  %v3235_v61 = vsub.f32 %v7386_v42, %v3217_v41  ;;  %v3661_v36 = vmul.f32 %v3263_v0, %v3234_v59 }
 0x3ca   : > { %v5176_v34 = vpop.eup %5175  ;;  %5025 = vmatmul.mubr.msk.f32.gmra.mxu1 %vm3045_vm1, %v3265_v13  ;;  %5057 = vmatmul.mubr.msk.f32.gmra.mxu0 %vm3045_vm1, %v3265_v13  ;;  %v3267_v1 = vmul.f32 %v5174_v29, %v7437_v17  ;;  %v3698_v17 = vsel %vm3045_vm1, %v3660_v63, 0.0  ;;  %v3680_v37 = vsel %vm3045_vm1, %v3654_v21, 0.0 }
 0x3cb   : > { %v5178_v27 = vpop.eup %5177  ;;  %3675 = vadd.xlane.f32.xlu1 %v3674_v2  ;;  %3696 = vadd.xlane.f32.xlu0 %v3695_v55  ;;  %v3205_v32 = vmul.f32 0.6931472, %v5176_v34  ;;  %v3662_v4 = vmul.f32 %v3265_v13, %v3235_v61  ;;  %v3701_v31 = vsel %vm3045_vm1, %v3661_v36, 0.0 }
 0x3cc   : > { %v5180_v20 = vpop.eup %5179  ;;  %5027 = vmatprep.mubr.msk.f32.mxu1 %vm3045_vm1, %v3267_v1  ;;  %v3269_v30 = vmul.f32 %v5178_v27, %v7455_v28  ;;  %5059 = vmatprep.mubr.msk.f32.mxu0 %vm3045_vm1, %v3267_v1  ;;  %v3228_v28 = vsub.f32 %v7337_v3, %v3203_v58 }
 0x3cd   : > { %v5182_v11 = vpop.eup %5181  ;;  %v3219_v47 = vmul.f32 0.6931472, %v5180_v20  ;;  %v3229_v45 = vsub.f32 %v7342_v43, %v3205_v32  ;;  %v3704_v5 = vsel %vm3045_vm1, %v3662_v4, 0.0 }
 0x3ce   : > { %5028 = vmatmul.mubr.msk.f32.gmra.mxu1 %vm3045_vm1, %v3269_v30  ;;  %5060 = vmatmul.mubr.msk.f32.gmra.mxu0 %vm3045_vm1, %v3269_v30  ;;  %v3221_v40 = vmul.f32 0.6931472, %v5182_v11  ;;  %v3655_v42 = vmul.f32 %v7510_v60, %v3228_v28 }
 0x3cf   : > { %3699 = vadd.xlane.f32.xlu1 %v3698_v17  ;;  %3678 = vadd.xlane.f32.xlu0 %v3677_v46  ;;  %v3236_v8 = vsub.f32 %v7389_v33, %v3219_v47  ;;  %v3656_v3 = vmul.f32 %v7518_v25, %v3229_v45 }
 0x3d0   : > { %v3237_v15 = vsub.f32 %v7402_v18, %v3221_v40  ;;  %v3683_v14 = vsel %vm3045_vm1, %v3655_v42, 0.0 }
 0x3d1   : > { %v3663_v12 = vmul.f32 %v3267_v1, %v3236_v8  ;;  %v3686_v43 = vsel %vm3045_vm1, %v3656_v3, 0.0 }
 0x3d2   : > { %v3664_v52 = vmul.f32 %v3269_v30, %v3237_v15 }
 0x3d3   : > { %3681 = vadd.xlane.f32.xlu1 %v3680_v37  ;;  %3702 = vadd.xlane.f32.xlu0 %v3701_v31  ;;  %v3707_v60 = vsel %vm3045_vm1, %v3663_v12, 0.0 }
 0x3d4   : > { %v3710_v33 = vsel %vm3045_vm1, %v3664_v52, 0.0 }
 0x3d7   : > { %3705 = vadd.xlane.f32.xlu1 %v3704_v5  ;;  %3684 = vadd.xlane.f32.xlu0 %v3683_v14 }
 0x3db   : > { %3687 = vadd.xlane.f32.xlu1 %v3686_v43  ;;  %3708 = vadd.xlane.f32.xlu0 %v3707_v60 }
 0x3df   : > { %3711 = vadd.xlane.f32.xlu1 %v3710_v33 }
 0x43a   : > { %v3667_v18 = vpop.xlane.xlu0 %3666 }
 0x43b   : > { %v3713_v25 = vsub.f32 0.0, %v3667_v18 }
 0x43d   : > { %3730 = vst.msk [vmem:[%s7590_s28] sm:$0xff] %vm3729_vm2, %v3713_v25 }
 0x440   : > { %v3670_v23 = vpop.xlane.xlu1 %3669 }
 0x441   : > { %v3714_v6 = vsub.f32 0.0, %v3670_v23 }
 0x443   : > { %3731 = vst.msk [vmem:[%s7590_s28 + $0x8] sm:$0xff] %vm3729_vm2, %v3714_v6 }
 0x44c   : > { %v3691_v54 = vpop.xlane.xlu0 %3690 }
 0x44d   : > { %v3721_v62 = vsub.f32 0.0, %v3691_v54 }
 0x44f   : > { %3738 = vst.msk [vmem:[%s7590_s28 + $0x40] sm:$0xff] %vm3729_vm2, %v3721_v62 }
 0x450   : > { %v3694_v10 = vpop.xlane.xlu1 %3693  ;;  %v3673_v44 = vpop.xlane.xlu0 %3672 }
 0x451   : > { %v3722_v35 = vsub.f32 0.0, %v3694_v10  ;;  %v3715_v26 = vsub.f32 0.0, %v3673_v44 }
 0x453   : > { %3739 = vst.msk [vmem:[%s7590_s28 + $0x48] sm:$0xff] %vm3729_vm2, %v3722_v35  ;;  %3732 = vst.msk [vmem:[%s7590_s28 + $0x10] sm:$0xff] %vm3729_vm2, %v3715_v26 }
 0x454   : > { %v3676_v51 = vpop.xlane.xlu1 %3675  ;;  %v3697_v7 = vpop.xlane.xlu0 %3696 }
 0x455   : > { %v3716_v53 = vsub.f32 0.0, %v3676_v51  ;;  %v3723_v39 = vsub.f32 0.0, %v3697_v7 }
 0x457   : > { %3733 = vst.msk [vmem:[%s7590_s28 + $0x18] sm:$0xff] %vm3729_vm2, %v3716_v53  ;;  %3740 = vst.msk [vmem:[%s7590_s28 + $0x50] sm:$0xff] %vm3729_vm2, %v3723_v39 }
 0x458   : > { %v3700_v38 = vpop.xlane.xlu1 %3699  ;;  %v3679_v48 = vpop.xlane.xlu0 %3678 }
 0x459   : > { %v3724_v0 = vsub.f32 0.0, %v3700_v38  ;;  %v3717_v19 = vsub.f32 0.0, %v3679_v48 }
 0x45b   : > { %3741 = vst.msk [vmem:[%s7590_s28 + $0x58] sm:$0xff] %vm3729_vm2, %v3724_v0  ;;  %3734 = vst.msk [vmem:[%s7590_s28 + $0x20] sm:$0xff] %vm3729_vm2, %v3717_v19 }
 0x45c   : > { %v3682_v24 = vpop.xlane.xlu1 %3681  ;;  %v3703_v49 = vpop.xlane.xlu0 %3702 }
 0x45d   : > { %v3718_v57 = vsub.f32 0.0, %v3682_v24  ;;  %v3725_v16 = vsub.f32 0.0, %v3703_v49 }
 0x45f   : > { %3735 = vst.msk [vmem:[%s7590_s28 + $0x28] sm:$0xff] %vm3729_vm2, %v3718_v57  ;;  %3742 = vst.msk [vmem:[%s7590_s28 + $0x60] sm:$0xff] %vm3729_vm2, %v3725_v16 }
 0x460   : > { %v3706_v50 = vpop.xlane.xlu1 %3705  ;;  %v3685_v13 = vpop.xlane.xlu0 %3684 }
 0x461   : > { %v3726_v56 = vsub.f32 0.0, %v3706_v50  ;;  %v3719_v29 = vsub.f32 0.0, %v3685_v13 }
 0x463   : > { %3743 = vst.msk [vmem:[%s7590_s28 + $0x68] sm:$0xff] %vm3729_vm2, %v3726_v56  ;;  %3736 = vst.msk [vmem:[%s7590_s28 + $0x30] sm:$0xff] %vm3729_vm2, %v3719_v29 }
 0x464   : > { %v3688_v22 = vpop.xlane.xlu1 %3687  ;;  %v3709_v41 = vpop.xlane.xlu0 %3708 }
 0x465   : > { %v3720_v34 = vsub.f32 0.0, %v3688_v22  ;;  %v3727_v2 = vsub.f32 0.0, %v3709_v41 }
 0x467   : > { %3737 = vst.msk [vmem:[%s7590_s28 + $0x38] sm:$0xff] %vm3729_vm2, %v3720_v34  ;;  %3744 = vst.msk [vmem:[%s7590_s28 + $0x70] sm:$0xff] %vm3729_vm2, %v3727_v2 }
 0x468   : > { %v3712_v1 = vpop.xlane.xlu1 %3711 }
 0x469   : > { %v3728_v63 = vsub.f32 0.0, %v3712_v1 }
 0x46b   : > { %3745 = vst.msk [vmem:[%s7590_s28 + $0x78] sm:$0xff] %vm3729_vm2, %v3728_v63 }
 0x472   : > { %v5008_v27 = vpop.f32.mrf.mxu1  ;;  %v5040_v58 = vpop.f32.mrf.mxu0 }
 0x473   : > { %3469 = vst.msk [vmem:[%s7628_s18 + $0x8] sm:$0xff] %vm3467_vm3, %v5008_v27 }
 0x474   : > { %3634 = vst.msk [vmem:[%s7634_s9 + $0x8] sm:$0xff] %vm3045_vm1, %v5040_v58  ;;  %v3388_v55 = vpop.f32.mrf.mxu1  ;;  %v3554_v9 = vpop.f32.mrf.mxu0 }
 0x475   : > { %3468 = vst.msk [vmem:[%s7628_s18] sm:$0xff] %vm3467_vm3, %v3388_v55 }
 0x476   : > { %3633 = vst.msk [vmem:[%s7634_s9] sm:$0xff] %vm3045_vm1, %v3554_v9  ;;  %v5011_v59 = vpop.f32.mrf.mxu1  ;;  %v5043_v20 = vpop.f32.mrf.mxu0 }
 0x477   : > { %3471 = vst.msk [vmem:[%s7628_s18 + $0x18] sm:$0xff] %vm3467_vm3, %v5011_v59 }
 0x478   : > { %3636 = vst.msk [vmem:[%s7634_s9 + $0x18] sm:$0xff] %vm3045_vm1, %v5043_v20  ;;  %v3398_v30 = vpop.f32.mrf.mxu1  ;;  %v3564_v32 = vpop.f32.mrf.mxu0 }
 0x479   : > { %3470 = vst.msk [vmem:[%s7628_s18 + $0x10] sm:$0xff] %vm3467_vm3, %v3398_v30 }
 0x47a   : > { %3635 = vst.msk [vmem:[%s7634_s9 + $0x10] sm:$0xff] %vm3045_vm1, %v3564_v32  ;;  %v5014_v17 = vpop.f32.mrf.mxu1  ;;  %v5046_v21 = vpop.f32.mrf.mxu0 }
 0x47b   : > { %3473 = vst.msk [vmem:[%s7628_s18 + $0x28] sm:$0xff] %vm3467_vm3, %v5014_v17 }
 0x47c   : > { %3638 = vst.msk [vmem:[%s7634_s9 + $0x28] sm:$0xff] %vm3045_vm1, %v5046_v21  ;;  %v3408_v61 = vpop.f32.mrf.mxu1  ;;  %v3574_v11 = vpop.f32.mrf.mxu0 }
 0x47d   : > { %3472 = vst.msk [vmem:[%s7628_s18 + $0x20] sm:$0xff] %vm3467_vm3, %v3408_v61 }
 0x47e   : > { %3637 = vst.msk [vmem:[%s7634_s9 + $0x20] sm:$0xff] %vm3045_vm1, %v3574_v11  ;;  %v5017_v47 = vpop.f32.mrf.mxu1  ;;  %v5049_v46 = vpop.f32.mrf.mxu0 }
 0x47f   : > { %3475 = vst.msk [vmem:[%s7628_s18 + $0x38] sm:$0xff] %vm3467_vm3, %v5017_v47 }
 0x480   : > { %3640 = vst.msk [vmem:[%s7634_s9 + $0x38] sm:$0xff] %vm3045_vm1, %v5049_v46  ;;  %v3418_v36 = vpop.f32.mrf.mxu1  ;;  %v3584_v28 = vpop.f32.mrf.mxu0 }
 0x481   : > { %3474 = vst.msk [vmem:[%s7628_s18 + $0x30] sm:$0xff] %vm3467_vm3, %v3418_v36 }
 0x482   : > { %3639 = vst.msk [vmem:[%s7634_s9 + $0x30] sm:$0xff] %vm3045_vm1, %v3584_v28  ;;  %v5020_v40 = vpop.f32.mrf.mxu1  ;;  %v5052_v37 = vpop.f32.mrf.mxu0 }
 0x483   : > { %3477 = vst.msk [vmem:[%s7628_s18 + $0x48] sm:$0xff] %vm3467_vm3, %v5020_v40 }
 0x484   : > { %3642 = vst.msk [vmem:[%s7634_s9 + $0x48] sm:$0xff] %vm3045_vm1, %v5052_v37  ;;  %v3428_v4 = vpop.f32.mrf.mxu1  ;;  %v3594_v45 = vpop.f32.mrf.mxu0 }
 0x485   : > { %3476 = vst.msk [vmem:[%s7628_s18 + $0x40] sm:$0xff] %vm3467_vm3, %v3428_v4 }
 0x486   : > { %3641 = vst.msk [vmem:[%s7634_s9 + $0x40] sm:$0xff] %vm3045_vm1, %v3594_v45  ;;  %v5023_v31 = vpop.f32.mrf.mxu1  ;;  %v5055_v42 = vpop.f32.mrf.mxu0 }
 0x487   : > { %3479 = vst.msk [vmem:[%s7628_s18 + $0x58] sm:$0xff] %vm3467_vm3, %v5023_v31 }
 0x488   : > { %3644 = vst.msk [vmem:[%s7634_s9 + $0x58] sm:$0xff] %vm3045_vm1, %v5055_v42  ;;  %v3438_v8 = vpop.f32.mrf.mxu1  ;;  %v3604_v5 = vpop.f32.mrf.mxu0 }
 0x489   : > { %3478 = vst.msk [vmem:[%s7628_s18 + $0x50] sm:$0xff] %vm3467_vm3, %v3438_v8 }
 0x48a   : > { %3643 = vst.msk [vmem:[%s7634_s9 + $0x50] sm:$0xff] %vm3045_vm1, %v3604_v5  ;;  %v5026_v3 = vpop.f32.mrf.mxu1  ;;  %v5058_v15 = vpop.f32.mrf.mxu0 }
 0x48b   : > { %3481 = vst.msk [vmem:[%s7628_s18 + $0x68] sm:$0xff] %vm3467_vm3, %v5026_v3 }
 0x48c   : > { %3646 = vst.msk [vmem:[%s7634_s9 + $0x68] sm:$0xff] %vm3045_vm1, %v5058_v15  ;;  %v3448_v14 = vpop.f32.mrf.mxu1  ;;  %v3614_v12 = vpop.f32.mrf.mxu0 }
 0x48d   : > { %3480 = vst.msk [vmem:[%s7628_s18 + $0x60] sm:$0xff] %vm3467_vm3, %v3448_v14 }
 0x48e   : > { %3645 = vst.msk [vmem:[%s7634_s9 + $0x60] sm:$0xff] %vm3045_vm1, %v3614_v12  ;;  %v5029_v43 = vpop.f32.mrf.mxu1  ;;  %v5061_v52 = vpop.f32.mrf.mxu0 }
 0x48f   : > { %3483 = vst.msk [vmem:[%s7628_s18 + $0x78] sm:$0xff] %vm3467_vm3, %v5029_v43 }
 0x490   : > { %3648 = vst.msk [vmem:[%s7634_s9 + $0x78] sm:$0xff] %vm3045_vm1, %v5061_v52  ;;  %v3458_v60 = vpop.f32.mrf.mxu1  ;;  %v3624_v33 = vpop.f32.mrf.mxu0 }
 0x491   : > { %3482 = vst.msk [vmem:[%s7628_s18 + $0x70] sm:$0xff] %vm3467_vm3, %v3458_v60 }
 0x492   : > { %3647 = vst.msk [vmem:[%s7634_s9 + $0x70] sm:$0xff] %vm3045_vm1, %v3624_v33 }
 0x493 PF: > { %s18_s24 = sadd.s32 1, %s5189_s24  }
 0x494   : > { %p15_p4 = scmp.ge.s32.totalorder %s18_s24, 4  }
 0x496   :  { %17 = sbr.rel (!%p15_p4) target bundleno = 1 (0x1), region = 94 }

</bundles_post_ra>
